<compile_context>
chip_gen: v6e
topology: v6e:2x2x1
jax: 0.10.0
libtpu: 0.0.40
codegen_flags: <defaults>
</compile_context>

<pallas_src>
import numpy as np
import jax
import jax.numpy as jnp
from jax import lax
from jax.experimental import pallas as pl
from jax.experimental.pallas import tpu as pltpu

EPS = 1e-5     # PyTorch BatchNorm2d default
LANE = 128     # TPU lane width: intermediate (VMEM-only) channel dim is lane-padded


def _round_up(c, m=LANE):
    return ((c + m - 1) // m) * m


def _vmem_capacity_bytes():
    try:
        cap = getattr(pltpu.get_tpu_info(), "vmem_capacity_bytes", None)
        if cap:
            return int(cap)
    except Exception:
        pass
    return 64 * 2 ** 20   # conservative: v7x per-TensorCore VMEM


def _estimate_vmem_bytes(TH, H, W, Cin, Wp, Cout):
    act = 2 * H * W * Cin * 2                        # double-buffered bf16 input image block
    out = 2 * TH * W * Cout * 2                      # double-buffered bf16 output row tile
    wts = 2 * (Cin * Wp + 9 * Wp * Wp + Wp * Cout) * 2 + 2 * (2 * Wp + Cout) * 4
    scr = (TH + 4) * (W + 2) * Wp * 2                # bf16 conv2 staging scratch
    tmp = ((TH + 4) * W * 3 * Wp * 2                 # kw-im2col value (bf16)
           + (TH + 2) * W * Wp * 4                   # conv1 f32 result
           + 3 * TH * W * Wp * 4)                    # conv2/conv3 f32 temporaries
    return act + out + wts + scr + tmp


def _choose_row_tile(H, W, Cin, Wp, Cout, budget):
    """Largest divisor of H whose VMEM estimate fits the budget (halo needs H>=TH+2)."""
    best = None
    for d in range(1, H + 1):
        if H % d:
            continue
        if d != H and H < d + 2:
            continue
        if best is None:
            best = d
        if _estimate_vmem_bytes(d, H, W, Cin, Wp, Cout) <= budget:
            best = d
    return best


# -----------------------------------------------------------------------------
# Kernel: one (batch, row-tile) grid step of the fused Bottleneck
# -----------------------------------------------------------------------------
def bottleneck_kernel(x_ref, w1_ref, b1_ref, w2_ref, b2_ref, w3_ref, b3_ref,
                      out_ref, o1p_ref):
    """
    x_ref   : (1, H, W, Cin)    bf16 full image of the current batch element (resident)
    w1_ref  : (Cin, Wp)         bf16, BN1 scale folded
    w2_ref  : (3, 3*Wp, Wp)     bf16, [kh, kw*Wp+ci, co], BN2 scale folded
    w3_ref  : (Wp, Cout)        bf16, BN3 scale folded
    b*_ref  : (1, C)            f32 folded BN biases
    out_ref : (1, TH, W, Cout)  bf16 output row tile
    o1p_ref : (TH+4, W+2, Wp)   bf16 scratch: conv1 output for image rows r0-2..r0+TH+1
                                plus a 1-px zero border; conv2 taps read rows 1..TH+2.
    """
    _, H, W, Cin = x_ref.shape
    _, TH, _, Cout = out_ref.shape
    Wp = w1_ref.shape[1]
    K2 = 3 * Wp

    r0 = pl.multiple_of(pl.program_id(1) * TH, TH)

    # ---- zero the conv2 padding: border columns + out-of-image halo rows.
    # (scratch persists across grid steps / cores, so re-zero every step) ----
    zcol = jnp.zeros((TH + 4, 1, Wp), jnp.bfloat16)
    zrow = jnp.zeros((1, W, Wp), jnp.bfloat16)
    o1p_ref[:, 0:1, :] = zcol
    o1p_ref[:, W + 1:W + 2, :] = zcol
    o1p_ref[1:2, 1:W + 1, :] = zrow              # image row r0-1 (stays zero on first tile)
    o1p_ref[TH + 2:TH + 3, 1:W + 1, :] = zrow    # image row r0+TH (stays zero on last tile)

    # ---- conv1 (1x1) + bn1 bias + relu: ONE fused MXU dot over tile + halo rows ----
    if TH == H:                   # whole image per step: no halo rows exist
        nrows, src0, dst0 = H, 0, 2
    else:
        nrows = TH + 2
        # Clamped window start (never OOB); dst0 in {0,1,2} realigns the window in
        # the scratch so out-of-image halo rows keep the zeros written above.
        src0 = jnp.clip(r0 - 1, 0, H - nrows)
        dst0 = src0 - r0 + 2
    x_win = x_ref[0, pl.ds(src0, nrows), :, :].reshape(nrows * W, Cin)
    o1 = jnp.dot(x_win, w1_ref[...], preferred_element_type=jnp.float32)
    o1 = jnp.maximum(o1 + b1_ref[...], 0.0).astype(jnp.bfloat16)
    o1p_ref[pl.ds(dst0, nrows), 1:W + 1, :] = o1.reshape(nrows, W, Wp)

    # ---- conv2 (3x3, stride 1, pad 1): kw-im2col once, then 3 MXU dots with K = 3*Wp ----
    o1pad = o1p_ref[...]                                       # (TH+4, W+2, Wp) bf16
    p = jnp.concatenate([o1pad[:, 0:W, :], o1pad[:, 1:W + 1, :],
                         o1pad[:, 2:W + 2, :]], axis=-1)       # (TH+4, W, 3*Wp)
    acc = jnp.dot(p[1:1 + TH].reshape(TH * W, K2), w2_ref[0],
                  preferred_element_type=jnp.float32)
    acc = acc + jnp.dot(p[2:2 + TH].reshape(TH * W, K2), w2_ref[1],
                        preferred_element_type=jnp.float32)
    acc = acc + jnp.dot(p[3:3 + TH].reshape(TH * W, K2), w2_ref[2],
                        preferred_element_type=jnp.float32)
    o2 = jnp.maximum(acc + b2_ref[...], 0.0).astype(jnp.bfloat16)

    # ---- conv3 (1x1) + bn3 bias + residual add + relu ----
    o3 = jnp.dot(o2, w3_ref[...], preferred_element_type=jnp.float32)
    # Re-load the residual tile from the resident input block right before the add.
    x_res = x_ref[0, pl.ds(r0, TH), :, :].reshape(TH * W, Cin)
    o3 = o3 + b3_ref[...] + x_res.astype(jnp.float32)          # identity: Cin == Cout
    out_ref[...] = jnp.maximum(o3, 0.0).astype(out_ref.dtype).reshape(1, TH, W, Cout)


# -----------------------------------------------------------------------------
# Wrappers
# -----------------------------------------------------------------------------
def bottleneck_pallas_nhwc(x, prep, *, row_tile=None):
    """x: bf16 NHWC activations [N, H, W, Cin] -> bf16 [N, H, W, Cout]."""
    N, H, W, Cin = x.shape
    Wp, Cout = prep["Wp"], prep["cout"]
    assert Cin == prep["cin"] and Cin == Cout, \
        "downsample=None requires inplanes == planes * expansion"
    # TODO(synk): pad W (and mask the conv2 border) for stages where W % 8 != 0 (28/14/7).
    assert W % 8 == 0, "W must be a multiple of 8 for sublane-dense reshapes/stores"

    cap = _vmem_capacity_bytes()
    TH = row_tile if row_tile is not None else \
        _choose_row_tile(H, W, Cin, Wp, Cout, budget=int(0.40 * cap))
    assert H % TH == 0 and (TH == H or H >= TH + 2), "row tile must divide H"

    est = _estimate_vmem_bytes(TH, H, W, Cin, Wp, Cout)
    vmem_limit = int(min(int(0.90 * cap), max(32 * 2 ** 20, 2 * est)))
    grid = (N, H // TH)

    return pl.pallas_call(
        bottleneck_kernel,
        out_shape=jax.ShapeDtypeStruct((N, H, W, Cout), jnp.bfloat16),
        grid_spec=pltpu.PrefetchScalarGridSpec(
            num_scalar_prefetch=0,
            grid=grid,
            in_specs=[
                # Whole image: constant index along the row axis -> VMEM-resident per image.
                pl.BlockSpec((1, H, W, Cin), lambda n, r: (n, 0, 0, 0)),
                # TODO(synk): single-buffer these constant weight specs (pipeline_mode=
                # pl.Buffered(1)) to save VMEM for larger TH on v7x.
                pl.BlockSpec((Cin, Wp), lambda n, r: (0, 0)),              # w1
                pl.BlockSpec((1, Wp), lambda n, r: (0, 0)),                # b1
                pl.BlockSpec((3, 3 * Wp, Wp), lambda n, r: (0, 0, 0)),     # w2 (kw-concat K)
                pl.BlockSpec((1, Wp), lambda n, r: (0, 0)),                # b2
                pl.BlockSpec((Wp, Cout), lambda n, r: (0, 0)),             # w3
                pl.BlockSpec((1, Cout), lambda n, r: (0, 0)),              # b3
            ],
            out_specs=pl.BlockSpec((1, TH, W, Cout), lambda n, r: (n, r, 0, 0)),
            scratch_shapes=[pltpu.VMEM((TH + 4, W + 2, Wp), jnp.bfloat16)],
        ),
        compiler_params=pltpu.CompilerParams(
            dimension_semantics=("parallel", "parallel"),
            vmem_limit_bytes=vmem_limit,
        ),
    )(x, prep["w1"], prep["b1"], prep["w2"], prep["b2"], prep["w3"], prep["b3"])


def bottleneck_forward_nchw(x_nchw, prep, *, row_tile=None):
    """PyTorch-style NCHW in / NCHW out convenience wrapper (bf16 activations in HBM)."""
    x = jnp.transpose(x_nchw, (0, 2, 3, 1)).astype(jnp.bfloat16)
    out = bottleneck_pallas_nhwc(x, prep, row_tile=row_tile)
    return jnp.transpose(out, (0, 3, 1, 2))


# -----------------------------------------------------------------------------
# Parameter construction (synthetic, deterministic) + host-side preparation
# -----------------------------------------------------------------------------
def fold_bn(gamma, beta, mean, var):
    scale = gamma / jnp.sqrt(var + EPS)
    bias = beta - mean * scale
    return scale, bias


def make_raw_params(key, inplanes, planes, base_width=64, groups=1):
    """PyTorch-layout (OIHW) conv weights + BatchNorm stats."""
    width = int(planes * (base_width / 64.0)) * groups
    cout = planes * 4  # expansion = 4
    ks = jax.random.split(key, 15)

    def bn(k0, k1, k2, k3, c):
        return (1.0 + 0.1 * jax.random.normal(k0, (c,), jnp.float32),
                0.1 * jax.random.normal(k1, (c,), jnp.float32),
                0.1 * jax.random.normal(k2, (c,), jnp.float32),
                jnp.abs(jax.random.normal(k3, (c,), jnp.float32)) + 0.5)

    w1 = 0.1 * jax.random.normal(ks[0], (width, inplanes, 1, 1), jnp.float32)
    w2 = 0.1 * jax.random.normal(ks[1], (width, width, 3, 3), jnp.float32)
    w3 = 0.1 * jax.random.normal(ks[2], (cout, width, 1, 1), jnp.float32)
    return dict(w1=w1, w2=w2, w3=w3, bn1=bn(*ks[3:7], width),
                bn2=bn(*ks[7:11], width), bn3=bn(*ks[11:15], cout))


def prepare_params(raw, inplanes, planes, base_width=64, groups=1):
    """Fold BN scales into weights, pad ONLY the intermediate width to a lane multiple."""
    width = int(planes * (base_width / 64.0)) * groups
    cout = planes * 4
    Wp = _round_up(width)

    s1, b1 = fold_bn(*raw["bn1"])
    s2, b2 = fold_bn(*raw["bn2"])
    s3, b3 = fold_bn(*raw["bn3"])

    # conv1: OIHW -> (Cin, width), BN1 scale folded, pad output to Wp.
    w1 = jnp.transpose(raw["w1"][:, :, 0, 0], (1, 0)) * s1[None, :]
    w1p = jnp.zeros((inplanes, Wp), jnp.float32).at[:, :width].set(w1).astype(jnp.bfloat16)
    # conv2: OIHW -> HWIO, BN2 scale folded, pad I/O to Wp, reshape to (3, 3*Wp, Wp)
    # with K ordered (kw, ci) to match the in-kernel kw-im2col concat.
    w2 = jnp.transpose(raw["w2"], (2, 3, 1, 0)) * s2[None, None, None, :]
    w2p = jnp.zeros((3, 3, Wp, Wp), jnp.float32).at[:, :, :width, :width].set(w2)
    w2p = w2p.reshape(3, 3 * Wp, Wp).astype(jnp.bfloat16)
    # conv3: OIHW -> (width, cout), BN3 scale folded, pad input to Wp.
    w3 = jnp.transpose(raw["w3"][:, :, 0, 0], (1, 0)) * s3[None, :]
    w3p = jnp.zeros((Wp, cout), jnp.float32).at[:width, :].set(w3).astype(jnp.bfloat16)

    b1p = jnp.zeros((1, Wp), jnp.float32).at[0, :width].set(b1)
    b2p = jnp.zeros((1, Wp), jnp.float32).at[0, :width].set(b2)
    b3p = b3.reshape(1, cout).astype(jnp.float32)

    return dict(w1=w1p, b1=b1p, w2=w2p, b2=b2p, w3=w3p, b3=b3p,
                cin=inplanes, width=width, Wp=Wp, cout=cout)


# -----------------------------------------------------------------------------
# Pure-JAX reference (same folded bf16 weights, bf16 stage casts, f32 accumulation)
# -----------------------------------------------------------------------------
def reference_forward_nhwc(x_bf16, prep):
    dn = ("NHWC", "HWIO", "NHWC")
    Wp = prep["Wp"]
    w1 = prep["w1"][None, None]                        # (1,1,Cin,Wp)
    w2 = prep["w2"].reshape(3, 3, Wp, Wp)              # (3,3,I,O) HWIO
    w3 = prep["w3"][None, None]                        # (1,1,Wp,Cout)

    o = lax.conv_general_dilated(x_bf16, w1, (1, 1), "VALID",
                                 dimension_numbers=dn, preferred_element_type=jnp.float32)
    o = jnp.maximum(o + prep["b1"][0], 0.0).astype(jnp.bfloat16)
    o = lax.conv_general_dilated(o, w2, (1, 1), ((1, 1), (1, 1)),
                                 dimension_numbers=dn, preferred_element_type=jnp.float32)
    o = jnp.maximum(o + prep["b2"][0], 0.0).astype(jnp.bfloat16)
    o = lax.conv_general_dilated(o, w3, (1, 1), "VALID",
                                 dimension_numbers=dn, preferred_element_type=jnp.float32)
    o = o + prep["b3"][0] + x_bf16.astype(jnp.float32)
    return jnp.maximum(o, 0.0)


if __name__ == "__main__":
    # downsample=None => inplanes == planes * 4 (residual add must be shape-valid)
    N, inplanes, planes, H, W = 2, 32, 8, 16, 16          # x: [2, 32, 16, 16] NCHW

    key = jax.random.PRNGKey(0)
    kx, kp = jax.random.split(key)
    x_nchw = jax.random.normal(kx, (N, inplanes, H, W), jnp.float32)

    raw = make_raw_params(kp, inplanes, planes)
    prep = prepare_params(raw, inplanes, planes)

    out = jax.block_until_ready(bottleneck_forward_nchw(x_nchw, prep))

    # Reference on the same bf16 NHWC input / folded bf16 weights.
    x_nhwc = jnp.transpose(x_nchw, (0, 2, 3, 1)).astype(jnp.bfloat16)
    ref = reference_forward_nhwc(x_nhwc, prep)
    ref_nchw = jnp.transpose(ref, (0, 3, 1, 2))

    assert out.shape == (N, planes * 4, H, W)
    out_f32 = np.asarray(out.astype(jnp.float32))
    ref_f32 = np.asarray(ref_nchw.astype(jnp.float32))
    np.testing.assert_allclose(out_f32, ref_f32, rtol=2e-2, atol=2e-2)
    print("KERNEL_OK")
</pallas_src>

<mosaic_0001>
module attributes {stable_mosaic.version = 11 : i64} {
  func.func @bottleneck_kernel(%arg0: i32, %arg1: i32, %arg2: memref<1x16x16x32xbf16, #tpu.memory_space<vmem>>, %arg3: memref<32x128xbf16, #tpu.memory_space<vmem>>, %arg4: memref<1x128xf32, #tpu.memory_space<vmem>>, %arg5: memref<3x384x128xbf16, #tpu.memory_space<vmem>>, %arg6: memref<1x128xf32, #tpu.memory_space<vmem>>, %arg7: memref<128x32xbf16, #tpu.memory_space<vmem>>, %arg8: memref<1x32xf32, #tpu.memory_space<vmem>>, %arg9: memref<1x16x16x32xbf16, #tpu.memory_space<vmem>>, %arg10: memref<20x18x128xbf16, #tpu.memory_space<vmem>>) attributes {dimension_semantics = [#tpu.dimension_semantics<parallel>, #tpu.dimension_semantics<parallel>], iteration_bounds = array<i64: 2, 1>, scalar_prefetch = 0 : i64, scratch_operands = 1 : i64, tpu.core_type = #tpu.core_type<tc>, window_params = [{transform_indices = @transform_0, window_bounds = array<i64: 1, 16, 16, 32>}, {pipeline_mode = #tpu.pipeline_mode<synchronous>, transform_indices = @transform_1, window_bounds = array<i64: 32, 128>}, {pipeline_mode = #tpu.pipeline_mode<synchronous>, transform_indices = @transform_2, window_bounds = array<i64: 1, 128>}, {pipeline_mode = #tpu.pipeline_mode<synchronous>, transform_indices = @transform_3, window_bounds = array<i64: 3, 384, 128>}, {pipeline_mode = #tpu.pipeline_mode<synchronous>, transform_indices = @transform_4, window_bounds = array<i64: 1, 128>}, {pipeline_mode = #tpu.pipeline_mode<synchronous>, transform_indices = @transform_5, window_bounds = array<i64: 128, 32>}, {pipeline_mode = #tpu.pipeline_mode<synchronous>, transform_indices = @transform_6, window_bounds = array<i64: 1, 32>}, {transform_indices = @transform_7, window_bounds = array<i64: 1, 16, 16, 32>}]} {
    %c16_i32 = arith.constant 16 : i32
    %0 = arith.muli %arg1, %c16_i32 : i32
    %1 = tpu.assume_multiple %0, 16 : i32
    %cst = arith.constant 0.000000e+00 : bf16
    %2 = vector.broadcast %cst : bf16 to vector<20x1x128xbf16>
    %cst_0 = arith.constant 0.000000e+00 : bf16
    %3 = vector.broadcast %cst_0 : bf16 to vector<1x16x128xbf16>
    %c0 = arith.constant 0 : index
    %c0_1 = arith.constant 0 : index
    %c0_2 = arith.constant 0 : index
    %4 = vector.load %arg10[%c0, %c0_1, %c0_2] : memref<20x18x128xbf16, #tpu.memory_space<vmem>>, vector<20x1x128xbf16>
    tpu.vector_store %arg10[%c0, %c0_1, %c0_2], %2 {strides = array<i32>} : memref<20x18x128xbf16, #tpu.memory_space<vmem>>, vector<20x1x128xbf16>,
    %c0_3 = arith.constant 0 : index
    %c17 = arith.constant 17 : index
    %c0_4 = arith.constant 0 : index
    %5 = vector.load %arg10[%c0_3, %c17, %c0_4] : memref<20x18x128xbf16, #tpu.memory_space<vmem>>, vector<20x1x128xbf16>
    tpu.vector_store %arg10[%c0_3, %c17, %c0_4], %2 {strides = array<i32>} : memref<20x18x128xbf16, #tpu.memory_space<vmem>>, vector<20x1x128xbf16>,
    %c1 = arith.constant 1 : index
    %c1_5 = arith.constant 1 : index
    %c0_6 = arith.constant 0 : index
    %6 = vector.load %arg10[%c1, %c1_5, %c0_6] : memref<20x18x128xbf16, #tpu.memory_space<vmem>>, vector<1x16x128xbf16>
    tpu.vector_store %arg10[%c1, %c1_5, %c0_6], %3 {strides = array<i32>} : memref<20x18x128xbf16, #tpu.memory_space<vmem>>, vector<1x16x128xbf16>,
    %c18 = arith.constant 18 : index
    %c1_7 = arith.constant 1 : index
    %c0_8 = arith.constant 0 : index
    %7 = vector.load %arg10[%c18, %c1_7, %c0_8] : memref<20x18x128xbf16, #tpu.memory_space<vmem>>, vector<1x16x128xbf16>
    tpu.vector_store %arg10[%c18, %c1_7, %c0_8], %3 {strides = array<i32>} : memref<20x18x128xbf16, #tpu.memory_space<vmem>>, vector<1x16x128xbf16>,
    %c0_9 = arith.constant 0 : index
    %c0_10 = arith.constant 0 : index
    %c0_11 = arith.constant 0 : index
    %c0_12 = arith.constant 0 : index
    %8 = vector.load %arg2[%c0_9, %c0_10, %c0_11, %c0_12] : memref<1x16x16x32xbf16, #tpu.memory_space<vmem>>, vector<1x16x16x32xbf16>
    %9 = vector.shape_cast %8 : vector<1x16x16x32xbf16> to vector<16x16x32xbf16>
    %10 = vector.shape_cast %9 : vector<16x16x32xbf16> to vector<256x32xbf16>
    %c0_13 = arith.constant 0 : index
    %c0_14 = arith.constant 0 : index
    %11 = vector.load %arg3[%c0_13, %c0_14] : memref<32x128xbf16, #tpu.memory_space<vmem>>, vector<32x128xbf16>
    %cst_15 = arith.constant dense<0.000000e+00> : vector<256x128xf32>
    %12 = tpu.matmul %10, %11, %cst_15 {dimension_numbers = #tpu.dot_dimension_numbers<[1], [0], [0], [1], [0, 0, 1, 1], [], []>} : vector<256x32xbf16>, vector<32x128xbf16>, vector<256x128xf32> -> vector<256x128xf32>
    %c0_16 = arith.constant 0 : index
    %c0_17 = arith.constant 0 : index
    %13 = vector.load %arg4[%c0_16, %c0_17] : memref<1x128xf32, #tpu.memory_space<vmem>>, vector<1x128xf32>
    %14 = vector.broadcast %13 : vector<1x128xf32> to vector<256x128xf32>
    %15 = arith.addf %12, %14 : vector<256x128xf32>
    %cst_18 = arith.constant 0.000000e+00 : f32
    %16 = vector.broadcast %cst_18 : f32 to vector<256x128xf32>
    %17 = arith.maximumf %15, %16 : vector<256x128xf32>
    %18 = arith.truncf %17 : vector<256x128xf32> to vector<256x128xbf16>
    %19 = vector.shape_cast %18 : vector<256x128xbf16> to vector<16x16x128xbf16>
    %c2 = arith.constant 2 : index
    %c1_19 = arith.constant 1 : index
    %c0_20 = arith.constant 0 : index
    %20 = vector.load %arg10[%c2, %c1_19, %c0_20] : memref<20x18x128xbf16, #tpu.memory_space<vmem>>, vector<16x16x128xbf16>
    tpu.vector_store %arg10[%c2, %c1_19, %c0_20], %19 {strides = array<i32>} : memref<20x18x128xbf16, #tpu.memory_space<vmem>>, vector<16x16x128xbf16>,
    %c0_21 = arith.constant 0 : index
    %c0_22 = arith.constant 0 : index
    %c0_23 = arith.constant 0 : index
    %21 = vector.load %arg10[%c0_21, %c0_22, %c0_23] : memref<20x18x128xbf16, #tpu.memory_space<vmem>>, vector<20x18x128xbf16>
    %22 = vector.extract_strided_slice %21 {offsets = [0, 0, 0], sizes = [20, 16, 128], strides = [1, 1, 1]} : vector<20x18x128xbf16> to vector<20x16x128xbf16>
    %23 = vector.extract_strided_slice %21 {offsets = [0, 1, 0], sizes = [20, 16, 128], strides = [1, 1, 1]} : vector<20x18x128xbf16> to vector<20x16x128xbf16>
    %24 = vector.extract_strided_slice %21 {offsets = [0, 2, 0], sizes = [20, 16, 128], strides = [1, 1, 1]} : vector<20x18x128xbf16> to vector<20x16x128xbf16>
    %25 = tpu.concatenate %22, %23, %24 in 2 : vector<20x16x128xbf16>, vector<20x16x128xbf16>, vector<20x16x128xbf16> -> vector<20x16x384xbf16>
    %26 = vector.extract_strided_slice %25 {offsets = [1, 0, 0], sizes = [16, 16, 384], strides = [1, 1, 1]} : vector<20x16x384xbf16> to vector<16x16x384xbf16>
    %27 = vector.shape_cast %26 : vector<16x16x384xbf16> to vector<256x384xbf16>
    %c0_24 = arith.constant 0 : index
    %c0_25 = arith.constant 0 : index
    %c0_26 = arith.constant 0 : index
    %28 = vector.load %arg5[%c0_24, %c0_25, %c0_26] : memref<3x384x128xbf16, #tpu.memory_space<vmem>>, vector<1x384x128xbf16>
    %29 = vector.shape_cast %28 : vector<1x384x128xbf16> to vector<384x128xbf16>
    %cst_27 = arith.constant dense<0.000000e+00> : vector<256x128xf32>
    %30 = tpu.matmul %27, %29, %cst_27 {dimension_numbers = #tpu.dot_dimension_numbers<[1], [0], [0], [1], [0, 0, 1, 1], [], []>} : vector<256x384xbf16>, vector<384x128xbf16>, vector<256x128xf32> -> vector<256x128xf32>
    %31 = vector.extract_strided_slice %25 {offsets = [2, 0, 0], sizes = [16, 16, 384], strides = [1, 1, 1]} : vector<20x16x384xbf16> to vector<16x16x384xbf16>
    %32 = vector.shape_cast %31 : vector<16x16x384xbf16> to vector<256x384xbf16>
    %c1_28 = arith.constant 1 : index
    %c0_29 = arith.constant 0 : index
    %c0_30 = arith.constant 0 : index
    %33 = vector.load %arg5[%c1_28, %c0_29, %c0_30] : memref<3x384x128xbf16, #tpu.memory_space<vmem>>, vector<1x384x128xbf16>
    %34 = vector.shape_cast %33 : vector<1x384x128xbf16> to vector<384x128xbf16>
    %cst_31 = arith.constant dense<0.000000e+00> : vector<256x128xf32>
    %35 = tpu.matmul %32, %34, %cst_31 {dimension_numbers = #tpu.dot_dimension_numbers<[1], [0], [0], [1], [0, 0, 1, 1], [], []>} : vector<256x384xbf16>, vector<384x128xbf16>, vector<256x128xf32> -> vector<256x128xf32>
    %36 = arith.addf %30, %35 : vector<256x128xf32>
    %37 = vector.extract_strided_slice %25 {offsets = [3, 0, 0], sizes = [16, 16, 384], strides = [1, 1, 1]} : vector<20x16x384xbf16> to vector<16x16x384xbf16>
    %38 = vector.shape_cast %37 : vector<16x16x384xbf16> to vector<256x384xbf16>
    %c2_32 = arith.constant 2 : index
    %c0_33 = arith.constant 0 : index
    %c0_34 = arith.constant 0 : index
    %39 = vector.load %arg5[%c2_32, %c0_33, %c0_34] : memref<3x384x128xbf16, #tpu.memory_space<vmem>>, vector<1x384x128xbf16>
    %40 = vector.shape_cast %39 : vector<1x384x128xbf16> to vector<384x128xbf16>
    %cst_35 = arith.constant dense<0.000000e+00> : vector<256x128xf32>
    %41 = tpu.matmul %38, %40, %cst_35 {dimension_numbers = #tpu.dot_dimension_numbers<[1], [0], [0], [1], [0, 0, 1, 1], [], []>} : vector<256x384xbf16>, vector<384x128xbf16>, vector<256x128xf32> -> vector<256x128xf32>
    %42 = arith.addf %36, %41 : vector<256x128xf32>
    %c0_36 = arith.constant 0 : index
    %c0_37 = arith.constant 0 : index
    %43 = vector.load %arg6[%c0_36, %c0_37] : memref<1x128xf32, #tpu.memory_space<vmem>>, vector<1x128xf32>
    %44 = vector.broadcast %43 : vector<1x128xf32> to vector<256x128xf32>
    %45 = arith.addf %42, %44 : vector<256x128xf32>
    %cst_38 = arith.constant 0.000000e+00 : f32
    %46 = vector.broadcast %cst_38 : f32 to vector<256x128xf32>
    %47 = arith.maximumf %45, %46 : vector<256x128xf32>
    %48 = arith.truncf %47 : vector<256x128xf32> to vector<256x128xbf16>
    %c0_39 = arith.constant 0 : index
    %c0_40 = arith.constant 0 : index
    %49 = vector.load %arg7[%c0_39, %c0_40] : memref<128x32xbf16, #tpu.memory_space<vmem>>, vector<128x32xbf16>
    %cst_41 = arith.constant dense<0.000000e+00> : vector<256x32xf32>
    %50 = tpu.matmul %48, %49, %cst_41 {dimension_numbers = #tpu.dot_dimension_numbers<[1], [0], [0], [1], [0, 0, 1, 1], [], []>} : vector<256x128xbf16>, vector<128x32xbf16>, vector<256x32xf32> -> vector<256x32xf32>
    %c0_42 = arith.constant 0 : index
    %51 = arith.index_cast %1 : i32 to index
    %c0_43 = arith.constant 0 : index
    %c0_44 = arith.constant 0 : index
    %52 = vector.load %arg2[%c0_42, %51, %c0_43, %c0_44] : memref<1x16x16x32xbf16, #tpu.memory_space<vmem>>, vector<1x16x16x32xbf16>
    %53 = vector.shape_cast %52 : vector<1x16x16x32xbf16> to vector<16x16x32xbf16>
    %54 = vector.shape_cast %53 : vector<16x16x32xbf16> to vector<256x32xbf16>
    %c0_45 = arith.constant 0 : index
    %c0_46 = arith.constant 0 : index
    %55 = vector.load %arg8[%c0_45, %c0_46] : memref<1x32xf32, #tpu.memory_space<vmem>>, vector<1x32xf32>
    %56 = vector.broadcast %55 : vector<1x32xf32> to vector<256x32xf32>
    %57 = arith.addf %50, %56 : vector<256x32xf32>
    %58 = arith.extf %54 : vector<256x32xbf16> to vector<256x32xf32>
    %59 = arith.addf %57, %58 : vector<256x32xf32>
    %cst_47 = arith.constant 0.000000e+00 : f32
    %60 = vector.broadcast %cst_47 : f32 to vector<256x32xf32>
    %61 = arith.maximumf %59, %60 : vector<256x32xf32>
    %62 = arith.truncf %61 : vector<256x32xf32> to vector<256x32xbf16>
    %63 = vector.shape_cast %62 : vector<256x32xbf16> to vector<1x16x16x32xbf16>
    %c0_48 = arith.constant 0 : index
    %c0_49 = arith.constant 0 : index
    %c0_50 = arith.constant 0 : index
    %c0_51 = arith.constant 0 : index
    %64 = vector.load %arg9[%c0_48, %c0_49, %c0_50, %c0_51] : memref<1x16x16x32xbf16, #tpu.memory_space<vmem>>, vector<1x16x16x32xbf16>
    tpu.vector_store %arg9[%c0_48, %c0_49, %c0_50, %c0_51], %63 {strides = array<i32>} : memref<1x16x16x32xbf16, #tpu.memory_space<vmem>>, vector<1x16x16x32xbf16>,
    return
  }
  func.func @transform_0(%arg0: i32, %arg1: i32) -> (i32, i32, i32, i32) {
    %c0_i32 = arith.constant 0 : i32
    %c0_i32_0 = arith.constant 0 : i32
    %c0_i32_1 = arith.constant 0 : i32
    %c0_i32_2 = arith.constant 0 : i32
    return %arg0, %c0_i32, %c0_i32_0, %c0_i32_1 : i32, i32, i32, i32
  }
  func.func @transform_1(%arg0: i32, %arg1: i32) -> (i32, i32) {
    %c0_i32 = arith.constant 0 : i32
    %c0_i32_0 = arith.constant 0 : i32
    %c0_i32_1 = arith.constant 0 : i32
    return %c0_i32, %c0_i32_0 : i32, i32
  }
  func.func @transform_2(%arg0: i32, %arg1: i32) -> (i32, i32) {
    %c0_i32 = arith.constant 0 : i32
    %c0_i32_0 = arith.constant 0 : i32
    %c0_i32_1 = arith.constant 0 : i32
    return %c0_i32, %c0_i32_0 : i32, i32
  }
  func.func @transform_3(%arg0: i32, %arg1: i32) -> (i32, i32, i32) {
    %c0_i32 = arith.constant 0 : i32
    %c0_i32_0 = arith.constant 0 : i32
    %c0_i32_1 = arith.constant 0 : i32
    %c0_i32_2 = arith.constant 0 : i32
    return %c0_i32, %c0_i32_0, %c0_i32_1 : i32, i32, i32
  }
  func.func @transform_4(%arg0: i32, %arg1: i32) -> (i32, i32) {
    %c0_i32 = arith.constant 0 : i32
    %c0_i32_0 = arith.constant 0 : i32
    %c0_i32_1 = arith.constant 0 : i32
    return %c0_i32, %c0_i32_0 : i32, i32
  }
  func.func @transform_5(%arg0: i32, %arg1: i32) -> (i32, i32) {
    %c0_i32 = arith.constant 0 : i32
    %c0_i32_0 = arith.constant 0 : i32
    %c0_i32_1 = arith.constant 0 : i32
    return %c0_i32, %c0_i32_0 : i32, i32
  }
  func.func @transform_6(%arg0: i32, %arg1: i32) -> (i32, i32) {
    %c0_i32 = arith.constant 0 : i32
    %c0_i32_0 = arith.constant 0 : i32
    %c0_i32_1 = arith.constant 0 : i32
    return %c0_i32, %c0_i32_0 : i32, i32
  }
  func.func @transform_7(%arg0: i32, %arg1: i32) -> (i32, i32, i32, i32) {
    %c0_i32 = arith.constant 0 : i32
    %c0_i32_0 = arith.constant 0 : i32
    %c0_i32_1 = arith.constant 0 : i32
    return %arg0, %arg1, %c0_i32, %c0_i32_0 : i32, i32, i32, i32
  }
}

</mosaic_0001>

<bundles_post_ra>
// kernel: tpu_custom_call.1
= control target key start
LH: loop header
LB: loop body
LE: loop exit
PB: predicated region body
PF: predicated region fallthrough
CT: control target
= control target key end

     0   :  { %s7085_s0 = inlined_call_operand.hbm [shape: bf16[2,16,16,32], index: 0, kind: input, shape index: {}]   ;;  %s7086_s1 = inlined_call_operand.vmem [shape: bf16[32,128], index: 1, kind: input, shape index: {}]   ;;  %s7087_s2 = inlined_call_operand.vmem [shape: f32[1,128], index: 2, kind: input, shape index: {}]   ;;  %s7088_s3 = inlined_call_operand.hbm [shape: bf16[3,384,128], index: 3, kind: input, shape index: {}]   ;;  %s7089_s4 = inlined_call_operand.vmem [shape: f32[1,128], index: 4, kind: input, shape index: {}]   ;;  %s7090_s5 = inlined_call_operand.vmem [shape: bf16[128,32], index: 5, kind: input, shape index: {}]   ;;  %s7091_s6 = inlined_call_operand.vmem [shape: f32[1,32], index: 6, kind: input, shape index: {}]   ;;  %s7092_s7 = inlined_call_operand.hbm [shape: bf16[2,16,16,32], index: 7, kind: output, shape index: {}]  }
   0x1   :  { %7104 = sst [smem:[#allocation18_spill]] %s7088_s3 }
   0x2   :  { %12 = vsyncpa [#allocation4], 0 }
   0x3   :  { %14 = vsyncpa [#allocation4 + $0x1], 0 }
   0x4   :  { %15 = vsyncpa [#allocation7], 0 }
   0x5   :  { %16 = vsyncpa [#allocation5], 0 }
   0x6   :  { %18 = vsyncpa [#allocation5 + $0x1], 0  ;;  %s5672_s24 = smov 0   ;;  %s5674_s25 = smov 0  }
   0x7   :  { %s5676_s26 = smov 0   ;;  %s5678_s27 = smov 0  }
   0x8   :  { %s5680_s28 = smov 0   ;;  %s5682_s29 = smov 0  }
   0x9 LB: > { %7105 = sst [smem:[#allocation12_spill]] %s5618_s28  ;;  %s4204_s30 = sadd.s32 4294967295, %s5622_s29   ;;  %s5622_s29 = sphi %s5682_s29, %s24_s29   ;;  %s5618_s28 = sphi %s5680_s28, %s7139_s28   ;;  %s5614_s27 = sphi %s5678_s27, %s7138_s27   ;;  %s5610_s26 = sphi %s5676_s26, %s7142_s26   ;;  %s5606_s25 = sphi %s5674_s25, %s7141_s25   ;;  %s5602_s24 = sphi %s5672_s24, %s7140_s24  }
   0xa   : > { %s4205_s8 = sadd.s32 4294967294, %s5622_s29   ;;  %p56_p0 = scmp.ne.s32.totalorder %s5606_s25, %s5602_s24 }
   0xb   : > { %p5706_p1 = scmp.eq.s32.totalorder %s4204_s30, 0  ;;  %p5710_p2 = scmp.eq.s32.totalorder %s4204_s30, 1 }
   0xc   : > { %p214_p3 = scmp.eq.s32.totalorder %s4205_s8, 1  ;;  %p4206_p5 = scmp.ge.s32.totalorder %s5622_s29, 1 }
   0xd   : > { %p5716_p4 = por %p5706_p1, %p56_p0  ;;  %p221_p7 = scmp.lt.s32.totalorder %s5622_s29, 3 }
   0xe   : > { %p5721_p6 = por %p214_p3, %p56_p0  ;;  %s5624_s14 = smov [#allocation6]  }
   0xf   : > { %s7108_s11 = scalar_select %p5716_p4, 1, 0 }
  0x10   : > { %s7109_s12 = scalar_select %p5721_p6, 1, 0 }
  0x11   : > { %p5726_p8 = pnand %p4206_p5, %p221_p7  ;;  %s239_s15 = sshll.u32 %s5624_s14, 4  ;;  %s240_s15 = int_to_ptr.vmem [resolvable:$true] %s239_s15 }
  0x12   : > { %7110 = sst [smem:[#allocation13_spill]] %s7109_s12  ;;  %s36_s17 = sadd.s32 1, %s5618_s28 }
  0x13   : > { %p5273_p9 = pneg %p5726_p8  ;;  %s5495_s18 = scalar_lea.vmem %s240_s15, 9216 }
  0x14   : > { %p5496_p13 = scmp.ne.s32.totalorder %s240_s15, %s5495_s18  ;;  %p5503_p5 = scmp.lt.s32.totalorder %s240_s15, %s240_s15 }
  0x15   : > { %p5735_p11 = pnand %p5273_p9, %p5706_p1  ;;  %p5504_p7 = scmp.lt.s32.totalorder %s5495_s18, %s5495_s18 }
  0x17   : > { %p5486_p12 = pneg %p5735_p11  ;;  %p5505_p6 = por %p5504_p7, %p5503_p5 }
  0x19   : > { %p5498_p0 = pnand %p5496_p13, %p5486_p12 }
  0x1b   : > { %p5499_p3 = pneg %p5498_p0 }
  0x1d   : > { %p5506_p4 = pnand %p5505_p6, %p5499_p3 }
  0x1f   : > { %5509 = shalt.err (!%p5506_p4)
}
  0x20   : > { %s7094_s19 = smov 64   ;;  %s7095_s20 = smov 4  }
  0x21   : > { %s7113_s3 = sld [smem:[#allocation18_spill]]  ;;  %p38_p4 = scmp.ge.s32.totalorder %s36_s17, 2 }
  0x22   : > { %s43_s23 = sadd.s32 1, %s5610_s26  ;;  %p50_p6 = scmp.ne.s32.totalorder %s5610_s26, %s5606_s25 }
  0x23   : > { %p51_p9 = scmp.eq.s32.totalorder %s5622_s29, 0  ;;  %s7144_s17 = smov (%p38_p4, %s36_s17), 0 }
  0x24   : > { %7114 = sst [smem:[#allocation14_spill]] %s7144_s17  ;;  %p5762_p13 = por %p5710_p2, %p50_p6 }
  0x25   : > { %p5756_p12 = por %p51_p9, %p50_p6  ;;  %s40_s14 = ssub.s32 %s5618_s28, %s7144_s17 }
  0x26   : > { %p5286_p0 = scmp.lt.s32.totalorder %s5622_s29, 2  ;;  %s4438_s21 = sshll.u32 %s5618_s28, 11 }
  0x27   : > { %5276 = dma.hbm_to_vmem [thread:$0]  (!%p5735_p11), %s7113_s3, 9216, %s240_s15, [#allocation7], %s7094_s19, %s7094_s19, %s7095_s20  }
  0x28   : > { %p41_p11 = scmp.eq.s32.totalorder %s40_s14, 0  ;;  %s262_s15 = sand.u32 1, %s5610_s26  }
  0x29   : > { %s4209_s16 = sshll.u32 %s262_s15, 7  ;;  %s272_s20 = scalar_lea.hbm %s7085_s0, %s4438_s21 }
  0x2a   : > { %s5771_s18 = scalar_select %p41_p11, %s5610_s26, %s43_s23  }
  0x2b   : > { %s266_s3 = scalar_lea.vmem [#allocation3], %s4209_s16  ;;  %p5779_p2 = pnand %p5286_p0, %p5756_p12 }
  0x2c   : > { %s273_s12 = sshll.u32 %s266_s3, 4  ;;  %s263_s17 = scalar_lea.sflag [#allocation4], %s262_s15  ;;  %s274_s12 = int_to_ptr.vmem [resolvable:$true] %s273_s12 }
  0x2d   : > { %p5512_p3 = pneg %p5779_p2  ;;  %s5523_s14 = scalar_lea.vmem %s274_s12, 2048 }
  0x2e   : > { %p5524_p5 = scmp.ne.s32.totalorder %s274_s12, %s5523_s14  ;;  %s5627_s23 = smov [#allocation3]  }
  0x2f   : > { %s5528_s28 = sshll.u32 %s5627_s23, 4  ;;  %s5529_s28 = int_to_ptr.vmem [resolvable:$false] %s5528_s28 }
  0x30   : > { %p5526_p7 = pnand %p5524_p5, %p5512_p3  ;;  %s5530_s19 = scalar_lea.vmem %s5529_s28, 4096 }
  0x31   : > { %p5531_p6 = scmp.lt.s32.totalorder %s274_s12, %s5529_s28  ;;  %p5532_p9 = scmp.lt.s32.totalorder %s5530_s19, %s5523_s14 }
  0x32   : > { %p5527_p4 = pneg %p5526_p7 }
  0x33   : > { %p5533_p11 = por %p5532_p9, %p5531_p6 }
  0x35   : > { %p5534_p10 = pnand %p5533_p11, %p5527_p4 }
  0x37   : > { %5537 = shalt.err (!%p5534_p10)
}
  0x38   : > { %s7118_s3 = smov 4   ;;  %s7119_s30 = smov 64  }
  0x39   : > { %5280 = dma.hbm_to_vmem [thread:$0]  (!%p5779_p2), %s272_s20, 2048, %s274_s12, %s263_s17, %s7119_s30, %s7119_s30, %s7118_s3  }
  0x3a   : > { %285 = sbr.rel (%p5726_p8) target bundleno = 1082 (0x43a), region = 48 }
  0x3f   : > { %s5793_s15 = sand.u32 1, %s5606_s25   ;;  %p7120_p10 = scmp.ne.s32.totalorder %s7108_s11, 0 }
  0x40   : > { %s4213_s28 = sshll.u32 %s5793_s15, 7  ;;  %s288_s16 = scalar_lea.sflag [#allocation4], %s5793_s15 }
  0x41   : > { %s5799_s21 = scalar_lea.vmem [#allocation3], %s4213_s28 }
  0x42   : > { %5589 = dma.done.wait (%p7120_p10), %s288_s16, 2048  }
  0x43   : > { %5591 = vsyncadd (%p7120_p10), %s288_s16, 4294965248 }
  0x44   : > { %5593 = dma.done.wait (%p5706_p1), [#allocation7], 9216  }
  0x45   : > { %5595 = vsyncadd (%p5706_p1), [#allocation7], 4294958080  ;;  %vm329_vm0 = vcmask 1040384   ;;  %vm330_vm1 = vsmask.f32 256  ;;  %vm607_vm5 = vcmask 261120  }
  0x46   : > { %vm392_vm2 = vsmask.f32 7938  ;;  %vm5810_vm3 = vmand %vm329_vm0, %vm330_vm1  ;;  %v332_v2 = vld [vmem:[#allocation2] sm:$0x1]  ;;  %v389_v3 = vld [vmem:[#allocation2 + $0xe4] sm:$0x1] }
  0x47   : > { %vm5815_vm4 = vmand %vm329_vm0, %vm392_vm2  ;;  %v394_v4 = vld [vmem:[#allocation2 + $0x8] sm:$0x1]  ;;  %v333_v5 = vsel %vm5810_vm3, 0, %v332_v2  ;;  %v390_v6 = vsel %vm5810_vm3, 0, %v389_v3  ;;  %v451_v8 = vld [vmem:[#allocation2 + $0xec] sm:$0x1] }
  0x48   : > { %v395_v7 = vsel %vm5815_vm4, 0, %v394_v4  ;;  %v5343_v9 = vld [vmem:[%s7086_s1 + $0x8] sm:$0xff]   ;;  %334 = vst [vmem:[#allocation2] sm:$0x1] %v333_v5  ;;  %391 = vst [vmem:[#allocation2 + $0xe4] sm:$0x1] %v390_v6 }
  0x49   : > { %396 = vst [vmem:[#allocation2 + $0x8] sm:$0x1] %v395_v7  ;;  %v452_v10 = vsel %vm5815_vm4, 0, %v451_v8  ;;  %v5344_v11 = vld [vmem:[%s7086_s1] sm:$0xff]   ;;  %5033 = vmatprep.subr.bf16.mxu0 %v5343_v9  ;;  %5261 = vmatprep.subr.bf16.mxu1 %v5343_v9  ;;  %v5345_v12 = vld [vmem:[%s5799_s21] sm:$0xff]   ;;  %v5346_v13 = vld [vmem:[%s5799_s21 + $0x8] sm:$0xff]  }
  0x4a   : > { %453 = vst [vmem:[#allocation2 + $0xec] sm:$0x1] %v452_v10  ;;  %5034 = vmatpush3.bf16.msra.mxu0 %v5343_v9  ;;  %5263 = vmatpush3.bf16.msra.mxu1 %v5343_v9  ;;  %v5347_v14 = vld [vmem:[%s5799_s21 + $0x10] sm:$0xff]   ;;  %v5353_v15 = vld [vmem:[%s5799_s21 + $0x40] sm:$0xff]   ;;  %v5354_v16 = vld [vmem:[%s5799_s21 + $0x48] sm:$0xff]   ;;  %vm455_vm6 = vcmask 1043456  }
  0x4b   : > { %5035 = vmatprep.subr.bf16.mxu0 %v5344_v11  ;;  %5262 = vmatprep.subr.bf16.mxu1 %v5344_v11  ;;  %v5355_v17 = vld [vmem:[%s5799_s21 + $0x50] sm:$0xff]   ;;  %v5348_v18 = vld [vmem:[%s5799_s21 + $0x18] sm:$0xff]   ;;  %v5349_v19 = vld [vmem:[%s5799_s21 + $0x20] sm:$0xff]   ;;  %vm945_vm8 = vsmask.f32 4368  ;;  %vm1831_vm10 = vcmask 1046528  }
  0x4c   : > { %5037 = vmatprep.mubr.msk.bf16.mxu0 %vm607_vm5, %v5345_v12  ;;  %5053 = vmatprep.mubr.msk.bf16.mxu1 %vm607_vm5, %v5353_v15  ;;  %v5356_v20 = vld [vmem:[%s5799_s21 + $0x58] sm:$0xff]   ;;  %v341_v21 = vld [vmem:[#allocation2 + $0x24] sm:$0x1]  ;;  %v5357_v22 = vld [vmem:[%s5799_s21 + $0x60] sm:$0xff]   ;;  %vm1596_vm11 = vsmask.f32 7424 }
  0x4d   : > { %v342_v23 = vsel %vm5810_vm3, 0, %v341_v21  ;;  %v5350_v24 = vld [vmem:[%s5799_s21 + $0x28] sm:$0xff]   ;;  %v5351_v25 = vld [vmem:[%s5799_s21 + $0x30] sm:$0xff]   ;;  %v5352_v28 = vld [vmem:[%s5799_s21 + $0x38] sm:$0xff]   ;;  %vm4058_vm12 = vcmask 257024   ;;  %s6922_s9 = scalar_lea.vmem [#allocation8], %s4213_s28 }
  0x4e   : > { %5036 = vmatpush3.bf16.msra.mxu0 %v5344_v11  ;;  %5264 = vmatpush3.bf16.msra.mxu1 %v5344_v11  ;;  %343 = vst [vmem:[#allocation2 + $0x24] sm:$0x1] %v342_v23  ;;  %v5358_v26 = vld [vmem:[%s5799_s21 + $0x68] sm:$0xff]   ;;  %v5359_v27 = vld [vmem:[%s5799_s21 + $0x70] sm:$0xff]   ;;  %v5360_v29 = vld [vmem:[%s5799_s21 + $0x78] sm:$0xff]   ;;  %s4503_s28 = sshll.u32 %s5614_s27, 11 }
  0x4f   : > { %v5361_v30 = vld [vmem:[#allocation6 + $0x178] sm:$0xff]   ;;  %v5364_v32 = vld [vmem:[#allocation6 + $0x170] sm:$0xff]   ;;  %v338_v33 = vld [vmem:[#allocation2 + $0x18] sm:$0x1]  ;;  %s7031_s13 = scalar_lea.hbm %s7092_s7, %s4503_s28  ;;  %s4092_s27 = scalar_lea.sflag [#allocation5], %s5793_s15 }
  0x50   : > { %5069 = vmatprep.subr.bf16.mxu0 %v5361_v30  ;;  %v5362_v31 = vld [vmem:[#allocation6 + $0x138] sm:$0xff]   ;;  %v339_v35 = vsel %vm5810_vm3, 0, %v338_v33  ;;  %v5365_v38 = vld [vmem:[#allocation6 + $0x130] sm:$0xff]   ;;  %v5367_v39 = vld [vmem:[#allocation6 + $0x168] sm:$0xff]   ;;  %s5629_s20 = smov [#allocation8]  }
  0x51   : > { %5038 = vmatmul.mubr.msk.bf16.vlgmr.msra.gmra.mxu0 %vm607_vm5, %v5346_v13  ;;  %5054 = vmatmul.mubr.msk.bf16.vlgmr.msra.gmra.mxu1 %vm607_vm5, %v5354_v16  ;;  %v5363_v34 = vld [vmem:[#allocation6 + $0xf8] sm:$0xff]   ;;  %340 = vst [vmem:[#allocation2 + $0x18] sm:$0x1] %v339_v35  ;;  %v5366_v40 = vld [vmem:[#allocation6 + $0xf0] sm:$0xff]   ;;  %v5368_v43 = vld [vmem:[#allocation6 + $0x128] sm:$0xff]   ;;  %s5542_s22 = sshll.u32 %s5629_s20, 4  ;;  %s5543_s22 = int_to_ptr.vmem [resolvable:$false] %s5542_s22 }
  0x52   : > { %5041 = vmatprep.mubr.msk.bf16.mxu0 %vm607_vm5, %v5347_v14  ;;  %5057 = vmatprep.mubr.msk.bf16.mxu1 %vm607_vm5, %v5355_v17  ;;  %v403_v36 = vld [vmem:[#allocation2 + $0x2c] sm:$0x1]  ;;  %v400_v41 = vld [vmem:[#allocation2 + $0x20] sm:$0x1]  ;;  %v5370_v44 = vld [vmem:[#allocation6 + $0x160] sm:$0xff]   ;;  %s5544_s10 = scalar_lea.vmem %s5543_s22, 4096 }
  0x53   : > { %5070 = vmatpush3.bf16.msra.mxu0 %v5361_v30  ;;  %4601 = vmatprep.subr.bf16.mxu1 %v5362_v31  ;;  %v404_v37 = vsel %vm5815_vm4, 0, %v403_v36  ;;  %v401_v42 = vsel %vm5815_vm4, 0, %v400_v41  ;;  %v5369_v45 = vld [vmem:[#allocation6 + $0xe8] sm:$0xff]   ;;  %v5371_v48 = vld [vmem:[#allocation6 + $0x120] sm:$0xff]   ;;  %v5373_v49 = vld [vmem:[#allocation6 + $0x158] sm:$0xff]  }
  0x54   : > { %5071 = vmatprep.subr.bf16.mxu0 %v5364_v32  ;;  %4602 = vmatpush3.bf16.msra.mxu1 %v5363_v34  ;;  %405 = vst [vmem:[#allocation2 + $0x2c] sm:$0x1] %v404_v37  ;;  %402 = vst [vmem:[#allocation2 + $0x20] sm:$0x1] %v401_v42  ;;  %v347_v46 = vld [vmem:[#allocation2 + $0x3c] sm:$0x1] }
  0x55   : > { %4603 = vmatprep.subr.bf16.mxu1 %v5365_v38  ;;  %v348_v47 = vsel %vm5810_vm3, 0, %v347_v46  ;;  %v344_v50 = vld [vmem:[#allocation2 + $0x30] sm:$0x1]  ;;  %v409_v51 = vld [vmem:[#allocation2 + $0x44] sm:$0x1]  ;;  %v5374_v57 = vld [vmem:[#allocation6 + $0x118] sm:$0xff]  }
  0x56   : > { %349 = vst [vmem:[#allocation2 + $0x3c] sm:$0x1] %v348_v47  ;;  %v5372_v52 = vld [vmem:[#allocation6 + $0xe0] sm:$0xff]   ;;  %v345_v53 = vsel %vm5810_vm3, 0, %v344_v50  ;;  %v410_v54 = vsel %vm5815_vm4, 0, %v409_v51  ;;  %v5376_v58 = vld [vmem:[#allocation6 + $0x150] sm:$0xff]   ;;  %vm5937_vm7 = vmand %vm455_vm6, %vm392_vm2 }
  0x57   : > { %5072 = vmatpush3.bf16.msra.mxu0 %v5364_v32  ;;  %v406_v55 = vld [vmem:[#allocation2 + $0x38] sm:$0x1]  ;;  %346 = vst [vmem:[#allocation2 + $0x30] sm:$0x1] %v345_v53  ;;  %411 = vst [vmem:[#allocation2 + $0x44] sm:$0x1] %v410_v54 }
  0x58   : > { %5073 = vmatprep.subr.bf16.mxu0 %v5367_v39  ;;  %4604 = vmatpush3.bf16.msra.mxu1 %v5366_v40  ;;  %v407_v56 = vsel %vm5815_vm4, 0, %v406_v55  ;;  %v5375_v59 = vld [vmem:[#allocation6 + $0xd8] sm:$0xff]   ;;  %v412_v61 = vld [vmem:[#allocation2 + $0x50] sm:$0x1]  ;;  %v353_v62 = vld [vmem:[#allocation2 + $0x54] sm:$0x1] }
  0x59   : > { %5042 = vmatmul.mubr.msk.bf16.gmra.mxu0 %vm607_vm5, %v5348_v18  ;;  %5058 = vmatmul.mubr.msk.bf16.gmra.mxu1 %vm607_vm5, %v5356_v20  ;;  %408 = vst [vmem:[#allocation2 + $0x38] sm:$0x1] %v407_v56  ;;  %v350_v60 = vld [vmem:[#allocation2 + $0x48] sm:$0x1]  ;;  %v354_v63 = vsel %vm5810_vm3, 0, %v353_v62  ;;  %v413_v4 = vsel %vm5815_vm4, 0, %v412_v61  ;;  %vm5967_vm9 = vmor %vm330_vm1, %vm945_vm8 }
  0x5a   : > { %5045 = vmatprep.mubr.msk.bf16.mxu0 %vm607_vm5, %v5349_v19  ;;  %5061 = vmatprep.mubr.msk.bf16.mxu1 %vm607_vm5, %v5357_v22  ;;  %v351_v2 = vsel %vm5810_vm3, 0, %v350_v60  ;;  %v415_v3 = vld [vmem:[#allocation2 + $0x5c] sm:$0x1]  ;;  %v5377_v5 = vld [vmem:[#allocation6 + $0x110] sm:$0xff]   ;;  %355 = vst [vmem:[#allocation2 + $0x54] sm:$0x1] %v354_v63 }
  0x5b   : > { %5074 = vmatpush3.bf16.msra.mxu0 %v5367_v39  ;;  %4605 = vmatprep.subr.bf16.mxu1 %v5368_v43  ;;  %352 = vst [vmem:[#allocation2 + $0x48] sm:$0x1] %v351_v2  ;;  %v416_v6 = vsel %vm5815_vm4, 0, %v415_v3  ;;  %414 = vst [vmem:[#allocation2 + $0x50] sm:$0x1] %v413_v4  ;;  %v5378_v7 = vld [vmem:[#allocation6 + $0xd0] sm:$0xff]  }
  0x5c   : > { %5075 = vmatprep.subr.bf16.mxu0 %v5370_v44  ;;  %4606 = vmatpush3.bf16.msra.mxu1 %v5369_v45  ;;  %v5379_v8 = vld [vmem:[#allocation6 + $0x148] sm:$0xff]   ;;  %417 = vst [vmem:[#allocation2 + $0x5c] sm:$0x1] %v416_v6  ;;  %v5382_v10 = vld [vmem:[#allocation6 + $0x140] sm:$0xff]   ;;  %v356_v13 = vld [vmem:[#allocation2 + $0x60] sm:$0x1] }
  0x5d   : > { %4607 = vmatprep.subr.bf16.mxu1 %v5371_v48  ;;  %v5380_v9 = vld [vmem:[#allocation6 + $0x108] sm:$0xff]   ;;  %v5383_v12 = vld [vmem:[#allocation6 + $0x100] sm:$0xff]   ;;  %v418_v14 = vld [vmem:[#allocation2 + $0x68] sm:$0x1]  ;;  %v357_v16 = vsel %vm5810_vm3, 0, %v356_v13  ;;  %v7125_v60 = vmov 0 }
  0x5e   : > { %v5381_v11 = vld [vmem:[#allocation6 + $0xc8] sm:$0xff]   ;;  %v359_v15 = vld [vmem:[#allocation2 + $0x6c] sm:$0x1]  ;;  %v419_v17 = vsel %vm5815_vm4, 0, %v418_v14  ;;  %358 = vst [vmem:[#allocation2 + $0x60] sm:$0x1] %v357_v16 }
  0x5f   : > { %5076 = vmatpush3.bf16.msra.mxu0 %v5370_v44  ;;  %v360_v18 = vsel %vm5810_vm3, 0, %v359_v15  ;;  %v421_v19 = vld [vmem:[#allocation2 + $0x74] sm:$0x1]  ;;  %420 = vst [vmem:[#allocation2 + $0x68] sm:$0x1] %v419_v17  ;;  %v5407_v55 = vld [vmem:[#allocation6 + $0x78] sm:$0xff]  }
  0x60   : > { %5077 = vmatprep.subr.bf16.mxu0 %v5373_v49  ;;  %4608 = vmatpush3.bf16.msra.mxu1 %v5372_v52  ;;  %361 = vst [vmem:[#allocation2 + $0x6c] sm:$0x1] %v360_v18  ;;  %v422_v20 = vsel %vm5815_vm4, 0, %v421_v19  ;;  %v365_v21 = vld [vmem:[#allocation2 + $0x84] sm:$0x1]  ;;  %v5386_v23 = vld [vmem:[#allocation6 + $0xc0] sm:$0xff]  }
  0x61   : > { %5046 = vmatmul.mubr.msk.bf16.gmra.mxu0 %vm607_vm5, %v5350_v24  ;;  %5062 = vmatmul.mubr.msk.bf16.gmra.mxu1 %vm607_vm5, %v5358_v26  ;;  %423 = vst [vmem:[#allocation2 + $0x74] sm:$0x1] %v422_v20  ;;  %v366_v22 = vsel %vm5810_vm3, 0, %v365_v21  ;;  %v362_v24 = vld [vmem:[#allocation2 + $0x78] sm:$0x1]  ;;  %v7126_v60 = vsel %vm5937_vm7, 4294967295, %v7125_v60 }
  0x62   : > { %5049 = vmatprep.mubr.msk.bf16.mxu0 %vm607_vm5, %v5351_v25  ;;  %5065 = vmatprep.mubr.msk.bf16.mxu1 %vm607_vm5, %v5359_v27  ;;  %367 = vst [vmem:[#allocation2 + $0x84] sm:$0x1] %v366_v22  ;;  %v363_v25 = vsel %vm5810_vm3, 0, %v362_v24  ;;  %v427_v26 = vld [vmem:[#allocation2 + $0x8c] sm:$0x1]  ;;  %7127 = vst [vmem:[#allocation15_spill] sm:$0xff] %v7126_v60 }
  0x63   : > { %5078 = vmatpush3.bf16.msra.mxu0 %v5373_v49  ;;  %4609 = vmatprep.subr.bf16.mxu1 %v5374_v57  ;;  %364 = vst [vmem:[#allocation2 + $0x78] sm:$0x1] %v363_v25  ;;  %v428_v27 = vsel %vm5815_vm4, 0, %v427_v26  ;;  %v371_v31 = vld [vmem:[#allocation2 + $0x9c] sm:$0x1]  ;;  %v5628_v62 = vmov 0  }
  0x64   : > { %5079 = vmatprep.subr.bf16.mxu0 %v5376_v58  ;;  %4610 = vmatpush3.bf16.msra.mxu1 %v5375_v59  ;;  %429 = vst [vmem:[#allocation2 + $0x8c] sm:$0x1] %v428_v27  ;;  %v372_v32 = vsel %vm5810_vm3, 0, %v371_v31  ;;  %v368_v33 = vld [vmem:[#allocation2 + $0x90] sm:$0x1] }
  0x65   : > { %4611 = vmatprep.subr.bf16.mxu1 %v5377_v5  ;;  %373 = vst [vmem:[#allocation2 + $0x9c] sm:$0x1] %v372_v32  ;;  %v369_v34 = vsel %vm5810_vm3, 0, %v368_v33  ;;  %v433_v35 = vld [vmem:[#allocation2 + $0xa4] sm:$0x1] }
  0x66   : > { %370 = vst [vmem:[#allocation2 + $0x90] sm:$0x1] %v369_v34  ;;  %v434_v36 = vsel %vm5815_vm4, 0, %v433_v35  ;;  %v430_v37 = vld [vmem:[#allocation2 + $0x98] sm:$0x1] }
  0x67   : > { %5080 = vmatpush3.bf16.msra.mxu0 %v5376_v58  ;;  %435 = vst [vmem:[#allocation2 + $0xa4] sm:$0x1] %v434_v36  ;;  %v377_v38 = vld [vmem:[#allocation2 + $0xb4] sm:$0x1]  ;;  %v431_v39 = vsel %vm5815_vm4, 0, %v430_v37 }
  0x68   : > { %4612 = vmatpush3.bf16.msra.mxu1 %v5378_v7  ;;  %5081 = vmatprep.subr.bf16.mxu0 %v5379_v8  ;;  %v378_v40 = vsel %vm5810_vm3, 0, %v377_v38  ;;  %432 = vst [vmem:[#allocation2 + $0x98] sm:$0x1] %v431_v39  ;;  %v374_v41 = vld [vmem:[#allocation2 + $0xa8] sm:$0x1] }
  0x69   : > { %5050 = vmatmul.mubr.msk.bf16.gmra.mxu0 %vm607_vm5, %v5352_v28  ;;  %5066 = vmatmul.mubr.msk.bf16.gmra.mxu1 %vm607_vm5, %v5360_v29  ;;  %v5903_v28 = vld [vmem:[#allocation6 + $0xb8] sm:$0xff]   ;;  %v424_v29 = vld [vmem:[#allocation2 + $0x80] sm:$0x1]  ;;  %379 = vst [vmem:[#allocation2 + $0xb4] sm:$0x1] %v378_v40  ;;  %v375_v42 = vsel %vm5810_vm3, 0, %v374_v41 }
  0x6a   : > { %4613 = vmatprep.subr.bf16.mxu1 %v5380_v9  ;;  %v425_v30 = vsel %vm5815_vm4, 0, %v424_v29  ;;  %376 = vst [vmem:[#allocation2 + $0xa8] sm:$0x1] %v375_v42  ;;  %v439_v43 = vld [vmem:[#allocation2 + $0xbc] sm:$0x1] }
  0x6b   : > { %5082 = vmatpush3.bf16.msra.mxu0 %v5379_v8  ;;  %426 = vst [vmem:[#allocation2 + $0x80] sm:$0x1] %v425_v30  ;;  %v440_v44 = vsel %vm5815_vm4, 0, %v439_v43  ;;  %v436_v45 = vld [vmem:[#allocation2 + $0xb0] sm:$0x1] }
  0x6c   : > { %5083 = vmatprep.subr.bf16.mxu0 %v5382_v10  ;;  %4614 = vmatpush3.bf16.msra.mxu1 %v5381_v11  ;;  %441 = vst [vmem:[#allocation2 + $0xbc] sm:$0x1] %v440_v44  ;;  %v437_v46 = vsel %vm5815_vm4, 0, %v436_v45  ;;  %v383_v47 = vld [vmem:[#allocation2 + $0xcc] sm:$0x1] }
  0x6d   : > { %4615 = vmatprep.subr.bf16.mxu1 %v5383_v12  ;;  %438 = vst [vmem:[#allocation2 + $0xb0] sm:$0x1] %v437_v46  ;;  %v384_v48 = vsel %vm5810_vm3, 0, %v383_v47  ;;  %v380_v49 = vld [vmem:[#allocation2 + $0xc0] sm:$0x1] }
  0x6e   : > { %385 = vst [vmem:[#allocation2 + $0xcc] sm:$0x1] %v384_v48  ;;  %v381_v50 = vsel %vm5810_vm3, 0, %v380_v49  ;;  %v445_v51 = vld [vmem:[#allocation2 + $0xd4] sm:$0x1] }
  0x6f   : > { %5084 = vmatpush3.bf16.msra.mxu0 %v5382_v10  ;;  %382 = vst [vmem:[#allocation2 + $0xc0] sm:$0x1] %v381_v50  ;;  %v446_v52 = vsel %vm5815_vm4, 0, %v445_v51  ;;  %v442_v53 = vld [vmem:[#allocation2 + $0xc8] sm:$0x1] }
  0x70   : > { %4616 = vmatpush3.bf16.msra.mxu1 %v5386_v23  ;;  %447 = vst [vmem:[#allocation2 + $0xd4] sm:$0x1] %v446_v52  ;;  %v443_v54 = vsel %vm5815_vm4, 0, %v442_v53  ;;  %4737 = vmatprep.subr.bf16.mxu0 %v5407_v55  ;;  %v335_v56 = vld [vmem:[#allocation2 + $0xc] sm:$0x1] }
  0x71   : > { %5117 = vmatprep.subr.bf16.mxu1 %v5903_v28  ;;  %444 = vst [vmem:[#allocation2 + $0xc8] sm:$0x1] %v443_v54  ;;  %v336_v57 = vsel %vm5810_vm3, 0, %v335_v56  ;;  %v397_v58 = vld [vmem:[#allocation2 + $0x14] sm:$0x1] }
  0x72   : > { %337 = vst [vmem:[#allocation2 + $0xc] sm:$0x1] %v336_v57  ;;  %v398_v59 = vsel %vm5815_vm4, 0, %v397_v58  ;;  %460 = vst [vmem:[#allocation2 + $0x10] sm:$0xf] %v5628_v62 }
  0x73   : > { %399 = vst [vmem:[#allocation2 + $0x14] sm:$0x1] %v398_v59  ;;  %468 = vst [vmem:[#allocation2 + $0xdc] sm:$0xf] %v5628_v62  ;;  %v5948_v4 = vld [vmem:[%s7087_s2] ss:$0 sm:$0xff] }
  0x74   : > { %v1275_v31 = vld [vmem:[#allocation2 + $0x24] sm:$0xf]  ;;  %v1268_v41 = vld [vmem:[#allocation2 + $0x18] sm:$0xf]  ;;  %v1279_v52 = vld [vmem:[#allocation2 + $0x2c] sm:$0x1] }
  0x79   : > { %v457_v61 = vld [vmem:[#allocation2 + $0xc] sm:$0xf] }
  0x7a   : > { %v458_v63 = vsel %vm5937_vm7, 0, %v457_v61  ;;  %v461_v2 = vld [vmem:[#allocation2 + $0x14] sm:$0x1] }
  0x7b   : > { %459 = vst [vmem:[#allocation2 + $0xc] sm:$0xf] %v458_v63  ;;  %v462_v3 = vsel %vm5810_vm3, 0, %v461_v2 }
  0x7c   : > { %463 = vst [vmem:[#allocation2 + $0x14] sm:$0x1] %v462_v3 }
 0x111   : > { %v5039_v5 = vpop.f32.mrf.mxu0  ;;  %v5055_v11 = vpop.f32.mrf.mxu1 }
 0x112   : > { %v699_v6 = vadd.f32 %v5039_v5, %v5948_v4  ;;  %v763_v15 = vadd.f32 %v5055_v11, %v5948_v4 }
 0x113   : > { %v690_v7 = vpop.f32.mrf.mxu0  ;;  %v754_v20 = vpop.f32.mrf.mxu1 }
 0x114   : > { %v819_v8 = vmax.f32 %v699_v6, 0.0  ;;  %v691_v9 = vadd.f32 %v5948_v4, %v690_v7  ;;  %v835_v24 = vmax.f32 %v763_v15, 0.0  ;;  %v5956_v25 = vadd.f32 %v5948_v4, %v754_v20 }
 0x115   : > { %v5040_v10 = vpop.f32.mrf.mxu0 }
 0x116   : > { %v4441_v12 = vpack.c.bf16 %v819_v8, %v819_v8  ;;  %v817_v13 = vmax.f32 %v691_v9, 0.0  ;;  %v702_v14 = vadd.f32 %v5040_v10, %v5948_v4  ;;  %v5959_v35 = vpack.c.bf16 %v835_v24, %v835_v24  ;;  %v1272_v9 = vld [vmem:[#allocation2 + $0x20] sm:$0x1] }
 0x117   : > { %v693_v16 = vpop.f32.mrf.mxu0  ;;  %v833_v36 = vmax.f32 %v5956_v25, 0.0 }
 0x118   : > { %v965_v17 = vshrl.u32 %v4441_v12, 16  ;;  %v4439_v18 = vpack.c.bf16 %v817_v13, %v817_v13  ;;  %v820_v19 = vmax.f32 %v702_v14, 0.0  ;;  %v968_v21 = vshll.u32 %v4441_v12, 16 }
 0x119   : > { %v694_v22 = vadd.f32 %v5948_v4, %v693_v16  ;;  %v5043_v23 = vpop.f32.mrf.mxu0 }
 0x11a   : > { %v967_v26 = vrot.slane %v965_v17, 7  ;;  %v948_v27 = vshrl.u32 %v4439_v18, 16  ;;  %v951_v29 = vshll.u32 %v4439_v18, 16  ;;  %v4442_v30 = vpack.c.bf16 %v820_v19, %v820_v19  ;;  %v1289_v17 = vld [vmem:[#allocation2 + $0x3c] sm:$0xf] }
 0x11b   : > { %v818_v32 = vmax.f32 %v694_v22, 0.0  ;;  %v715_v33 = vadd.f32 %v5043_v23, %v5948_v4  ;;  %v706_v34 = vpop.f32.mrf.mxu0 }
 0x11c   : > { %v970_v37 = vor.u32 %v968_v21, %v967_v26  ;;  %v971_v38 = vrot.slane %v967_v26, 4  ;;  %v950_v39 = vrot.slane %v948_v27, 7  ;;  %v973_v40 = vshrl.u32 %v4442_v30, 16 }
 0x11d   : > { %v976_v42 = vshll.u32 %v4442_v30, 16  ;;  %v4440_v43 = vpack.c.bf16 %v818_v32, %v818_v32  ;;  %v823_v44 = vmax.f32 %v715_v33, 0.0  ;;  %v707_v45 = vadd.f32 %v5948_v4, %v706_v34  ;;  %v5044_v46 = vpop.f32.mrf.mxu0  ;;  %v1282_v34 = vld [vmem:[#allocation2 + $0x30] sm:$0xf] }
 0x11e   : > { %v1276_v47 = vsel %vm5937_vm7, %v970_v37, %v1275_v31  ;;  %v953_v48 = vor.u32 %v951_v29, %v950_v39  ;;  %v954_v49 = vrot.slane %v950_v39, 4  ;;  %v975_v50 = vrot.slane %v973_v40, 7 }
 0x11f   : > { %1277 = vst [vmem:[#allocation2 + $0x24] sm:$0xf] %v1276_v47  ;;  %v956_v53 = vshrl.u32 %v4440_v43, 16  ;;  %v959_v54 = vshll.u32 %v4440_v43, 16  ;;  %v4445_v55 = vpack.c.bf16 %v823_v44, %v823_v44  ;;  %v821_v56 = vmax.f32 %v707_v45, 0.0  ;;  %v709_v57 = vpop.f32.mrf.mxu0 }
 0x120   : > { %v1269_v58 = vsel %vm5937_vm7, %v953_v48, %v1268_v41  ;;  %v978_v59 = vor.u32 %v976_v42, %v975_v50  ;;  %v980_v61 = vrot.slane %v975_v50, 4  ;;  %v718_v62 = vadd.f32 %v5044_v46, %v5948_v4  ;;  %v1293_v45 = vld [vmem:[#allocation2 + $0x44] sm:$0x1] }
 0x121   : > { %1270 = vst [vmem:[#allocation2 + $0x18] sm:$0xf] %v1269_v58  ;;  %v958_v63 = vrot.slane %v956_v53, 7  ;;  %v999_v2 = vshrl.u32 %v4445_v55, 16  ;;  %v1002_v3 = vshll.u32 %v4445_v55, 16  ;;  %v4443_v5 = vpack.c.bf16 %v821_v56, %v821_v56  ;;  %v5047_v6 = vpop.f32.mrf.mxu0 }
 0x122   : > { %v979_v7 = vsel %vm5967_vm9, %v971_v38, %v978_v59  ;;  %v1280_v8 = vsel %vm5810_vm3, %v980_v61, %v1279_v52  ;;  %v824_v10 = vmax.f32 %v718_v62, 0.0  ;;  %v710_v11 = vadd.f32 %v5948_v4, %v709_v57  ;;  %v1286_v56 = vld [vmem:[#allocation2 + $0x38] sm:$0x1] }
 0x123   : > { %1278 = vst [vmem:[#allocation2 + $0x28] sm:$0xf] %v979_v7  ;;  %1281 = vst [vmem:[#allocation2 + $0x2c] sm:$0x1] %v1280_v8  ;;  %v961_v12 = vor.u32 %v959_v54, %v958_v63  ;;  %v963_v13 = vrot.slane %v958_v63, 4  ;;  %v1001_v14 = vrot.slane %v999_v2, 7  ;;  %v722_v16 = vpop.f32.mrf.mxu0  ;;  %v731_v21 = vadd.f32 %v5047_v6, %v5948_v4 }
 0x124   : > { %v982_v15 = vshrl.u32 %v4443_v5, 16  ;;  %v985_v18 = vshll.u32 %v4443_v5, 16  ;;  %v4446_v19 = vpack.c.bf16 %v824_v10, %v824_v10  ;;  %v822_v20 = vmax.f32 %v710_v11, 0.0 }
 0x125   : > { %v962_v22 = vsel %vm5967_vm9, %v954_v49, %v961_v12  ;;  %v1273_v23 = vsel %vm5810_vm3, %v963_v13, %v1272_v9  ;;  %v1004_v24 = vor.u32 %v1002_v3, %v1001_v14  ;;  %v1005_v26 = vrot.slane %v1001_v14, 4  ;;  %v5048_v27 = vpop.f32.mrf.mxu0  ;;  %v1303_v13 = vld [vmem:[#allocation2 + $0x54] sm:$0xf] }
 0x126   : > { %1271 = vst [vmem:[#allocation2 + $0x1c] sm:$0xf] %v962_v22  ;;  %1274 = vst [vmem:[#allocation2 + $0x20] sm:$0x1] %v1273_v23  ;;  %v984_v29 = vrot.slane %v982_v15, 7  ;;  %v1007_v30 = vshrl.u32 %v4446_v19, 16  ;;  %v4444_v32 = vpack.c.bf16 %v822_v20, %v822_v20  ;;  %v723_v38 = vadd.f32 %v5948_v4, %v722_v16 }
 0x127   : > { %v1010_v31 = vshll.u32 %v4446_v19, 16  ;;  %v1290_v33 = vsel %vm5937_vm7, %v1004_v24, %v1289_v17  ;;  %v827_v37 = vmax.f32 %v731_v21, 0.0  ;;  %v734_v39 = vadd.f32 %v5048_v27, %v5948_v4  ;;  %v725_v40 = vpop.f32.mrf.mxu0  ;;  %v1296_v20 = vld [vmem:[#allocation2 + $0x48] sm:$0xf] }
 0x128   : > { %1291 = vst [vmem:[#allocation2 + $0x3c] sm:$0xf] %v1290_v33  ;;  %v987_v41 = vor.u32 %v985_v18, %v984_v29  ;;  %v988_v42 = vrot.slane %v984_v29, 4  ;;  %v1009_v43 = vrot.slane %v1007_v30, 7  ;;  %v990_v44 = vshrl.u32 %v4444_v32, 16 }
 0x129   : > { %v993_v46 = vshll.u32 %v4444_v32, 16  ;;  %v4449_v47 = vpack.c.bf16 %v827_v37, %v827_v37  ;;  %v825_v48 = vmax.f32 %v723_v38, 0.0  ;;  %v828_v49 = vmax.f32 %v734_v39, 0.0  ;;  %v5051_v50 = vpop.f32.mrf.mxu0  ;;  %v1307_v32 = vld [vmem:[#allocation2 + $0x5c] sm:$0x1]  ;;  %v6004_v39 = vpop.f32.mrf.mxu1 }
 0x12a   : > { %v1283_v52 = vsel %vm5937_vm7, %v987_v41, %v1282_v34  ;;  %v1012_v53 = vor.u32 %v1010_v31, %v1009_v43  ;;  %v1014_v54 = vrot.slane %v1009_v43, 4  ;;  %v992_v55 = vrot.slane %v990_v44, 7 }
 0x12b   : > { %1284 = vst [vmem:[#allocation2 + $0x30] sm:$0xf] %v1283_v52  ;;  %v1033_v57 = vshrl.u32 %v4449_v47, 16  ;;  %v1036_v58 = vshll.u32 %v4449_v47, 16  ;;  %v4447_v59 = vpack.c.bf16 %v825_v48, %v825_v48  ;;  %v4450_v61 = vpack.c.bf16 %v828_v49, %v828_v49  ;;  %v738_v62 = vpop.f32.mrf.mxu0  ;;  %v1300_v48 = vld [vmem:[#allocation2 + $0x50] sm:$0x1] }
 0x12c   : > { %v1013_v63 = vsel %vm5967_vm9, %v1005_v26, %v1012_v53  ;;  %v1294_v2 = vsel %vm5810_vm3, %v1014_v54, %v1293_v45  ;;  %v995_v3 = vor.u32 %v993_v46, %v992_v55  ;;  %v997_v5 = vrot.slane %v992_v55, 4 }
 0x12d   : > { %1292 = vst [vmem:[#allocation2 + $0x40] sm:$0xf] %v1013_v63  ;;  %1295 = vst [vmem:[#allocation2 + $0x44] sm:$0x1] %v1294_v2  ;;  %v1035_v6 = vrot.slane %v1033_v57, 7  ;;  %v1016_v7 = vshrl.u32 %v4447_v59, 16  ;;  %v5052_v10 = vpop.f32.mrf.mxu0  ;;  %v726_v15 = vadd.f32 %v5948_v4, %v725_v40  ;;  %v747_v22 = vadd.f32 %v5051_v50, %v5948_v4 }
 0x12e   : > { %v1019_v8 = vshll.u32 %v4447_v59, 16  ;;  %v1041_v9 = vshrl.u32 %v4450_v61, 16  ;;  %v996_v11 = vsel %vm5967_vm9, %v988_v42, %v995_v3  ;;  %v1287_v12 = vsel %vm5810_vm3, %v997_v5, %v1286_v56  ;;  %v6014_v54 = vld [vmem:[#allocation2 + $0x18] sm:$0xff]   ;;  %v6017_v59 = vpop.f32.mrf.mxu1 }
 0x12f   : > { %v1044_v14 = vshll.u32 %v4450_v61, 16  ;;  %1285 = vst [vmem:[#allocation2 + $0x34] sm:$0xf] %v996_v11  ;;  %1288 = vst [vmem:[#allocation2 + $0x38] sm:$0x1] %v1287_v12  ;;  %v1038_v16 = vor.u32 %v1036_v58, %v1035_v6  ;;  %v1039_v17 = vrot.slane %v1035_v6, 4  ;;  %v739_v23 = vadd.f32 %v5948_v4, %v738_v62  ;;  %v741_v26 = vpop.f32.mrf.mxu0 }
 0x130   : > { %v1018_v18 = vrot.slane %v1016_v7, 7  ;;  %v1043_v19 = vrot.slane %v1041_v9, 7  ;;  %v826_v21 = vmax.f32 %v726_v15, 0.0  ;;  %v750_v24 = vadd.f32 %v5052_v10, %v5948_v4  ;;  %v1317_v7 = vld [vmem:[#allocation2 + $0x6c] sm:$0xf] }
 0x131   : > { %v1304_v27 = vsel %vm5937_vm7, %v1038_v16, %v1303_v13  ;;  %v831_v37 = vmax.f32 %v747_v22, 0.0  ;;  %v829_v38 = vmax.f32 %v739_v23, 0.0  ;;  %v742_v43 = vadd.f32 %v5948_v4, %v741_v26  ;;  %v1321_v9 = vld [vmem:[#allocation2 + $0x74] sm:$0x1]  ;;  %v6032_v22 = vpop.f32.mrf.mxu1 }
 0x132   : > { %v1021_v29 = vor.u32 %v1019_v8, %v1018_v18  ;;  %v1022_v30 = vrot.slane %v1018_v18, 4  ;;  %v1046_v31 = vor.u32 %v1044_v14, %v1043_v19  ;;  %1305 = vst [vmem:[#allocation2 + $0x54] sm:$0xf] %v1304_v27  ;;  %v1048_v33 = vrot.slane %v1043_v19, 4  ;;  %v1310_v8 = vld [vmem:[#allocation2 + $0x60] sm:$0xf] }
 0x133   : > { %v4448_v34 = vpack.c.bf16 %v826_v21, %v826_v21  ;;  %v832_v42 = vmax.f32 %v750_v24, 0.0  ;;  %v4453_v47 = vpack.c.bf16 %v831_v37, %v831_v37  ;;  %v4451_v49 = vpack.c.bf16 %v829_v38, %v829_v38  ;;  %v1331_v14 = vld [vmem:[#allocation2 + $0x84] sm:$0xf]  ;;  %v6022_v15 = vld [vmem:[#allocation2 + $0x2c] ss:$0 sps:$4 sm:$0x11]  }
 0x134   : > { %v1297_v40 = vsel %vm5937_vm7, %v1021_v29, %v1296_v20  ;;  %v1047_v41 = vsel %vm5967_vm9, %v1039_v17, %v1046_v31  ;;  %v1308_v44 = vsel %vm5810_vm3, %v1048_v33, %v1307_v32  ;;  %v830_v52 = vmax.f32 %v742_v43, 0.0  ;;  %v6028_v20 = vld [vmem:[#allocation2 + $0x20] ss:$0 sps:$4 sm:$0x11]   ;;  %v6030_v21 = vld [vmem:[#allocation2 + $0x24] sm:$0xff]  }
 0x135   : > { %1298 = vst [vmem:[#allocation2 + $0x48] sm:$0xf] %v1297_v40  ;;  %1306 = vst [vmem:[#allocation2 + $0x58] sm:$0xf] %v1047_v41  ;;  %v1024_v45 = vshrl.u32 %v4448_v34, 16  ;;  %v1027_v46 = vshll.u32 %v4448_v34, 16  ;;  %v4454_v50 = vpack.c.bf16 %v832_v42, %v832_v42  ;;  %v4455_v43 = vpack.c.bf16 %v833_v36, %v833_v36 }
 0x136   : > { %1309 = vst [vmem:[#allocation2 + $0x5c] sm:$0x1] %v1308_v44  ;;  %v1101_v53 = vshrl.u32 %v5959_v35, 16  ;;  %v1067_v56 = vshrl.u32 %v4453_v47, 16  ;;  %v1070_v57 = vshll.u32 %v4453_v47, 16  ;;  %v1104_v58 = vshll.u32 %v5959_v35, 16  ;;  %v6050_v44 = vpop.f32.mrf.mxu1 }
 0x137   : > { %v1026_v55 = vrot.slane %v1024_v45, 7  ;;  %v1050_v61 = vshrl.u32 %v4451_v49, 16  ;;  %v1053_v62 = vshll.u32 %v4451_v49, 16  ;;  %v1075_v63 = vshrl.u32 %v4454_v50, 16  ;;  %v1314_v45 = vld [vmem:[#allocation2 + $0x68] sm:$0x1] }
 0x138   : > { %v1078_v2 = vshll.u32 %v4454_v50, 16  ;;  %v1069_v6 = vrot.slane %v1067_v56, 7  ;;  %v4452_v10 = vpack.c.bf16 %v830_v52, %v830_v52  ;;  %v6019_v13 = vrot.slane %v1101_v53, 7  ;;  %v5408_v50 = vld [vmem:[#allocation6 + $0x38] sm:$0xff]  }
 0x139   : > { %v1029_v3 = vor.u32 %v1027_v46, %v1026_v55  ;;  %v1031_v5 = vrot.slane %v1026_v55, 4  ;;  %v1052_v11 = vrot.slane %v1050_v61, 7  ;;  %v1077_v12 = vrot.slane %v1075_v63, 7  ;;  %v5410_v55 = vld [vmem:[#allocation6 + $0x70] sm:$0xff]  }
 0x13a   : > { %v1835_v35 = vrot.slane %v6014_v54, 1  ;;  %v1072_v18 = vor.u32 %v1070_v57, %v1069_v6  ;;  %v1073_v19 = vrot.slane %v1069_v6, 4  ;;  %v1061_v31 = vshll.u32 %v4452_v10, 16  ;;  %v1324_v57 = vld [vmem:[#allocation2 + $0x78] sm:$0xf]  ;;  %v6073_v6 = vpop.f32.mrf.mxu1 }
 0x13b   : > { %v1030_v16 = vsel %vm5967_vm9, %v1022_v30, %v1029_v3  ;;  %v1301_v17 = vsel %vm5810_vm3, %v1031_v5, %v1300_v48  ;;  %v1055_v23 = vor.u32 %v1053_v62, %v1052_v11  ;;  %v1056_v24 = vrot.slane %v1052_v11, 4  ;;  %v5411_v62 = vld [vmem:[#allocation6 + $0x30] sm:$0xff]   ;;  %v6078_v11 = vld [vmem:[#allocation2 + $0x30] sm:$0xff]  }
 0x13c   : > { %1299 = vst [vmem:[#allocation2 + $0x4c] sm:$0xf] %v1030_v16  ;;  %1302 = vst [vmem:[#allocation2 + $0x50] sm:$0x1] %v1301_v17  ;;  %v1080_v26 = vor.u32 %v1078_v2, %v1077_v12  ;;  %v1082_v27 = vrot.slane %v1077_v12, 4  ;;  %v1318_v29 = vsel %vm5937_vm7, %v1072_v18, %v1317_v7  ;;  %v1058_v30 = vshrl.u32 %v4452_v10, 16 }
 0x13d   : > { %v1106_v32 = vor.u32 %v1104_v58, %v6019_v13  ;;  %1319 = vst [vmem:[#allocation2 + $0x6c] sm:$0xf] %v1318_v29  ;;  %v1311_v33 = vsel %vm5937_vm7, %v1055_v23, %v1310_v8  ;;  %v1107_v38 = vrot.slane %v6019_v13, 4  ;;  %v1836_v42 = vrot.slane %v6028_v20, 1  ;;  %v5416_v18 = vld [vmem:[#allocation6 + $0x68] sm:$0xff]  }
 0x13e   : > { %v1081_v34 = vsel %vm5967_vm9, %v1073_v19, %v1080_v26  ;;  %v1322_v37 = vsel %vm5810_vm3, %v1082_v27, %v1321_v9  ;;  %1312 = vst [vmem:[#allocation2 + $0x60] sm:$0xf] %v1311_v33  ;;  %v1060_v40 = vrot.slane %v1058_v30, 7  ;;  %v1838_v46 = vrot.slane %v6030_v21, 1  ;;  %v1335_v26 = vld [vmem:[#allocation2 + $0x8c] sm:$0x1] }
 0x13f   : > { %1320 = vst [vmem:[#allocation2 + $0x70] sm:$0xf] %v1081_v34  ;;  %1323 = vst [vmem:[#allocation2 + $0x74] sm:$0x1] %v1322_v37  ;;  %v1332_v41 = vsel %vm5937_vm7, %v1106_v32, %v1331_v14  ;;  %v1839_v47 = vrot.slane %v6022_v15, 1  ;;  %v766_v48 = vadd.f32 %v6004_v39, %v5948_v4  ;;  %v1610_v49 = vshrl.u32 %v6014_v54, 16 }
 0x140   : > { %1333 = vst [vmem:[#allocation2 + $0x84] sm:$0xf] %v1332_v41  ;;  %v1063_v52 = vor.u32 %v1061_v31, %v1060_v40  ;;  %v1065_v53 = vrot.slane %v1060_v40, 4  ;;  %v6058_v25 = vsel %vm1831_vm10, %v1835_v35, %v1836_v42  ;;  %v1084_v36 = vshrl.u32 %v4455_v43, 16  ;;  %v773_v31 = vpop.f32.mrf.mxu1  ;;  %v5398_v41 = vld [vmem:[#allocation6 + $0xb0] sm:$0xff]  }
 0x141   : > { %5085 = vmatprep.mubr.bf16.mxu0 %v6058_v25  ;;  %v1087_v56 = vshll.u32 %v4455_v43, 16  ;;  %v6062_v58 = vsel %vm1831_vm10, %v1838_v46, %v1839_v47  ;;  %v836_v61 = vmax.f32 %v766_v48, 0.0  ;;  %v1612_v39 = vshll.u32 %v6014_v54, 16  ;;  %v6080_v12 = vld [vmem:[#allocation2 + $0x38] ss:$0 sps:$4 sm:$0x11]  }
 0x142   : > { %v1064_v63 = vsel %vm5967_vm9, %v1056_v24, %v1063_v52  ;;  %v1315_v2 = vsel %vm5810_vm3, %v1065_v53, %v1314_v45  ;;  %v6069_v3 = vrot.slane %v1084_v36, 7  ;;  %5086 = vmatmul.mubr.bf16.vlgmr.msra.gmra.mxu0 %v6062_v58  ;;  %v1617_v5 = vshll.u32 %v6028_v20, 16  ;;  %v6094_v40 = vld [vmem:[#allocation2 + $0x44] ss:$0 sps:$4 sm:$0x11]   ;;  %v5417_v45 = vld [vmem:[#allocation6 + $0x28] sm:$0xff]  }
 0x143   : > { %1313 = vst [vmem:[#allocation2 + $0x64] sm:$0xf] %v1064_v63  ;;  %1316 = vst [vmem:[#allocation2 + $0x68] sm:$0x1] %v1315_v2  ;;  %v4458_v7 = vpack.c.bf16 %v836_v61, %v836_v61  ;;  %v1614_v8 = vrot.slane %v1612_v39, 1  ;;  %v758_v9 = vadd.f32 %v5948_v4, %v6017_v59  ;;  %v1622_v10 = vshrl.u32 %v6030_v21, 16  ;;  %4738 = vmatpush3.bf16.msra.mxu0 %v5408_v50 }
 0x144   : > { %v1089_v14 = vor.u32 %v1087_v56, %v6069_v3  ;;  %v1090_v35 = vrot.slane %v6069_v3, 4  ;;  %v1619_v16 = vrot.slane %v1617_v5, 1  ;;  %v1624_v17 = vshll.u32 %v6030_v21, 16  ;;  %4739 = vmatprep.subr.bf16.mxu0 %v5410_v55  ;;  %v6099_v50 = vld [vmem:[#allocation2 + $0x3c] sm:$0xff]   ;;  %v5418_v52 = vld [vmem:[#allocation6 + $0x60] sm:$0xff]  }
 0x145   : > { %v1109_v19 = vshrl.u32 %v4458_v7, 16  ;;  %v1112_v20 = vshll.u32 %v4458_v7, 16  ;;  %v1615_v23 = vor.u32 %v1614_v8, %v1610_v49  ;;  %v834_v59 = vmax.f32 %v758_v9, 0.0  ;;  %v1328_v39 = vld [vmem:[#allocation2 + $0x80] sm:$0x1]  ;;  %v5409_v63 = vld [vmem:[#allocation6 + $0xa8] sm:$0xff]  }
 0x146   : > { %v1325_v24 = vsel %vm5937_vm7, %v1089_v14, %v1324_v57  ;;  %v1626_v27 = vrot.slane %v1624_v17, 1  ;;  %v1629_v29 = vshll.u32 %v6022_v15, 16  ;;  %v779_v30 = vadd.f32 %v6032_v22, %v5948_v4  ;;  %v5063_v57 = vpop.f32.mrf.mxu1  ;;  %v5424_v14 = vld [vmem:[#allocation6 + $0x58] sm:$0xff]  }
 0x147   : > { %1326 = vst [vmem:[#allocation2 + $0x78] sm:$0xf] %v1325_v24  ;;  %v1111_v32 = vrot.slane %v1109_v19, 7  ;;  %v6091_v33 = vsel %vm1596_vm11, %v1615_v23, %v1619_v16  ;;  %v4456_v34 = vpack.c.bf16 %v834_v59, %v834_v59  ;;  %v1841_v37 = vrot.slane %v6078_v11, 1  ;;  %4740 = vmatpush3.bf16.msra.mxu0 %v5411_v62  ;;  %v1345_v24 = vld [vmem:[#allocation2 + $0x9c] sm:$0xf] }
 0x148   : > { %2177 = vmatprep.mubr.bf16.mxu1 %v6091_v33  ;;  %v1627_v42 = vor.u32 %v1626_v27, %v1622_v10  ;;  %v1631_v15 = vrot.slane %v1629_v29, 1  ;;  %v839_v43 = vmax.f32 %v779_v30, 0.0  ;;  %v1842_v22 = vrot.slane %v6080_v12, 1  ;;  %4741 = vmatprep.subr.bf16.mxu0 %v5416_v18  ;;  %v786_v23 = vpop.f32.mrf.mxu1  ;;  %v5426_v29 = vld [vmem:[#allocation6 + $0xa0] sm:$0xff]  }
 0x149   : > { %v1114_v46 = vor.u32 %v1112_v20, %v1111_v32  ;;  %v1116_v47 = vrot.slane %v1111_v32, 4  ;;  %v1092_v48 = vshrl.u32 %v4456_v34, 16  ;;  %v1095_v49 = vshll.u32 %v4456_v34, 16  ;;  %2178 = vmatmul.mubr.bf16.vlgmr.msra.gmra.mxu1 %v6014_v54  ;;  %v6129_v20 = vld [vmem:[#allocation2 + $0x48] sm:$0xff]  }
 0x14a   : > { %5118 = vmatpush3.bf16.msra.mxu1 %v5903_v28  ;;  %v6103_v53 = vsel %vm1596_vm11, %v1627_v42, %v1631_v15  ;;  %v4461_v36 = vpack.c.bf16 %v839_v43, %v839_v43  ;;  %v6106_v55 = vsel %vm1831_vm10, %v1841_v37, %v1842_v22  ;;  %v771_v56 = vadd.f32 %v5948_v4, %v6050_v44  ;;  %v6143_v15 = vld [vmem:[#allocation2 + $0x50] ss:$0 sps:$4 sm:$0x11]   ;;  %v5427_v43 = vld [vmem:[#allocation6 + $0x50] sm:$0xff]  }
 0x14b   : > { %v1115_v54 = vsel %vm5967_vm9, %v1107_v38, %v1114_v46  ;;  %v1336_v61 = vsel %vm5810_vm3, %v1116_v47, %v1335_v26  ;;  %v1094_v28 = vrot.slane %v1092_v48, 7  ;;  %2185 = vmatprep.mubr.bf16.mxu1 %v6103_v53  ;;  %5089 = vmatprep.mubr.bf16.mxu0 %v6106_v55  ;;  %v1844_v62 = vrot.slane %v6099_v50, 1  ;;  %v5419_v38 = vld [vmem:[#allocation6 + $0x20] sm:$0xff]  }
 0x14c   : > { %1334 = vst [vmem:[#allocation2 + $0x88] sm:$0xf] %v1115_v54  ;;  %1337 = vst [vmem:[#allocation2 + $0x8c] sm:$0x1] %v1336_v61  ;;  %v1135_v44 = vshrl.u32 %v4461_v36, 16  ;;  %v1138_v2 = vshll.u32 %v4461_v36, 16  ;;  %5119 = vmatprep.subr.bf16.mxu1 %v5398_v41  ;;  %4742 = vmatpush3.bf16.msra.mxu0 %v5417_v45  ;;  %v782_v9 = vadd.f32 %v6073_v6, %v5948_v4 }
 0x14d   : > { %v837_v13 = vmax.f32 %v771_v56, 0.0  ;;  %v1845_v5 = vrot.slane %v6094_v40, 1  ;;  %v1097_v7 = vor.u32 %v1095_v49, %v1094_v28  ;;  %v1099_v8 = vrot.slane %v1094_v28, 4  ;;  %4743 = vmatprep.subr.bf16.mxu0 %v5418_v52  ;;  %v1338_v46 = vld [vmem:[#allocation2 + $0x90] sm:$0xf]  ;;  %v6149_v49 = vld [vmem:[#allocation2 + $0x54] sm:$0xff]  }
 0x14e   : > { %v774_v10 = vadd.f32 %v5948_v4, %v773_v31  ;;  %v6123_v16 = vrot.slane %v1135_v44, 7  ;;  %v1634_v19 = vshrl.u32 %v6078_v11, 16  ;;  %5120 = vmatpush3.bf16.msra.mxu1 %v5398_v41  ;;  %v840_v26 = vmax.f32 %v782_v9, 0.0  ;;  %v6151_v52 = vld [vmem:[#allocation6 + $0x98] sm:$0xff]  }
 0x14f   : > { %v4459_v17 = vpack.c.bf16 %v837_v13, %v837_v13  ;;  %v6126_v18 = vsel %vm1831_vm10, %v1844_v62, %v1845_v5  ;;  %v1098_v6 = vsel %vm5967_vm9, %v1090_v35, %v1097_v7  ;;  %v1329_v59 = vsel %vm5810_vm3, %v1099_v8, %v1328_v39  ;;  %5121 = vmatprep.subr.bf16.mxu1 %v5409_v63  ;;  %v5425_v35 = vld [vmem:[#allocation6 + $0x18] sm:$0xff]   ;;  %v1349_v39 = vld [vmem:[#allocation2 + $0xa4] sm:$0x1]  ;;  %v1342_v5 = vld [vmem:[#allocation2 + $0x98] sm:$0x1] }
 0x150   : > { %5090 = vmatmul.mubr.bf16.gmra.mxu0 %v6126_v18  ;;  %v838_v27 = vmax.f32 %v774_v10, 0.0  ;;  %1327 = vst [vmem:[#allocation2 + $0x7c] sm:$0xf] %v1098_v6  ;;  %1330 = vst [vmem:[#allocation2 + $0x80] sm:$0x1] %v1329_v59  ;;  %v1140_v30 = vor.u32 %v1138_v2, %v6123_v16  ;;  %v1141_v31 = vrot.slane %v6123_v16, 4  ;;  %v4462_v34 = vpack.c.bf16 %v840_v26, %v840_v26 }
 0x151   : > { %v1118_v3 = vshrl.u32 %v4459_v17, 16  ;;  %v1121_v32 = vshll.u32 %v4459_v17, 16  ;;  %4744 = vmatpush3.bf16.msra.mxu0 %v5419_v38  ;;  %2186 = vmatmul.mubr.bf16.gmra.mxu1 %v6030_v21  ;;  %v1636_v41 = vshll.u32 %v6078_v11, 16  ;;  %v1641_v42 = vshll.u32 %v6080_v12, 16  ;;  %v5064_v21 = vpop.f32.mrf.mxu1  ;;  %v5433_v6 = vld [vmem:[#allocation6 + $0x48] sm:$0xff]  }
 0x152   : > { %v4460_v37 = vpack.c.bf16 %v838_v27, %v838_v27  ;;  %4745 = vmatprep.subr.bf16.mxu0 %v5424_v14  ;;  %v1346_v22 = vsel %vm5937_vm7, %v1140_v30, %v1345_v24  ;;  %v795_v47 = vadd.f32 %v5063_v57, %v5948_v4  ;;  %v1847_v48 = vrot.slane %v6129_v20, 1  ;;  %5122 = vmatpush3.bf16.msra.mxu1 %v5409_v63  ;;  %v5428_v57 = vld [vmem:[#allocation6 + $0x10] sm:$0xff]   ;;  %v6157_v10 = vld [vmem:[#allocation2 + $0x5c] ss:$0 sps:$4 sm:$0x11]  }
 0x153   : > { %v1120_v45 = vrot.slane %v1118_v3, 7  ;;  %1347 = vst [vmem:[#allocation2 + $0x9c] sm:$0xf] %v1346_v22  ;;  %v1143_v12 = vshrl.u32 %v4462_v34, 16  ;;  %v1146_v36 = vshll.u32 %v4462_v34, 16  ;;  %5123 = vmatprep.subr.bf16.mxu1 %v5426_v29  ;;  %v1638_v62 = vrot.slane %v1636_v41, 1  ;;  %v789_v17 = vpop.f32.mrf.mxu1 }
 0x154   : > { %v1126_v56 = vshrl.u32 %v4460_v37, 16  ;;  %v1129_v54 = vshll.u32 %v4460_v37, 16  ;;  %v1643_v44 = vrot.slane %v1641_v42, 1  ;;  %v843_v38 = vmax.f32 %v795_v47, 0.0  ;;  %v5435_v42 = vld [vmem:[#allocation6 + $0x40] sm:$0xff]  }
 0x155   : > { %v1123_v61 = vor.u32 %v1121_v32, %v1120_v45  ;;  %v1124_v28 = vrot.slane %v1120_v45, 4  ;;  %4746 = vmatpush3.bf16.msra.mxu0 %v5425_v35  ;;  %v1145_v2 = vrot.slane %v1143_v12, 7  ;;  %v1848_v63 = vrot.slane %v6143_v15, 1  ;;  %v5434_v32 = vld [vmem:[#allocation6 + $0x8] sm:$0xff]   ;;  %v5440_v35 = vld [vmem:[#allocation6 + $0x90] sm:$0xff]   ;;  %v5067_v45 = vpop.f32.mrf.mxu1 }
 0x156   : > { %v1128_v13 = vrot.slane %v1126_v56, 7  ;;  %4747 = vmatprep.subr.bf16.mxu0 %v5427_v43  ;;  %v1639_v8 = vor.u32 %v1638_v62, %v1634_v19  ;;  %v787_v9 = vadd.f32 %v5948_v4, %v786_v23  ;;  %v1850_v14 = vrot.slane %v6149_v49, 1  ;;  %5124 = vmatpush3.bf16.msra.mxu1 %v5426_v29  ;;  %v1352_v62 = vld [vmem:[#allocation2 + $0xa8] sm:$0xf] }
 0x157   : > { %v1339_v7 = vsel %vm5937_vm7, %v1123_v61, %v1338_v46  ;;  %v1148_v59 = vor.u32 %v1146_v36, %v1145_v2  ;;  %v1150_v24 = vrot.slane %v1145_v2, 4  ;;  %5125 = vmatprep.subr.bf16.mxu1 %v6151_v52  ;;  %v4465_v19 = vpack.c.bf16 %v843_v38, %v843_v38  ;;  %v1359_v46 = vld [vmem:[#allocation2 + $0xb4] sm:$0xf] }
 0x158   : > { %1340 = vst [vmem:[#allocation2 + $0x90] sm:$0xf] %v1339_v7  ;;  %v1131_v26 = vor.u32 %v1129_v54, %v1128_v13  ;;  %v1133_v27 = vrot.slane %v1128_v13, 4  ;;  %v6162_v30 = vsel %vm1596_vm11, %v1639_v8, %v1643_v44  ;;  %v6165_v23 = vsel %vm1831_vm10, %v1847_v48, %v1848_v63  ;;  %v6198_v8 = vld [vmem:[#allocation2 + $0x60] sm:$0xff]  }
 0x159   : > { %v841_v3 = vmax.f32 %v787_v9, 0.0  ;;  %4748 = vmatpush3.bf16.msra.mxu0 %v5428_v57  ;;  %v1149_v29 = vsel %vm5967_vm9, %v1141_v31, %v1148_v59  ;;  %v1350_v34 = vsel %vm5810_vm3, %v1150_v24, %v1349_v39  ;;  %2193 = vmatprep.mubr.bf16.mxu1 %v6162_v30  ;;  %v1169_v16 = vshrl.u32 %v4465_v19, 16  ;;  %v5436_v39 = vld [vmem:[#allocation6] sm:$0xff]   ;;  %v802_v9 = vpop.f32.mrf.mxu1  ;;  %v6200_v24 = vld [vmem:[#allocation2 + $0x68] ss:$0 sps:$4 sm:$0x11]  }
 0x15a   : > { %v1132_v37 = vsel %vm5967_vm9, %v1124_v28, %v1131_v26  ;;  %v1343_v41 = vsel %vm5810_vm3, %v1133_v27, %v1342_v5  ;;  %1348 = vst [vmem:[#allocation2 + $0xa0] sm:$0xf] %v1149_v29  ;;  %1351 = vst [vmem:[#allocation2 + $0xa4] sm:$0x1] %v1350_v34  ;;  %v1172_v43 = vshll.u32 %v4465_v19, 16  ;;  %5093 = vmatprep.mubr.bf16.mxu0 %v6165_v23  ;;  %v1851_v22 = vrot.slane %v6157_v10, 1 }
 0x15b   : > { %1341 = vst [vmem:[#allocation2 + $0x94] sm:$0xf] %v1132_v37  ;;  %1344 = vst [vmem:[#allocation2 + $0x98] sm:$0x1] %v1343_v41  ;;  %v4463_v31 = vpack.c.bf16 %v841_v3, %v841_v3  ;;  %2194 = vmatmul.mubr.bf16.gmra.mxu1 %v6078_v11  ;;  %v798_v47 = vadd.f32 %v5064_v21, %v5948_v4  ;;  %v790_v48 = vadd.f32 %v5948_v4, %v789_v17  ;;  %v5441_v21 = vld [vmem:[#allocation6 + $0x88] sm:$0xff]  }
 0x15c   : > { %v1646_v12 = vshrl.u32 %v6099_v50, 16  ;;  %v1648_v36 = vshll.u32 %v6099_v50, 16  ;;  %4749 = vmatprep.subr.bf16.mxu0 %v5433_v6  ;;  %5126 = vmatpush3.bf16.msra.mxu1 %v6151_v52  ;;  %v6186_v56 = vrot.slane %v1169_v16, 7  ;;  %v6189_v28 = vsel %vm1831_vm10, %v1850_v14, %v1851_v22  ;;  %v6193_v52 = vld [vmem:[#allocation6 + $0x238] sm:$0xff]   ;;  %v5068_v22 = vpop.f32.mrf.mxu1 }
 0x15d   : > { %v1152_v54 = vshrl.u32 %v4463_v31, 16  ;;  %v1155_v61 = vshll.u32 %v4463_v31, 16  ;;  %4750 = vmatpush3.bf16.msra.mxu0 %v5434_v32  ;;  %5127 = vmatprep.subr.bf16.mxu1 %v5440_v35  ;;  %v844_v44 = vmax.f32 %v798_v47, 0.0  ;;  %v842_v57 = vmax.f32 %v790_v48, 0.0  ;;  %v6206_v32 = vld [vmem:[#allocation2 + $0x6c] sm:$0xff]  }
 0x15e   : > { %5094 = vmatmul.mubr.bf16.gmra.mxu0 %v6189_v28  ;;  %v1650_v2 = vrot.slane %v1648_v36, 1  ;;  %v1653_v13 = vshll.u32 %v6094_v40, 16  ;;  %4751 = vmatprep.subr.bf16.mxu0 %v5435_v42  ;;  %v1174_v5 = vor.u32 %v1172_v43, %v6186_v56  ;;  %v1175_v38 = vrot.slane %v6186_v56, 4  ;;  %v6202_v40 = vld [vmem:[#allocation6 + $0x80] sm:$0xff]   ;;  %v1363_v42 = vld [vmem:[#allocation2 + $0xbc] sm:$0x1] }
 0x15f   : > { %v1154_v63 = vrot.slane %v1152_v54, 7  ;;  %v811_v7 = vadd.f32 %v5067_v45, %v5948_v4  ;;  %v4466_v14 = vpack.c.bf16 %v844_v44, %v844_v44  ;;  %v4464_v17 = vpack.c.bf16 %v842_v57, %v842_v57  ;;  %v6208_v4 = vld [vmem:[#allocation2 + $0x74] ss:$0 sps:$4 sm:$0x11]   ;;  %v1356_v47 = vld [vmem:[#allocation2 + $0xb0] sm:$0x1] }
 0x160   : > { %v1651_v6 = vor.u32 %v1650_v2, %v1646_v12  ;;  %v1655_v59 = vrot.slane %v1653_v13, 1  ;;  %5128 = vmatpush3.bf16.msra.mxu1 %v5440_v35  ;;  %v1360_v26 = vsel %vm5937_vm7, %v1174_v5, %v1359_v46  ;;  %v1853_v31 = vrot.slane %v6198_v8, 1  ;;  %v5477_v12 = vld [vmem:[%s7087_s2] ss:$0 sm:$0xff]  ;;  %v5443_v13 = vld [vmem:[#allocation6 + $0x1f8] sm:$0xff]  }
 0x161   : > { %v1157_v27 = vor.u32 %v1155_v61, %v1154_v63  ;;  %v1158_v19 = vrot.slane %v1154_v63, 4  ;;  %v847_v3 = vmax.f32 %v811_v7, 0.0  ;;  %4752 = vmatpush3.bf16.msra.mxu0 %v5436_v39  ;;  %5129 = vmatprep.subr.bf16.mxu1 %v5441_v21  ;;  %1361 = vst [vmem:[#allocation2 + $0xb4] sm:$0xf] %v1360_v26  ;;  %v1177_v29 = vshrl.u32 %v4466_v14, 16 }
 0x162   : > { %v1180_v34 = vshll.u32 %v4466_v14, 16  ;;  %v1160_v37 = vshrl.u32 %v4464_v17, 16  ;;  %v1163_v41 = vshll.u32 %v4464_v17, 16  ;;  %5165 = vmatprep.subr.bf16.mxu0 %v6193_v52  ;;  %v6214_v16 = vsel %vm1596_vm11, %v1651_v6, %v1655_v59  ;;  %v1373_v26 = vld [vmem:[#allocation2 + $0xcc] sm:$0xf] }
 0x163   : > { %v1353_v35 = vsel %vm5937_vm7, %v1157_v27, %v1352_v62  ;;  %v4469_v43 = vpack.c.bf16 %v847_v3, %v847_v3  ;;  %v1179_v45 = vrot.slane %v1177_v29, 7  ;;  %2201 = vmatprep.mubr.bf16.mxu1 %v6214_v16  ;;  %v1854_v48 = vrot.slane %v6200_v24, 1  ;;  %v6243_v27 = vld [vmem:[#allocation2 + $0x78] sm:$0xff]   ;;  %v6245_v3 = vld [vmem:[#allocation2 + $0x84] sm:$0xff]  }
 0x164   : > { %1354 = vst [vmem:[#allocation2 + $0xa8] sm:$0xf] %v1353_v35  ;;  %v1162_v46 = vrot.slane %v1160_v37, 7  ;;  %v803_v36 = vadd.f32 %v5477_v12, %v802_v9  ;;  %5130 = vmatpush3.bf16.msra.mxu1 %v5441_v21  ;;  %v1856_v61 = vrot.slane %v6206_v32, 1  ;;  %v1857_v39 = vrot.slane %v6208_v4, 1  ;;  %v805_v9 = vpop.f32.mrf.mxu1 }
 0x165   : > { %v1203_v56 = vshrl.u32 %v4469_v43, 16  ;;  %v1206_v54 = vshll.u32 %v4469_v43, 16  ;;  %2202 = vmatmul.mubr.bf16.gmra.mxu1 %v6099_v50  ;;  %5131 = vmatprep.subr.bf16.mxu1 %v6202_v40  ;;  %v1182_v62 = vor.u32 %v1180_v34, %v1179_v45  ;;  %v1184_v44 = vrot.slane %v1179_v45, 4  ;;  %v6250_v37 = vld [vmem:[#allocation2 + $0x80] ss:$0 sps:$4 sm:$0x11]  }
 0x166   : > { %v1165_v57 = vor.u32 %v1163_v41, %v1162_v46  ;;  %v1167_v2 = vrot.slane %v1162_v46, 4  ;;  %v6229_v63 = vsel %vm1831_vm10, %v1853_v31, %v1854_v48  ;;  %v845_v21 = vmax.f32 %v803_v36, 0.0  ;;  %v6256_v31 = vld [vmem:[#allocation2 + $0x8c] ss:$0 sps:$4 sm:$0x11]  }
 0x167   : > { %v6226_v5 = vrot.slane %v1203_v56, 7  ;;  %v6232_v7 = vsel %vm1831_vm10, %v1856_v61, %v1857_v39  ;;  %v1183_v14 = vsel %vm5967_vm9, %v1175_v38, %v1182_v62  ;;  %v1364_v17 = vsel %vm5810_vm3, %v1184_v44, %v1363_v42  ;;  %5097 = vmatprep.mubr.bf16.mxu0 %v6229_v63 }
 0x168   : > { %v1166_v6 = vsel %vm5967_vm9, %v1158_v19, %v1165_v57  ;;  %v1357_v59 = vsel %vm5810_vm3, %v1167_v2, %v1356_v47  ;;  %1362 = vst [vmem:[#allocation2 + $0xb8] sm:$0xf] %v1183_v14  ;;  %1365 = vst [vmem:[#allocation2 + $0xbc] sm:$0x1] %v1364_v17  ;;  %v4467_v34 = vpack.c.bf16 %v845_v21, %v845_v21  ;;  %5098 = vmatmul.mubr.bf16.gmra.mxu0 %v6232_v7 }
 0x169   : > { %1355 = vst [vmem:[#allocation2 + $0xac] sm:$0xf] %v1166_v6  ;;  %1358 = vst [vmem:[#allocation2 + $0xb0] sm:$0x1] %v1357_v59  ;;  %v1208_v38 = vor.u32 %v1206_v54, %v6226_v5  ;;  %v1209_v29 = vrot.slane %v6226_v5, 4  ;;  %v814_v19 = vadd.f32 %v5477_v12, %v5068_v22  ;;  %5132 = vmatpush3.bf16.msra.mxu1 %v6202_v40  ;;  %v1658_v35 = vshrl.u32 %v6129_v20, 16 }
 0x16a   : > { %v806_v41 = vadd.f32 %v5477_v12, %v805_v9  ;;  %v1660_v42 = vshll.u32 %v6129_v20, 16  ;;  %v1665_v43 = vshll.u32 %v6143_v15, 16  ;;  %4873 = vmatprep.subr.bf16.mxu1 %v5443_v13  ;;  %v1186_v46 = vshrl.u32 %v4467_v34, 16  ;;  %v1366_v54 = vld [vmem:[#allocation2 + $0xc0] sm:$0xf]  ;;  %v6265_v13 = vld [vmem:[#allocation2 + $0x90] sm:$0xff]  }
 0x16b   : > { %v1374_v45 = vsel %vm5937_vm7, %v1208_v38, %v1373_v26  ;;  %v1189_v47 = vshll.u32 %v4467_v34, 16  ;;  %v848_v22 = vmax.f32 %v814_v19, 0.0  ;;  %v1859_v12 = vrot.slane %v6243_v27, 1  ;;  %v6267_v21 = vld [vmem:[#allocation2 + $0x98] ss:$0 sps:$4 sm:$0x11]  }
 0x16c   : > { %1375 = vst [vmem:[#allocation2 + $0xcc] sm:$0xf] %v1374_v45  ;;  %v846_v48 = vmax.f32 %v806_v41, 0.0  ;;  %v1662_v36 = vrot.slane %v1660_v42, 1  ;;  %v1667_v40 = vrot.slane %v1665_v43, 1  ;;  %v1188_v56 = vrot.slane %v1186_v46, 7 }
 0x16d   : > { %v4470_v61 = vpack.c.bf16 %v848_v22, %v848_v22  ;;  %v1860_v15 = vrot.slane %v6250_v37, 1  ;;  %v1862_v39 = vrot.slane %v6245_v3, 1  ;;  %v1863_v57 = vrot.slane %v6256_v31, 1  ;;  %v6269_v59 = vld [vmem:[#allocation2 + $0x9c] sm:$0xff]   ;;  %v1377_v26 = vld [vmem:[#allocation2 + $0xd4] sm:$0x1] }
 0x16e   : > { %v4468_v62 = vpack.c.bf16 %v846_v48, %v846_v48  ;;  %v1663_v44 = vor.u32 %v1662_v36, %v1658_v35  ;;  %v1670_v2 = vshrl.u32 %v6149_v49, 16  ;;  %v1191_v9 = vor.u32 %v1189_v47, %v1188_v56  ;;  %v1370_v43 = vld [vmem:[#allocation2 + $0xc8] sm:$0x1]  ;;  %v6285_v47 = vld [vmem:[#allocation2 + $0xa4] ss:$0 sps:$4 sm:$0x11]  }
 0x16f   : > { %v1192_v14 = vrot.slane %v1188_v56, 4  ;;  %v1211_v17 = vshrl.u32 %v4470_v61, 16  ;;  %v1214_v6 = vshll.u32 %v4470_v61, 16  ;;  %v6275_v41 = vsel %vm1831_vm10, %v1859_v12, %v1860_v15 }
 0x170   : > { %v1194_v38 = vshrl.u32 %v4468_v62, 16  ;;  %v1197_v34 = vshll.u32 %v4468_v62, 16  ;;  %v6272_v19 = vsel %vm1596_vm11, %v1663_v44, %v1667_v40  ;;  %v1367_v35 = vsel %vm5937_vm7, %v1191_v9, %v1366_v54  ;;  %5101 = vmatprep.mubr.bf16.mxu0 %v6275_v41  ;;  %v6293_v15 = vld [vmem:[#allocation2 + $0xa8] sm:$0xff]   ;;  %v6298_v9 = vld [vmem:[#allocation2 + $0xb0] ss:$0 sps:$4 sm:$0x11]  }
 0x171   : > { %v1213_v42 = vrot.slane %v1211_v17, 7  ;;  %2209 = vmatprep.mubr.bf16.mxu1 %v6272_v19  ;;  %v6282_v45 = vsel %vm1831_vm10, %v1862_v39, %v1863_v57  ;;  %v1672_v46 = vshll.u32 %v6149_v49, 16  ;;  %1368 = vst [vmem:[#allocation2 + $0xc0] sm:$0xf] %v1367_v35  ;;  %v1677_v48 = vshll.u32 %v6157_v10, 16 }
 0x172   : > { %v1196_v22 = vrot.slane %v1194_v38, 7  ;;  %5102 = vmatmul.mubr.bf16.gmra.mxu0 %v6282_v45  ;;  %2210 = vmatmul.mubr.bf16.gmra.mxu1 %v6129_v20  ;;  %v1865_v36 = vrot.slane %v6265_v13, 1  ;;  %v1866_v40 = vrot.slane %v6267_v21, 1  ;;  %v1868_v61 = vrot.slane %v6269_v59, 1 }
 0x173   : > { %v1216_v12 = vor.u32 %v1214_v6, %v1213_v42  ;;  %v1218_v56 = vrot.slane %v1213_v42, 4  ;;  %v1674_v54 = vrot.slane %v1672_v46, 1  ;;  %v1679_v44 = vrot.slane %v1677_v48, 1  ;;  %v6324_v46 = vld [vmem:[#allocation2 + $0xbc] ss:$0 sps:$4 sm:$0x11]  }
 0x174   : > { %v1199_v39 = vor.u32 %v1197_v34, %v1196_v22  ;;  %v1201_v62 = vrot.slane %v1196_v22, 4  ;;  %v6296_v57 = vsel %vm1831_vm10, %v1865_v36, %v1866_v40  ;;  %v1869_v38 = vrot.slane %v6285_v47, 1  ;;  %v6328_v48 = vld [vmem:[#allocation2 + $0xc] sm:$0xff]  }
 0x175   : > { %v1217_v10 = vsel %vm5967_vm9, %v1209_v29, %v1216_v12  ;;  %v1378_v17 = vsel %vm5810_vm3, %v1218_v56, %v1377_v26  ;;  %v1675_v6 = vor.u32 %v1674_v54, %v1670_v2  ;;  %5105 = vmatprep.mubr.bf16.mxu0 %v6296_v57  ;;  %v1682_v5 = vshrl.u32 %v6198_v8, 16 }
 0x176   : > { %1376 = vst [vmem:[#allocation2 + $0xd0] sm:$0xf] %v1217_v10  ;;  %1379 = vst [vmem:[#allocation2 + $0xd4] sm:$0x1] %v1378_v17  ;;  %v1200_v34 = vsel %vm5967_vm9, %v1192_v14, %v1199_v39  ;;  %v1371_v35 = vsel %vm5810_vm3, %v1201_v62, %v1370_v43  ;;  %v1684_v29 = vshll.u32 %v6198_v8, 16  ;;  %v6318_v26 = vsel %vm1831_vm10, %v1868_v61, %v1869_v38  ;;  %v6322_v14 = vld [vmem:[#allocation2 + $0xb4] sm:$0xff]  }
 0x177   : > { %1369 = vst [vmem:[#allocation2 + $0xc4] sm:$0xf] %v1200_v34  ;;  %1372 = vst [vmem:[#allocation2 + $0xc8] sm:$0x1] %v1371_v35  ;;  %v6315_v2 = vsel %vm1596_vm11, %v1675_v6, %v1679_v44  ;;  %v1689_v42 = vshll.u32 %v6200_v24, 16  ;;  %v1871_v51 = vrot.slane %v6293_v15, 1 }
 0x178   : > { %2217 = vmatprep.mubr.bf16.mxu1 %v6315_v2  ;;  %v1686_v43 = vrot.slane %v1684_v29, 1  ;;  %v1872_v22 = vrot.slane %v6298_v9, 1  ;;  %v1696_v40 = vshll.u32 %v6206_v32, 16  ;;  %v1701_v12 = vshll.u32 %v6208_v4, 16 }
 0x179   : > { %v1691_v36 = vrot.slane %v1689_v42, 1  ;;  %v1694_v54 = vshrl.u32 %v6206_v32, 16  ;;  %v1874_v61 = vrot.slane %v6322_v14, 1  ;;  %v1875_v39 = vrot.slane %v6324_v46, 1 }
 0x17a   : > { %5106 = vmatmul.mubr.bf16.gmra.mxu0 %v6318_v26  ;;  %2218 = vmatmul.mubr.bf16.gmra.mxu1 %v6149_v49  ;;  %v1687_v24 = vor.u32 %v1686_v43, %v1682_v5  ;;  %v6335_v56 = vsel %vm1831_vm10, %v1871_v51, %v1872_v22  ;;  %v1698_v62 = vrot.slane %v1696_v40, 1  ;;  %v6344_v4 = vld [vmem:[#allocation2 + $0x14] ss:$0 sps:$4 sm:$0x11]   ;;  %v1600_v10 = vshll.u32 %v6328_v48, 16 }
 0x17b   : > { %7130 = vst [vmem:[#allocation16_spill] sm:$0xff] %v6335_v56  ;;  %5109 = vmatprep.mubr.bf16.mxu0 %v6335_v56  ;;  %v1703_v17 = vrot.slane %v1701_v12, 1  ;;  %v1708_v35 = vshll.u32 %v6243_v27, 16  ;;  %v6354_v5 = vsel %vm1831_vm10, %v1874_v61, %v1875_v39  ;;  %v1598_v43 = vshrl.u32 %v6328_v48, 16 }
 0x17c   : > { %v6342_v44 = vsel %vm1596_vm11, %v1687_v24, %v1691_v36  ;;  %v1699_v38 = vor.u32 %v1698_v62, %v1694_v54  ;;  %7131 = vst [vmem:[#allocation17_spill] sm:$0xff] %v6354_v5  ;;  %v1602_v22 = vrot.slane %v1600_v10, 1  ;;  %v1605_v36 = vshll.u32 %v6344_v4, 16 }
 0x17d   : > { %2225 = vmatprep.mubr.bf16.mxu1 %v6342_v44  ;;  %v6348_v6 = vld [vmem:[#allocation2 + $0xcc] sm:$0xff]   ;;  %v6358_v42 = vld [vmem:[#allocation2 + $0xd4] ss:$0 sps:$4 sm:$0x11]   ;;  %v1706_v24 = vshrl.u32 %v6243_v27, 16  ;;  %v1710_v54 = vrot.slane %v1708_v35, 1 }
 0x17e   : > { %v6350_v34 = vld [vmem:[#allocation2 + $0xc0] sm:$0xff]   ;;  %v6356_v29 = vld [vmem:[#allocation2 + $0xc8] ss:$0 sps:$4 sm:$0x11]   ;;  %v6367_v12 = vsel %vm1596_vm11, %v1699_v38, %v1703_v17  ;;  %v1713_v61 = vshll.u32 %v6250_v37, 16  ;;  %v1880_v62 = vrot.slane %v6348_v6, 1  ;;  %v1603_v60 = vor.u32 %v1602_v22, %v1598_v43 }
 0x17f   : > { %v1877_v51 = vrot.slane %v6350_v34, 1  ;;  %v1878_v40 = vrot.slane %v6356_v29, 1  ;;  %v1881_v10 = vrot.slane %v6358_v42, 1  ;;  %v1711_v17 = vor.u32 %v1710_v54, %v1706_v24 }
 0x180   : > { %v1715_v38 = vrot.slane %v1713_v61, 1  ;;  %v1720_v56 = vshll.u32 %v6245_v3, 16  ;;  %v1725_v22 = vshll.u32 %v6256_v31, 16  ;;  %v1732_v54 = vshll.u32 %v6265_v13, 16 }
 0x181   : > { %v6373_v39 = vsel %vm1831_vm10, %v1877_v51, %v1878_v40  ;;  %v6380_v35 = vsel %vm1831_vm10, %v1880_v62, %v1881_v10  ;;  %v1718_v40 = vshrl.u32 %v6245_v3, 16  ;;  %v1730_v61 = vshrl.u32 %v6265_v13, 16  ;;  %v5455_v62 = vld [vmem:[#allocation6 + $0x228] sm:$0xff]  }
 0x182   : > { %5110 = vmatmul.mubr.bf16.gmra.mxu0 %v6354_v5  ;;  %2226 = vmatmul.mubr.bf16.gmra.mxu1 %v6198_v8  ;;  %v1607_v5 = vrot.slane %v1605_v36, 1  ;;  %v6386_v51 = vsel %vm1596_vm11, %v1711_v17, %v1715_v38  ;;  %v1722_v43 = vrot.slane %v1720_v56, 1  ;;  %v1727_v24 = vrot.slane %v1725_v22, 1  ;;  %v5459_v22 = vld [vmem:[#allocation6 + $0x218] sm:$0xff]  }
 0x183   : > { %2233 = vmatprep.mubr.bf16.mxu1 %v6367_v12  ;;  %5113 = vmatprep.mubr.bf16.mxu0 %v6373_v39  ;;  %v1734_v56 = vrot.slane %v1732_v54, 1  ;;  %v1737_v31 = vshll.u32 %v6267_v21, 16  ;;  %v1744_v38 = vshll.u32 %v6269_v59, 16  ;;  %v1756_v54 = vshll.u32 %v6293_v15, 16 }
 0x184   : > { %v1608_v37 = vsel %vm1596_vm11, %v1603_v60, %v1607_v5  ;;  %v1723_v36 = vor.u32 %v1722_v43, %v1718_v40  ;;  %v5450_v60 = vld [vmem:[#allocation6 + $0x230] sm:$0xff]   ;;  %v5478_v40 = vld [vmem:[#allocation2 + $0x18] sm:$0xff]  }
 0x185   : > { %v1735_v10 = vor.u32 %v1734_v56, %v1730_v61  ;;  %v1739_v17 = vrot.slane %v1737_v31, 1  ;;  %v1746_v43 = vrot.slane %v1744_v38, 1  ;;  %v6412_v61 = vld [vmem:[#allocation2 + $0x24] sm:$0xff]   ;;  %v1754_v56 = vshrl.u32 %v6293_v15, 16 }
 0x186   : > { %v6395_v5 = vsel %vm1596_vm11, %v1723_v36, %v1727_v24  ;;  %v1758_v31 = vrot.slane %v1756_v54, 1 }
 0x187   : > { %v6405_v21 = vsel %vm1596_vm11, %v1735_v10, %v1739_v17  ;;  %v5463_v10 = vld [vmem:[#allocation6 + $0x208] sm:$0xff]  }
 0x188   : > { %v1759_v17 = vor.u32 %v1758_v31, %v1754_v56 }
 0x18a   : > { %5114 = vmatmul.mubr.bf16.gmra.mxu0 %v6380_v35  ;;  %2234 = vmatmul.mubr.bf16.gmra.mxu1 %v6206_v32 }
 0x18b   : > { %2241 = vmatprep.mubr.bf16.mxu1 %v6386_v51  ;;  %2643 = vmatprep.mubr.bf16.mxu0 %v1608_v37  ;;  %v5458_v37 = vld [vmem:[#allocation6 + $0x220] sm:$0xff]  }
 0x192   : > { %2644 = vmatmul.mubr.bf16.vlgmr.msra.gmra.mxu0 %v6328_v48  ;;  %2242 = vmatmul.mubr.bf16.gmra.mxu1 %v6243_v27 }
 0x193   : > { %2651 = vmatprep.mubr.bf16.mxu0 %v6091_v33  ;;  %2249 = vmatprep.mubr.bf16.mxu1 %v6395_v5  ;;  %v1742_v33 = vshrl.u32 %v6269_v59, 16 }
 0x194   : > { %5166 = vmatpush3.bf16.msra.mxu0 %v6193_v52  ;;  %v1749_v52 = vshll.u32 %v6285_v47, 16 }
 0x195   : > { %5167 = vmatprep.subr.bf16.mxu0 %v5450_v60  ;;  %v1747_v36 = vor.u32 %v1746_v43, %v1742_v33  ;;  %v1766_v33 = vshrl.u32 %v6322_v14, 16 }
 0x196   : > { %v1751_v24 = vrot.slane %v1749_v52, 1  ;;  %v1773_v52 = vshll.u32 %v6324_v46, 16  ;;  %v1778_v46 = vshrl.u32 %v6350_v34, 16 }
 0x198   : > { %5168 = vmatpush3.bf16.msra.mxu0 %v5450_v60  ;;  %v5462_v60 = vld [vmem:[#allocation6 + $0x210] sm:$0xff]   ;;  %v6417_v47 = vsel %vm1596_vm11, %v1747_v36, %v1751_v24  ;;  %v1775_v36 = vrot.slane %v1773_v52, 1  ;;  %v5449_v52 = vld [vmem:[#allocation6 + $0x1a8] sm:$0xff]  }
 0x199   : > { %5169 = vmatprep.subr.bf16.mxu0 %v5455_v62 }
 0x19a   : > { %2652 = vmatmul.mubr.bf16.gmra.mxu0 %v5478_v40  ;;  %2250 = vmatmul.mubr.bf16.gmra.mxu1 %v6245_v3  ;;  %v5466_v40 = vld [vmem:[#allocation6 + $0x200] sm:$0xff]  }
 0x19b   : > { %2659 = vmatprep.mubr.bf16.mxu0 %v6103_v53  ;;  %2257 = vmatprep.mubr.bf16.mxu1 %v6405_v21 }
 0x19c   : > { %5170 = vmatpush3.bf16.msra.mxu0 %v5455_v62  ;;  %v1761_v62 = vshll.u32 %v6298_v9, 16 }
 0x19d   : > { %5171 = vmatprep.subr.bf16.mxu0 %v5458_v37 }
 0x19e   : > { %v1763_v38 = vrot.slane %v1761_v62, 1  ;;  %v1792_v62 = vshll.u32 %v6348_v6, 16 }
 0x1a0   : > { %5172 = vmatpush3.bf16.msra.mxu0 %v5458_v37  ;;  %v1768_v37 = vshll.u32 %v6322_v14, 16  ;;  %v6427_v9 = vsel %vm1596_vm11, %v1759_v17, %v1763_v38  ;;  %v1794_v17 = vrot.slane %v1792_v62, 1  ;;  %v5465_v62 = vld [vmem:[#allocation6 + $0x180] sm:$0xff]  }
 0x1a1   : > { %5173 = vmatprep.subr.bf16.mxu0 %v5459_v22 }
 0x1a2   : > { %2660 = vmatmul.mubr.bf16.gmra.mxu0 %v6412_v61  ;;  %2258 = vmatmul.mubr.bf16.gmra.mxu1 %v6265_v13  ;;  %v1770_v43 = vrot.slane %v1768_v37, 1 }
 0x1a3   : > { %2667 = vmatprep.mubr.bf16.mxu0 %v6162_v30  ;;  %2265 = vmatprep.mubr.bf16.mxu1 %v6417_v47 }
 0x1a4   : > { %5174 = vmatpush3.bf16.msra.mxu0 %v5459_v22  ;;  %v1771_v22 = vor.u32 %v1770_v43, %v1766_v33  ;;  %v5446_v43 = vld [vmem:[#allocation6 + $0x1f0] sm:$0xff]  }
 0x1a5   : > { %5175 = vmatprep.subr.bf16.mxu0 %v5462_v60 }
 0x1a6   : > { %v6437_v24 = vsel %vm1596_vm11, %v1771_v22, %v1775_v36  ;;  %v5451_v22 = vld [vmem:[#allocation6 + $0x1e0] sm:$0xff]   ;;  %v5453_v36 = vld [vmem:[#allocation6 + $0x1d8] sm:$0xff]  }
 0x1a8   : > { %5176 = vmatpush3.bf16.msra.mxu0 %v5462_v60  ;;  %v1785_v60 = vshll.u32 %v6356_v29, 16  ;;  %v1797_v29 = vshll.u32 %v6358_v42, 16  ;;  %v1833_v42 = vrot.slane %v6344_v4, 1  ;;  %v5448_v4 = vld [vmem:[#allocation6 + $0x1e8] sm:$0xff]  }
 0x1a9   : > { %5177 = vmatprep.subr.bf16.mxu0 %v5463_v10 }
 0x1aa   : > { %2668 = vmatmul.mubr.bf16.gmra.mxu0 %v6078_v11  ;;  %2266 = vmatmul.mubr.bf16.gmra.mxu1 %v6269_v59  ;;  %v1780_v11 = vshll.u32 %v6350_v34, 16  ;;  %v1787_v31 = vrot.slane %v1785_v60, 1  ;;  %v1799_v37 = vrot.slane %v1797_v29, 1  ;;  %v5460_v60 = vld [vmem:[#allocation6 + $0x1c8] sm:$0xff]  }
 0x1ab   : > { %2675 = vmatprep.mubr.bf16.mxu0 %v6214_v16  ;;  %2273 = vmatprep.mubr.bf16.mxu1 %v6427_v9 }
 0x1ac   : > { %5178 = vmatpush3.bf16.msra.mxu0 %v5463_v10  ;;  %v1782_v54 = vrot.slane %v1780_v11, 1  ;;  %v1790_v10 = vshrl.u32 %v6348_v6, 16  ;;  %v5454_v11 = vld [vmem:[#allocation6 + $0x198] sm:$0xff]  }
 0x1ad   : > { %5179 = vmatprep.subr.bf16.mxu0 %v5466_v40 }
 0x1ae   : > { %v1783_v56 = vor.u32 %v1782_v54, %v1778_v46  ;;  %v1795_v38 = vor.u32 %v1794_v17, %v1790_v10  ;;  %v5456_v46 = vld [vmem:[#allocation6 + $0x1d0] sm:$0xff]   ;;  %v386_v10 = vld [vmem:[#allocation2 + $0xd8] sm:$0x1] }
 0x1af   : > { %v5457_v54 = vld [vmem:[#allocation6 + $0x190] sm:$0xff]   ;;  %v387_v29 = vsel %vm5810_vm3, 0, %v386_v10 }
 0x1b0   : > { %5180 = vmatpush3.bf16.msra.mxu0 %v5466_v40  ;;  %v1832_v40 = vrot.slane %v6328_v48, 1  ;;  %v5447_v48 = vld [vmem:[#allocation6 + $0x1b0] sm:$0xff]   ;;  %388 = vst [vmem:[#allocation2 + $0xd8] sm:$0x1] %v387_v29 }
 0x1b1   : > { %v448_v17 = vld [vmem:[#allocation2 + $0xe0] sm:$0x1] }
 0x1b2   : > { %2676 = vmatmul.mubr.bf16.gmra.mxu0 %v6099_v50  ;;  %2274 = vmatmul.mubr.bf16.gmra.mxu1 %v6293_v15  ;;  %v6447_v50 = vsel %vm1596_vm11, %v1783_v56, %v1787_v31  ;;  %v1834_v33 = vsel %vm1831_vm10, %v1832_v40, %v1833_v42  ;;  %v5461_v56 = vld [vmem:[#allocation6 + $0x188] sm:$0xff]   ;;  %v5464_v31 = vld [vmem:[#allocation6 + $0x1c0] sm:$0xff]   ;;  %v7133_v40 = vld [vmem:[#allocation17_spill] sm:$0xff] }
 0x1b3   : > { %2683 = vmatprep.mubr.bf16.mxu0 %v6272_v19  ;;  %2281 = vmatprep.mubr.bf16.mxu1 %v6437_v24 }
 0x1ba   : > { %2684 = vmatmul.mubr.bf16.gmra.mxu0 %v6129_v20  ;;  %2282 = vmatmul.mubr.bf16.gmra.mxu1 %v6322_v14  ;;  %v6456_v20 = vsel %vm1596_vm11, %v1795_v38, %v1799_v37  ;;  %v449_v38 = vsel %vm5815_vm4, 0, %v448_v17  ;;  %v7132_v37 = vld [vmem:[#allocation16_spill] sm:$0xff] }
 0x1bb   : > { %2691 = vmatprep.mubr.bf16.mxu0 %v6315_v2  ;;  %2289 = vmatprep.mubr.bf16.mxu1 %v6447_v50  ;;  %450 = vst [vmem:[#allocation2 + $0xe0] sm:$0x1] %v449_v38 }
 0x1c2   : > { %2692 = vmatmul.mubr.bf16.gmra.mxu0 %v6149_v49  ;;  %2290 = vmatmul.mubr.bf16.gmra.mxu1 %v6350_v34  ;;  %v5444_v49 = vld [vmem:[#allocation6 + $0x1b8] sm:$0xff]  }
 0x1c3   : > { %2699 = vmatprep.mubr.bf16.mxu0 %v6342_v44  ;;  %2297 = vmatprep.mubr.bf16.mxu1 %v6456_v20 }
 0x1ca   : > { %2700 = vmatmul.mubr.bf16.gmra.mxu0 %v6198_v8  ;;  %2298 = vmatmul.mubr.bf16.gmra.mxu1 %v6348_v6 }
 0x1cb   : > { %2707 = vmatprep.mubr.bf16.mxu0 %v6367_v12  ;;  %5133 = vmatprep.mubr.bf16.mxu1 %v1834_v33 }
 0x1d2   : > { %2708 = vmatmul.mubr.bf16.gmra.mxu0 %v6206_v32  ;;  %5134 = vmatmul.mubr.bf16.vlgmr.msra.gmra.mxu1 %v6058_v25  ;;  %v5452_v25 = vld [vmem:[#allocation6 + $0x1a0] sm:$0xff]  }
 0x1d3   : > { %2715 = vmatprep.mubr.bf16.mxu0 %v6386_v51  ;;  %4874 = vmatpush3.bf16.msra.mxu1 %v5444_v49  ;;  %v465_v49 = vld [vmem:[#allocation2 + $0xd8] sm:$0xf] }
 0x1d4   : > { %5137 = vmatprep.mubr.bf16.mxu1 %v6062_v58  ;;  %4875 = vmatprep.subr.bf16.mxu1 %v5446_v43  ;;  %v469_v43 = vld [vmem:[#allocation2 + $0xe0] sm:$0x1] }
 0x1d5   : > { %v470_v1 = vsel %vm5810_vm3, 0, %v469_v43 }
 0x1d6   : > { %471 = vst [vmem:[#allocation2 + $0xe0] sm:$0x1] %v470_v1 }
 0x1d7   : > { %4876 = vmatpush3.bf16.msra.mxu1 %v5447_v48 }
 0x1d8   : > { %4877 = vmatprep.subr.bf16.mxu1 %v5448_v4 }
 0x1da   : > { %2716 = vmatmul.mubr.bf16.gmra.mxu0 %v6243_v27  ;;  %5138 = vmatmul.mubr.bf16.gmra.mxu1 %v6106_v55 }
 0x1db   : > { %2723 = vmatprep.mubr.bf16.mxu0 %v6395_v5  ;;  %5141 = vmatprep.mubr.bf16.mxu1 %v6126_v18 }
 0x1dc   : > { %4878 = vmatpush3.bf16.msra.mxu1 %v5449_v52  ;;  %v466_v52 = vsel %vm5937_vm7, 0, %v465_v49 }
 0x1dd   : > { %4879 = vmatprep.subr.bf16.mxu1 %v5451_v22  ;;  %467 = vst [vmem:[#allocation2 + $0xd8] sm:$0xf] %v466_v52 }
 0x1e0   : > { %4880 = vmatpush3.bf16.msra.mxu1 %v5452_v25 }
 0x1e1   : > { %4881 = vmatprep.subr.bf16.mxu1 %v5453_v36 }
 0x1e2   : > { %2724 = vmatmul.mubr.bf16.gmra.mxu0 %v6245_v3  ;;  %5142 = vmatmul.mubr.bf16.gmra.mxu1 %v6165_v23 }
 0x1e3   : > { %2731 = vmatprep.mubr.bf16.mxu0 %v6405_v21  ;;  %5145 = vmatprep.mubr.bf16.mxu1 %v6189_v28 }
 0x1e4   : > { %4882 = vmatpush3.bf16.msra.mxu1 %v5454_v11 }
 0x1e5   : > { %4883 = vmatprep.subr.bf16.mxu1 %v5456_v46 }
 0x1e8   : > { %4884 = vmatpush3.bf16.msra.mxu1 %v5457_v54 }
 0x1e9   : > { %4885 = vmatprep.subr.bf16.mxu1 %v5460_v60 }
 0x1ea   : > { %2732 = vmatmul.mubr.bf16.gmra.mxu0 %v6265_v13  ;;  %5146 = vmatmul.mubr.bf16.gmra.mxu1 %v6229_v63 }
 0x1eb   : > { %2739 = vmatprep.mubr.bf16.mxu0 %v6417_v47  ;;  %5149 = vmatprep.mubr.bf16.mxu1 %v6232_v7 }
 0x1ec   : > { %4886 = vmatpush3.bf16.msra.mxu1 %v5461_v56 }
 0x1ed   : > { %4887 = vmatprep.subr.bf16.mxu1 %v5464_v31 }
 0x1f0   : > { %4888 = vmatpush3.bf16.msra.mxu1 %v5465_v62 }
 0x1f2   : > { %2740 = vmatmul.mubr.bf16.gmra.mxu0 %v6269_v59  ;;  %5150 = vmatmul.mubr.bf16.gmra.mxu1 %v6275_v41 }
 0x1f3   : > { %2747 = vmatprep.mubr.bf16.mxu0 %v6427_v9  ;;  %5153 = vmatprep.mubr.bf16.mxu1 %v6282_v45 }
 0x1fa   : > { %2748 = vmatmul.mubr.bf16.gmra.mxu0 %v6293_v15  ;;  %5154 = vmatmul.mubr.bf16.gmra.mxu1 %v6296_v57 }
 0x1fb   : > { %2755 = vmatprep.mubr.bf16.mxu0 %v6437_v24  ;;  %5157 = vmatprep.mubr.bf16.mxu1 %v6318_v26 }
 0x202   : > { %2756 = vmatmul.mubr.bf16.gmra.mxu0 %v6322_v14  ;;  %5158 = vmatmul.mubr.bf16.gmra.mxu1 %v7132_v37  ;;  %v5087_v42 = vpop.f32.mrf.mxu0 }
 0x203   : > { %2763 = vmatprep.mubr.bf16.mxu0 %v6447_v50  ;;  %5161 = vmatprep.mubr.bf16.mxu1 %v7133_v40 }
 0x204   : > { %v2340_v33 = vpop.f32.mrf.mxu0 }
 0x206   : > { %v5088_v48 = vpop.f32.mrf.mxu0 }
 0x208   : > { %v2343_v36 = vpop.f32.mrf.mxu0 }
 0x209   : > { %v4617_v22 = vpop.f32.mrf.mxu1 }
 0x20a   : > { %2764 = vmatmul.mubr.bf16.gmra.mxu0 %v6350_v34  ;;  %5162 = vmatmul.mubr.bf16.gmra.mxu1 %v6373_v39 }
 0x20b   : > { %5181 = vmatprep.mubr.bf16.mxu0 %v6062_v58  ;;  %3158 = vmatprep.mubr.bf16.mxu1 %v6103_v53  ;;  %v4618_v25 = vpop.f32.mrf.mxu1 }
 0x20c   : > { %v4619_v11 = vadd.f32 %v4618_v25, %v4617_v22 }
 0x20d   : > { %v4620_v46 = vpop.f32.mrf.mxu1 }
 0x20e   : > { %v6506_v54 = vadd.f32 %v4619_v11, %v2340_v33 }
 0x20f   : > { %v4621_v0 = vpop.f32.mrf.mxu1 }
 0x210   : > { %v5091_v60 = vpop.f32.mrf.mxu0  ;;  %v4622_v56 = vadd.f32 %v4621_v0, %v4620_v46 }
 0x211   : > { %v4623_v62 = vpop.f32.mrf.mxu1 }
 0x212   : > { %5182 = vmatmul.mubr.bf16.vlgmr.msra.gmra.mxu0 %v6106_v55  ;;  %3159 = vmatmul.mubr.bf16.vlgmr.msra.gmra.mxu1 %v6412_v61  ;;  %v2356_v31 = vpop.f32.mrf.mxu0  ;;  %v6512_v58 = vadd.f32 %v4622_v56, %v2343_v36  ;;  %v5480_v55 = vld [vmem:[#allocation2 + $0x30] sm:$0xff]   ;;  %v5481_v36 = vld [vmem:[#allocation2 + $0x3c] sm:$0xff]  }
 0x213   : > { %5185 = vmatprep.mubr.bf16.mxu0 %v6126_v18  ;;  %3166 = vmatprep.mubr.bf16.mxu1 %v6162_v30  ;;  %v4624_v53 = vpop.f32.mrf.mxu1 }
 0x214   : > { %v4625_v10 = vadd.f32 %v4624_v53, %v4623_v62  ;;  %v5092_v17 = vpop.f32.mrf.mxu0 }
 0x215   : > { %v4626_v29 = vpop.f32.mrf.mxu1 }
 0x216   : > { %v6514_v38 = vadd.f32 %v5087_v42, %v4625_v10  ;;  %v2359_v61 = vpop.f32.mrf.mxu0 }
 0x217   : > { %v4627_v33 = vpop.f32.mrf.mxu1 }
 0x218   : > { %v4628_v49 = vadd.f32 %v4627_v33, %v4626_v29 }
 0x21a   : > { %5186 = vmatmul.mubr.bf16.gmra.mxu0 %v6165_v23  ;;  %3167 = vmatmul.mubr.bf16.gmra.mxu1 %v5480_v55  ;;  %v6519_v18 = vadd.f32 %v5088_v48, %v4628_v49  ;;  %v5483_v55 = vld [vmem:[#allocation2 + $0x54] sm:$0xff]  }
 0x21b   : > { %5189 = vmatprep.mubr.bf16.mxu0 %v6189_v28  ;;  %3174 = vmatprep.mubr.bf16.mxu1 %v6214_v16  ;;  %v4629_v30 = vpop.f32.mrf.mxu1 }
 0x21d   : > { %v4630_v43 = vpop.f32.mrf.mxu1 }
 0x21e   : > { %v5095_v4 = vpop.f32.mrf.mxu0  ;;  %v4631_v52 = vadd.f32 %v4630_v43, %v4629_v30 }
 0x21f   : > { %v4632_v1 = vpop.f32.mrf.mxu1 }
 0x220   : > { %v2372_v42 = vpop.f32.mrf.mxu0  ;;  %v6521_v22 = vadd.f32 %v4631_v52, %v2356_v31 }
 0x221   : > { %v4633_v25 = vpop.f32.mrf.mxu1 }
 0x222   : > { %5190 = vmatmul.mubr.bf16.gmra.mxu0 %v6229_v63  ;;  %v6524_v23 = vpop.f32.mrf.mxu0  ;;  %3175 = vmatmul.mubr.bf16.gmra.mxu1 %v5481_v36  ;;  %v4634_v28 = vadd.f32 %v4633_v25, %v4632_v1  ;;  %v5482_v63 = vld [vmem:[#allocation2 + $0x48] sm:$0xff]  }
 0x223   : > { %5193 = vmatprep.mubr.bf16.mxu0 %v6232_v7  ;;  %3182 = vmatprep.mubr.bf16.mxu1 %v6272_v19 }
 0x224   : > { %v6528_v16 = vadd.f32 %v4634_v28, %v2359_v61  ;;  %v2375_v48 = vpop.f32.mrf.mxu0 }
 0x225   : > { %v4635_v11 = vpop.f32.mrf.mxu1 }
 0x227   : > { %v4636_v46 = vpop.f32.mrf.mxu1 }
 0x228   : > { %v4637_v0 = vadd.f32 %v4636_v46, %v4635_v11  ;;  %v6530_v56 = vpop.f32.mrf.mxu0 }
 0x229   : > { %v4638_v31 = vpop.f32.mrf.mxu1 }
 0x22a   : > { %5194 = vmatmul.mubr.bf16.gmra.mxu0 %v6275_v41  ;;  %3183 = vmatmul.mubr.bf16.gmra.mxu1 %v5482_v63  ;;  %v6533_v62 = vadd.f32 %v5091_v60, %v4637_v0  ;;  %v2388_v7 = vpop.f32.mrf.mxu0  ;;  %v6568_v0 = vld [vmem:[#allocation2 + $0xd8] sm:$0xff]  }
 0x22b   : > { %5197 = vmatprep.mubr.bf16.mxu0 %v6282_v45  ;;  %3190 = vmatprep.mubr.bf16.mxu1 %v6315_v2  ;;  %v4639_v19 = vpop.f32.mrf.mxu1  ;;  %v1883_v63 = vrot.slane %v6568_v0, 1 }
 0x22c   : > { %v4640_v53 = vadd.f32 %v4639_v19, %v4638_v31  ;;  %v6537_v10 = vpop.f32.mrf.mxu0 }
 0x22e   : > { %v6539_v29 = vadd.f32 %v5092_v17, %v4640_v53  ;;  %v2391_v33 = vpop.f32.mrf.mxu0 }
 0x232   : > { %v6541_v49 = vpop.f32.mrf.mxu0  ;;  %5198 = vmatmul.mubr.bf16.gmra.mxu0 %v6296_v57  ;;  %v4641_v41 = vpop.f32.mrf.mxu1  ;;  %3191 = vmatmul.mubr.bf16.gmra.mxu1 %v5483_v55 }
 0x233   : > { %5201 = vmatprep.mubr.bf16.mxu0 %v6318_v26  ;;  %3198 = vmatprep.mubr.bf16.mxu1 %v6342_v44 }
 0x234   : > { %v6546_v45 = vpop.f32.mrf.mxu0  ;;  %v4642_v2 = vpop.f32.mrf.mxu1 }
 0x235   : > { %v4643_v60 = vadd.f32 %v4642_v2, %v4641_v41 }
 0x236   : > { %v6548_v61 = vpop.f32.mrf.mxu0  ;;  %v4644_v17 = vpop.f32.mrf.mxu1 }
 0x237   : > { %v6550_v30 = vadd.f32 %v4643_v60, %v2372_v42 }
 0x238   : > { %v6552_v43 = vpop.f32.mrf.mxu0  ;;  %v4645_v52 = vpop.f32.mrf.mxu1 }
 0x239   : > { %v4646_v57 = vadd.f32 %v4645_v52, %v4644_v17 }
 0x23a   : > { %v6554_v1 = vpop.f32.mrf.mxu0  ;;  %5202 = vmatmul.mubr.bf16.gmra.mxu0 %v7132_v37  ;;  %v4647_v26 = vpop.f32.mrf.mxu1  ;;  %3199 = vmatmul.mubr.bf16.gmra.mxu1 %v6198_v8  ;;  %v6570_v37 = vld [vmem:[#allocation2 + $0xe0] ss:$0 sps:$4 sm:$0x11]  }
 0x23b   : > { %5205 = vmatprep.mubr.bf16.mxu0 %v7133_v40  ;;  %v6559_v44 = vadd.f32 %v4646_v57, %v2375_v48  ;;  %3206 = vmatprep.mubr.bf16.mxu1 %v6367_v12  ;;  %v1884_v19 = vrot.slane %v6570_v37, 1 }
 0x23c   : > { %v6562_v25 = vpop.f32.mrf.mxu0  ;;  %v4648_v42 = vpop.f32.mrf.mxu1 }
 0x23d   : > { %v4649_v36 = vadd.f32 %v4648_v42, %v4647_v26 }
 0x23e   : > { %v6564_v28 = vpop.f32.mrf.mxu0  ;;  %v4650_v11 = vpop.f32.mrf.mxu1 }
 0x23f   : > { %v6566_v46 = vadd.f32 %v5095_v4, %v4649_v36 }
 0x240   : > { %v6572_v8 = vpop.f32.mrf.mxu0  ;;  %v4651_v40 = vpop.f32.mrf.mxu1 }
 0x241   : > { %v4652_v48 = vadd.f32 %v4651_v40, %v4650_v11 }
 0x242   : > { %v6574_v31 = vpop.f32.mrf.mxu0  ;;  %5206 = vmatmul.mubr.bf16.gmra.mxu0 %v6373_v39  ;;  %v4653_v12 = vpop.f32.mrf.mxu1  ;;  %3207 = vmatmul.mubr.bf16.gmra.mxu1 %v6206_v32  ;;  %v1885_v32 = vsel %vm1831_vm10, %v1883_v63, %v1884_v19 }
 0x243   : > { %5209 = vmatprep.mubr.bf16.mxu0 %v6380_v35  ;;  %v6580_v4 = vadd.f32 %v6524_v23, %v4652_v48  ;;  %3214 = vmatprep.mubr.bf16.mxu1 %v6386_v51 }
 0x244   : > { %v6585_v53 = vpop.f32.mrf.mxu0  ;;  %v4654_v41 = vpop.f32.mrf.mxu1 }
 0x245   : > { %v4655_v55 = vadd.f32 %v4654_v41, %v4653_v12 }
 0x246   : > { %v6587_v2 = vpop.f32.mrf.mxu0  ;;  %v4656_v39 = vpop.f32.mrf.mxu1 }
 0x247   : > { %v6589_v60 = vadd.f32 %v4655_v55, %v2388_v7 }
 0x248   : > { %v6592_v35 = vpop.f32.mrf.mxu0  ;;  %v4657_v23 = vpop.f32.mrf.mxu1 }
 0x249   : > { %v4658_v17 = vadd.f32 %v4657_v23, %v4656_v39 }
 0x24a   : > { %v6594_v51 = vpop.f32.mrf.mxu0  ;;  %v4659_v52 = vpop.f32.mrf.mxu1  ;;  %3215 = vmatmul.mubr.bf16.gmra.mxu1 %v6243_v27  ;;  %5210 = vmatmul.mubr.bf16.gmra.mxu0 %v1885_v32  ;;  %v5469_v27 = vld [vmem:[%s7090_s5 + $0x38] sm:$0xff]   ;;  %v5470_v32 = vld [vmem:[%s7090_s5 + $0x30] sm:$0xff]  }
 0x24b   : > { %v6597_v57 = vadd.f32 %v4658_v17, %v2391_v33  ;;  %3222 = vmatprep.mubr.bf16.mxu1 %v6395_v5  ;;  %5213 = vmatprep.subr.bf16.mxu0 %v5469_v27 }
 0x24c   : > { %v6600_v26 = vpop.f32.mrf.mxu0  ;;  %v4660_v7 = vpop.f32.mrf.mxu1  ;;  %5214 = vmatpush3.bf16.msra.mxu0 %v5469_v27 }
 0x24d   : > { %v4661_v42 = vadd.f32 %v4660_v7, %v4659_v52  ;;  %5215 = vmatprep.subr.bf16.mxu0 %v5470_v32 }
 0x24e   : > { %v6602_v36 = vpop.f32.mrf.mxu0  ;;  %v4662_v11 = vpop.f32.mrf.mxu1 }
 0x24f   : > { %v6605_v40 = vadd.f32 %v6530_v56, %v4661_v42 }
 0x250   : > { %v6607_v48 = vpop.f32.mrf.mxu0  ;;  %v4663_v12 = vpop.f32.mrf.mxu1  ;;  %5216 = vmatpush3.bf16.msra.mxu0 %v5470_v32 }
 0x251   : > { %v4664_v63 = vadd.f32 %v4663_v12, %v4662_v11  ;;  %v5471_v11 = vld [vmem:[%s7090_s5 + $0x28] sm:$0xff]  }
 0x252   : > { %v4753_v33 = vpop.f32.mrf.mxu0  ;;  %v4665_v5 = vpop.f32.mrf.mxu1  ;;  %3223 = vmatmul.mubr.bf16.gmra.mxu1 %v6245_v3  ;;  %5217 = vmatprep.subr.bf16.mxu0 %v5471_v11 }
 0x253   : > { %v6614_v19 = vadd.f32 %v6537_v10, %v4664_v63  ;;  %3230 = vmatprep.mubr.bf16.mxu1 %v6405_v21 }
 0x254   : > { %v4754_v56 = vpop.f32.mrf.mxu0  ;;  %v4666_v41 = vpop.f32.mrf.mxu1  ;;  %5218 = vmatpush3.bf16.msra.mxu0 %v5471_v11 }
 0x255   : > { %v4755_v55 = vadd.f32 %v4754_v56, %v4753_v33  ;;  %v4667_v39 = vadd.f32 %v4666_v41, %v4665_v5  ;;  %v5472_v56 = vld [vmem:[%s7090_s5 + $0x20] sm:$0xff]  }
 0x256   : > { %v4756_v23 = vpop.f32.mrf.mxu0  ;;  %v4668_v17 = vpop.f32.mrf.mxu1  ;;  %5219 = vmatprep.subr.bf16.mxu0 %v5472_v56 }
 0x257   : > { %v6621_v52 = vadd.f32 %v4667_v39, %v6546_v45  ;;  %v6624_v3 = vadd.f32 %v4755_v55, %v6506_v54 }
 0x258   : > { %v4757_v21 = vpop.f32.mrf.mxu0  ;;  %v4669_v10 = vpop.f32.mrf.mxu1  ;;  %5220 = vmatpush3.bf16.msra.mxu0 %v5472_v56 }
 0x259   : > { %v4758_v7 = vadd.f32 %v4757_v21, %v4756_v23  ;;  %v6626_v42 = vadd.f32 %v4669_v10, %v4668_v17 }
 0x25a   : > { %v4759_v12 = vpop.f32.mrf.mxu0  ;;  %v4671_v63 = vpop.f32.mrf.mxu1  ;;  %3231 = vmatmul.mubr.bf16.gmra.mxu1 %v6265_v13 }
 0x25b   : > { %3238 = vmatprep.mubr.bf16.mxu1 %v6417_v47  ;;  %v6634_v54 = vadd.f32 %v4758_v7, %v6512_v58 }
 0x25c   : > { %v4760_v45 = vpop.f32.mrf.mxu0  ;;  %v4672_v27 = vpop.f32.mrf.mxu1 }
 0x25d   : > { %v4761_v33 = vadd.f32 %v4760_v45, %v4759_v12  ;;  %v4673_v5 = vadd.f32 %v4672_v27, %v4671_v63  ;;  %v5473_v63 = vld [vmem:[%s7090_s5 + $0x18] sm:$0xff]  }
 0x25e   : > { %v4762_v41 = vpop.f32.mrf.mxu0  ;;  %v4674_v55 = vpop.f32.mrf.mxu1  ;;  %5221 = vmatprep.subr.bf16.mxu0 %v5473_v63 }
 0x25f   : > { %v6640_v39 = vadd.f32 %v6541_v49, %v4673_v5  ;;  %v6643_v13 = vadd.f32 %v4761_v33, %v6514_v38  ;;  %5222 = vmatpush3.bf16.msra.mxu0 %v5473_v63 }
 0x260   : > { %v4763_v47 = vpop.f32.mrf.mxu0  ;;  %v4675_v58 = vpop.f32.mrf.mxu1 }
 0x261   : > { %v4764_v32 = vadd.f32 %v4763_v47, %v4762_v41  ;;  %v4676_v23 = vadd.f32 %v4675_v58, %v4674_v55 }
 0x262   : > { %v4765_v17 = vpop.f32.mrf.mxu0  ;;  %v4677_v21 = vpop.f32.mrf.mxu1  ;;  %3239 = vmatmul.mubr.bf16.gmra.mxu1 %v6269_v59 }
 0x263   : > { %v6647_v10 = vadd.f32 %v6548_v61, %v4676_v23  ;;  %3246 = vmatprep.mubr.bf16.mxu1 %v6427_v9  ;;  %v6651_v49 = vadd.f32 %v4764_v32, %v6519_v18 }
 0x264   : > { %v4766_v38 = vpop.f32.mrf.mxu0  ;;  %v4678_v7 = vpop.f32.mrf.mxu1 }
 0x265   : > { %v4767_v11 = vadd.f32 %v4766_v38, %v4765_v17  ;;  %v4679_v12 = vadd.f32 %v4678_v7, %v4677_v21  ;;  %v5476_v21 = vld [vmem:[%s7090_s5] sm:$0xff]  }
 0x266   : > { %v4768_v45 = vpop.f32.mrf.mxu0  ;;  %v4680_v27 = vpop.f32.mrf.mxu1 }
 0x267   : > { %v6657_v59 = vadd.f32 %v4679_v12, %v6562_v25  ;;  %v6660_v61 = vadd.f32 %v4767_v11, %v6521_v22  ;;  %v5474_v22 = vld [vmem:[%s7090_s5 + $0x10] sm:$0xff]   ;;  %v5475_v25 = vld [vmem:[%s7090_s5 + $0x8] sm:$0xff]  }
 0x268   : > { %v4769_v9 = vpop.f32.mrf.mxu0  ;;  %v4681_v18 = vpop.f32.mrf.mxu1  ;;  %5223 = vmatprep.subr.bf16.mxu0 %v5474_v22 }
 0x269   : > { %v4770_v33 = vadd.f32 %v4769_v9, %v4768_v45  ;;  %v6662_v5 = vadd.f32 %v4681_v18, %v4680_v27  ;;  %5224 = vmatpush3.bf16.msra.mxu0 %v5474_v22  ;;  %v1804_v18 = vshll.u32 %v6568_v0, 16 }
 0x26a   : > { %v4771_v56 = vpop.f32.mrf.mxu0  ;;  %v4683_v41 = vpop.f32.mrf.mxu1  ;;  %3247 = vmatmul.mubr.bf16.gmra.mxu1 %v6293_v15  ;;  %5225 = vmatprep.subr.bf16.mxu0 %v5475_v25 }
 0x26b   : > { %3254 = vmatprep.mubr.bf16.mxu1 %v6437_v24  ;;  %v6667_v55 = vadd.f32 %v4770_v33, %v6528_v16 }
 0x26c   : > { %v4772_v47 = vpop.f32.mrf.mxu0  ;;  %v4684_v58 = vpop.f32.mrf.mxu1 }
 0x26d   : > { %v4773_v32 = vadd.f32 %v4772_v47, %v4771_v56  ;;  %v4685_v23 = vadd.f32 %v4684_v58, %v4683_v41  ;;  %5226 = vmatpush3.bf16.msra.mxu0 %v5475_v25  ;;  %v1806_v47 = vrot.slane %v1804_v18, 1  ;;  %v1809_v58 = vshll.u32 %v6570_v37, 16 }
 0x26e   : > { %v4774_v17 = vpop.f32.mrf.mxu0  ;;  %v4686_v15 = vpop.f32.mrf.mxu1  ;;  %5227 = vmatprep.subr.bf16.mxu0 %v5476_v21 }
 0x26f   : > { %v6676_v24 = vadd.f32 %v6554_v1, %v4685_v23  ;;  %v6679_v16 = vadd.f32 %v4773_v32, %v6533_v62 }
 0x270   : > { %v4775_v38 = vpop.f32.mrf.mxu0  ;;  %v4687_v7 = vpop.f32.mrf.mxu1 }
 0x271   : > { %v4776_v11 = vadd.f32 %v4775_v38, %v4774_v17  ;;  %v4688_v12 = vadd.f32 %v4687_v7, %v4686_v15  ;;  %5228 = vmatpush3.bf16.msra.mxu0 %v5476_v21  ;;  %v1811_v7 = vrot.slane %v1809_v58, 1 }
 0x272   : > { %v4777_v63 = vpop.f32.mrf.mxu0  ;;  %v4689_v45 = vpop.f32.mrf.mxu1  ;;  %3255 = vmatmul.mubr.bf16.gmra.mxu1 %v6322_v14 }
 0x273   : > { %v6686_v1 = vadd.f32 %v6564_v28, %v4688_v12  ;;  %3262 = vmatprep.mubr.bf16.mxu1 %v6447_v50  ;;  %v6690_v62 = vadd.f32 %v4776_v11, %v6539_v29  ;;  %v1802_v29 = vshrl.u32 %v6568_v0, 16 }
 0x274   : > { %v4778_v27 = vpop.f32.mrf.mxu0  ;;  %v4690_v9 = vpop.f32.mrf.mxu1 }
 0x275   : > { %v4779_v33 = vadd.f32 %v4778_v27, %v4777_v63  ;;  %v4691_v56 = vadd.f32 %v4690_v9, %v4689_v45  ;;  %v1807_v38 = vor.u32 %v1806_v47, %v1802_v29 }
 0x276   : > { %v4780_v41 = vpop.f32.mrf.mxu0  ;;  %v4692_v22 = vpop.f32.mrf.mxu1 }
 0x277   : > { %v6694_v14 = vadd.f32 %v4691_v56, %v6585_v53  ;;  %v6697_v28 = vadd.f32 %v4779_v33, %v6550_v30 }
 0x278   : > { %v4781_v50 = vpop.f32.mrf.mxu0  ;;  %v4693_v25 = vpop.f32.mrf.mxu1 }
 0x279   : > { %v4782_v32 = vadd.f32 %v4781_v50, %v4780_v41  ;;  %v6701_v23 = vadd.f32 %v4693_v25, %v4692_v22 }
 0x27a   : > { %v4783_v17 = vpop.f32.mrf.mxu0  ;;  %v4695_v15 = vpop.f32.mrf.mxu1  ;;  %3263 = vmatmul.mubr.bf16.gmra.mxu1 %v6350_v34 }
 0x27b   : > { %3270 = vmatprep.mubr.bf16.mxu1 %v6456_v20  ;;  %v6706_v53 = vadd.f32 %v4782_v32, %v6559_v44  ;;  %v1812_v20 = vsel %vm1596_vm11, %v1807_v38, %v1811_v7 }
 0x27c   : > { %v4784_v30 = vpop.f32.mrf.mxu0  ;;  %v4696_v21 = vpop.f32.mrf.mxu1 }
 0x27d   : > { %v4785_v11 = vadd.f32 %v4784_v30, %v4783_v17  ;;  %v4697_v12 = vadd.f32 %v4696_v21, %v4695_v15 }
 0x27e   : > { %v4786_v63 = vpop.f32.mrf.mxu0  ;;  %v4698_v37 = vpop.f32.mrf.mxu1 }
 0x27f   : > { %v6709_v45 = vadd.f32 %v6574_v31, %v4697_v12  ;;  %v6712_v27 = vadd.f32 %v4785_v11, %v6566_v46 }
 0x280   : > { %v4787_v34 = vpop.f32.mrf.mxu0  ;;  %v4699_v9 = vpop.f32.mrf.mxu1 }
 0x281   : > { %v4788_v44 = vadd.f32 %v4787_v34, %v4786_v63  ;;  %v4700_v18 = vadd.f32 %v4699_v9, %v4698_v37 }
 0x282   : > { %v4789_v33 = vpop.f32.mrf.mxu0  ;;  %v4701_v56 = vpop.f32.mrf.mxu1  ;;  %3271 = vmatmul.mubr.bf16.gmra.mxu1 %v6348_v6 }
 0x283   : > { %v6717_v41 = vadd.f32 %v6587_v2, %v4700_v18  ;;  %3278 = vmatprep.mubr.bf16.mxu1 %v1812_v20  ;;  %v6720_v31 = vadd.f32 %v4788_v44, %v6580_v4 }
 0x284   : > { %v4790_v22 = vpop.f32.mrf.mxu0  ;;  %v4702_v46 = vpop.f32.mrf.mxu1 }
 0x285   : > { %v4791_v50 = vadd.f32 %v4790_v22, %v4789_v33  ;;  %v4703_v25 = vadd.f32 %v4702_v46, %v4701_v56 }
 0x286   : > { %v4792_v29 = vpop.f32.mrf.mxu0  ;;  %v4704_v47 = vpop.f32.mrf.mxu1 }
 0x287   : > { %v6723_v58 = vadd.f32 %v4703_v25, %v6600_v26  ;;  %v6726_v32 = vadd.f32 %v4791_v50, %v6589_v60 }
 0x288   : > { %v4793_v6 = vpop.f32.mrf.mxu0  ;;  %v4705_v17 = vpop.f32.mrf.mxu1 }
 0x289   : > { %v4794_v2 = vadd.f32 %v4793_v6, %v4792_v29  ;;  %v6728_v15 = vadd.f32 %v4705_v17, %v4704_v47 }
 0x28a   : > { %v4795_v30 = vpop.f32.mrf.mxu0  ;;  %v4707_v4 = vpop.f32.mrf.mxu1  ;;  %3279 = vmatmul.mubr.bf16.gmra.mxu1 %v6568_v0 }
 0x28b   : > { %v6732_v21 = vadd.f32 %v4794_v2, %v6597_v57 }
 0x28c   : > { %v4796_v38 = vpop.f32.mrf.mxu0  ;;  %v4708_v7 = vpop.f32.mrf.mxu1 }
 0x28d   : > { %v4797_v11 = vadd.f32 %v4796_v38, %v4795_v30  ;;  %v6734_v26 = vadd.f32 %v4708_v7, %v4707_v4 }
 0x28e   : > { %v4798_v12 = vpop.f32.mrf.mxu0  ;;  %v4710_v60 = vpop.f32.mrf.mxu1 }
 0x28f   : > { %v2702_v63 = vadd.f32 %v4797_v11, %v6605_v40 }
 0x290   : > { %v4799_v37 = vpop.f32.mrf.mxu0  ;;  %v4711_v34 = vpop.f32.mrf.mxu1 }
 0x291   : > { %v4800_v9 = vadd.f32 %v4799_v37, %v4798_v12  ;;  %v6737_v20 = vadd.f32 %v4711_v34, %v4710_v60 }
 0x292   : > { %v4801_v44 = vpop.f32.mrf.mxu0  ;;  %v5135_v18 = vpop.f32.mrf.mxu1 }
 0x293   : > { %v6740_v0 = vadd.f32 %v5135_v18, %v6643_v13  ;;  %v2705_v57 = vadd.f32 %v4800_v9, %v6614_v19  ;;  %v2408_v13 = vadd.f32 %v6626_v42, %v6552_v43 }
 0x294   : > { %v4802_v33 = vpop.f32.mrf.mxu0  ;;  %v2806_v56 = vpop.f32.mrf.mxu1 }
 0x295   : > { %v4803_v22 = vadd.f32 %v4802_v33, %v4801_v44  ;;  %v6744_v46 = vadd.f32 %v2806_v56, %v6624_v3 }
 0x296   : > { %v4804_v50 = vpop.f32.mrf.mxu0  ;;  %v5136_v40 = vpop.f32.mrf.mxu1 }
 0x297   : > { %v6747_v25 = vadd.f32 %v5136_v40, %v6651_v49  ;;  %v2710_v29 = vadd.f32 %v4803_v22, %v6621_v52 }
 0x298   : > { %v4805_v47 = vpop.f32.mrf.mxu0  ;;  %v2809_v6 = vpop.f32.mrf.mxu1 }
 0x299   : > { %v4806_v17 = vadd.f32 %v4805_v47, %v4804_v50  ;;  %v6753_v19 = vadd.f32 %v2809_v6, %v6634_v54 }
 0x29a   : > { %v4807_v2 = vpop.f32.mrf.mxu0  ;;  %v5139_v30 = vpop.f32.mrf.mxu1 }
 0x29b   : > { %v6756_v3 = vadd.f32 %v5139_v30, %v6679_v16  ;;  %v2713_v4 = vadd.f32 %v4806_v17, %v2408_v13 }
 0x29c   : > { %v4808_v38 = vpop.f32.mrf.mxu0  ;;  %v2822_v49 = vpop.f32.mrf.mxu1 }
 0x29d   : > { %v4809_v7 = vadd.f32 %v4808_v38, %v4807_v2  ;;  %v6759_v52 = vadd.f32 %v2822_v49, %v6660_v61 }
 0x29e   : > { %v4810_v11 = vpop.f32.mrf.mxu0  ;;  %v5140_v12 = vpop.f32.mrf.mxu1 }
 0x29f   : > { %v6762_v43 = vadd.f32 %v5140_v12, %v6690_v62  ;;  %v2718_v42 = vadd.f32 %v4809_v7, %v6640_v39 }
 0x2a0   : > { %v4811_v54 = vpop.f32.mrf.mxu0  ;;  %v2825_v60 = vpop.f32.mrf.mxu1 }
 0x2a1   : > { %v4812_v37 = vadd.f32 %v4811_v54, %v4810_v11  ;;  %v6766_v16 = vadd.f32 %v2825_v60, %v6667_v55 }
 0x2a2   : > { %v4813_v34 = vpop.f32.mrf.mxu0  ;;  %v5143_v9 = vpop.f32.mrf.mxu1 }
 0x2a3   : > { %v6769_v44 = vadd.f32 %v5143_v9, %v6712_v27  ;;  %v2721_v61 = vadd.f32 %v4812_v37, %v6647_v10  ;;  %v2424_v27 = vadd.f32 %v6662_v5, %v6572_v8 }
 0x2a4   : > { %v4814_v18 = vpop.f32.mrf.mxu0  ;;  %v2838_v33 = vpop.f32.mrf.mxu1 }
 0x2a5   : > { %v4815_v56 = vadd.f32 %v4814_v18, %v4813_v34  ;;  %v6773_v62 = vadd.f32 %v2838_v33, %v6697_v28 }
 0x2a6   : > { %v4816_v39 = vpop.f32.mrf.mxu0  ;;  %v5144_v22 = vpop.f32.mrf.mxu1 }
 0x2a7   : > { %v6776_v50 = vadd.f32 %v5144_v22, %v6720_v31  ;;  %v2726_v55 = vadd.f32 %v4815_v56, %v6657_v59 }
 0x2a8   : > { %v4817_v40 = vpop.f32.mrf.mxu0  ;;  %v2841_v47 = vpop.f32.mrf.mxu1 }
 0x2a9   : > { %v4818_v6 = vadd.f32 %v4817_v40, %v4816_v39  ;;  %v6782_v10 = vadd.f32 %v2841_v47, %v6706_v53  ;;  %v2440_v40 = vadd.f32 %v6701_v23, %v6592_v35 }
 0x2aa   : > { %v4819_v13 = vpop.f32.mrf.mxu0  ;;  %v5147_v17 = vpop.f32.mrf.mxu1 }
 0x2ab   : > { %v6784_v28 = vadd.f32 %v5147_v17, %v2702_v63  ;;  %v2729_v2 = vadd.f32 %v4818_v6, %v2424_v27 }
 0x2ac   : > { %v4820_v30 = vpop.f32.mrf.mxu0  ;;  %v2854_v38 = vpop.f32.mrf.mxu1 }
 0x2ad   : > { %v4821_v31 = vadd.f32 %v4820_v30, %v4819_v13  ;;  %v6787_v49 = vadd.f32 %v2854_v38, %v6726_v32 }
 0x2ae   : > { %v4822_v59 = vpop.f32.mrf.mxu0  ;;  %v5148_v7 = vpop.f32.mrf.mxu1 }
 0x2af   : > { %v6789_v11 = vadd.f32 %v5148_v7, %v2705_v57  ;;  %v2734_v8 = vadd.f32 %v4821_v31, %v6676_v24 }
 0x2b0   : > { %v4823_v5 = vpop.f32.mrf.mxu0  ;;  %v2857_v53 = vpop.f32.mrf.mxu1 }
 0x2b1   : > { %v4824_v12 = vadd.f32 %v4823_v5, %v4822_v59  ;;  %v6793_v54 = vadd.f32 %v2857_v53, %v6732_v21 }
 0x2b2   : > { %v4825_v63 = vpop.f32.mrf.mxu0  ;;  %v5151_v60 = vpop.f32.mrf.mxu1 }
 0x2b3   : > { %v6795_v37 = vadd.f32 %v5151_v60, %v2718_v42  ;;  %v2737_v34 = vadd.f32 %v4824_v12, %v6686_v1 }
 0x2b4   : > { %v4826_v32 = vpop.f32.mrf.mxu0  ;;  %v2870_v9 = vpop.f32.mrf.mxu1 }
 0x2b5   : > { %v4827_v18 = vadd.f32 %v4826_v32, %v4825_v63  ;;  %v6798_v33 = vadd.f32 %v2870_v9, %v2710_v29 }
 0x2b6   : > { %v4828_v57 = vpop.f32.mrf.mxu0  ;;  %v5152_v56 = vpop.f32.mrf.mxu1 }
 0x2b7   : > { %v6800_v24 = vadd.f32 %v5152_v56, %v2721_v61  ;;  %v2742_v39 = vadd.f32 %v4827_v18, %v6694_v14  ;;  %v2456_v56 = vadd.f32 %v6728_v15, %v6607_v48  ;;  %v2464_v48 = vadd.f32 %v6602_v36, %v6737_v20 }
 0x2b8   : > { %v4829_v22 = vpop.f32.mrf.mxu0  ;;  %v2873_v21 = vpop.f32.mrf.mxu1 }
 0x2b9   : > { %v4830_v42 = vadd.f32 %v4829_v22, %v4828_v57  ;;  %v6805_v47 = vadd.f32 %v2873_v21, %v2713_v4 }
 0x2ba   : > { %v4831_v1 = vpop.f32.mrf.mxu0  ;;  %v5155_v27 = vpop.f32.mrf.mxu1 }
 0x2bb   : > { %v6807_v6 = vadd.f32 %v5155_v27, %v2734_v8  ;;  %v2745_v29 = vadd.f32 %v4830_v42, %v2440_v40  ;;  %v2461_v27 = vadd.f32 %v6594_v51, %v6734_v26 }
 0x2bc   : > { %v4832_v13 = vpop.f32.mrf.mxu0  ;;  %v2886_v17 = vpop.f32.mrf.mxu1 }
 0x2bd   : > { %v4833_v30 = vadd.f32 %v4832_v13, %v4831_v1  ;;  %v6809_v61 = vadd.f32 %v2886_v17, %v2726_v55 }
 0x2be   : > { %v4834_v38 = vpop.f32.mrf.mxu0  ;;  %v5156_v14 = vpop.f32.mrf.mxu1 }
 0x2bf   : > { %v6811_v31 = vadd.f32 %v5156_v14, %v2737_v34  ;;  %v2750_v59 = vadd.f32 %v4833_v30, %v6709_v45 }
 0x2c0   : > { %v4835_v35 = vpop.f32.mrf.mxu0  ;;  %v2889_v23 = vpop.f32.mrf.mxu1 }
 0x2c1   : > { %v4836_v4 = vadd.f32 %v4835_v35, %v4834_v38  ;;  %v6814_v7 = vadd.f32 %v2889_v23, %v2729_v2 }
 0x2c2   : > { %v4837_v5 = vpop.f32.mrf.mxu0  ;;  %v5159_v8 = vpop.f32.mrf.mxu1 }
 0x2c3   : > { %v6816_v53 = vadd.f32 %v5159_v8, %v2750_v59  ;;  %v2753_v12 = vadd.f32 %v4836_v4, %v6717_v41 }
 0x2c4   : > { %v4838_v63 = vpop.f32.mrf.mxu0  ;;  %v2902_v55 = vpop.f32.mrf.mxu1 }
 0x2c5   : > { %v4839_v60 = vadd.f32 %v4838_v63, %v4837_v5  ;;  %v6819_v32 = vadd.f32 %v2902_v55, %v2742_v39 }
 0x2c6   : > { %v4840_v34 = vpop.f32.mrf.mxu0  ;;  %v5160_v9 = vpop.f32.mrf.mxu1 }
 0x2c7   : > { %v6821_v18 = vadd.f32 %v5160_v9, %v2753_v12  ;;  %v2758_v45 = vadd.f32 %v4839_v60, %v6723_v58 }
 0x2c8   : > { %v4841_v57 = vpop.f32.mrf.mxu0  ;;  %v2905_v2 = vpop.f32.mrf.mxu1 }
 0x2c9   : > { %v4842_v22 = vadd.f32 %v4841_v57, %v4840_v34  ;;  %v6826_v21 = vadd.f32 %v2905_v2, %v2745_v29  ;;  %v6844_v57 = vld [vmem:[%s7089_s4] ss:$0 sm:$0xff] }
 0x2ca   : > { %v4843_v41 = vpop.f32.mrf.mxu0  ;;  %v5163_v40 = vpop.f32.mrf.mxu1 }
 0x2cb   : > { %v2761_v42 = vadd.f32 %v4842_v22, %v2456_v56 }
 0x2cc   : > { %v4844_v1 = vpop.f32.mrf.mxu0  ;;  %v2918_v39 = vpop.f32.mrf.mxu1 }
 0x2cd   : > { %v4845_v13 = vadd.f32 %v4844_v1, %v4843_v41  ;;  %v6830_v17 = vadd.f32 %v2918_v39, %v2758_v45 }
 0x2ce   : > { %v4846_v58 = vpop.f32.mrf.mxu0  ;;  %v5164_v30 = vpop.f32.mrf.mxu1 }
 0x2cf   : > { %v2766_v38 = vadd.f32 %v4845_v13, %v2461_v27 }
 0x2d0   : > { %v4847_v14 = vpop.f32.mrf.mxu0  ;;  %v2921_v59 = vpop.f32.mrf.mxu1 }
 0x2d1   : > { %v6834_v15 = vadd.f32 %v5163_v40, %v2766_v38  ;;  %v4848_v29 = vadd.f32 %v4847_v14, %v4846_v58  ;;  %v6836_v35 = vadd.f32 %v2921_v59, %v2761_v42 }
 0x2d2   : > { %v5183_v23 = vpop.f32.mrf.mxu0  ;;  %v4889_v4 = vpop.f32.mrf.mxu1 }
 0x2d3   : > { %v2769_v5 = vadd.f32 %v4848_v29, %v2464_v48 }
 0x2d4   : > { %v3321_v51 = vpop.f32.mrf.mxu0  ;;  %v4890_v26 = vpop.f32.mrf.mxu1 }
 0x2d5   : > { %v6838_v8 = vadd.f32 %v5164_v30, %v2769_v5  ;;  %v4891_v12 = vadd.f32 %v4890_v26, %v4889_v4 }
 0x2d6   : > { %v5184_v63 = vpop.f32.mrf.mxu0  ;;  %v4892_v55 = vpop.f32.mrf.mxu1 }
 0x2d7   : > { %v3322_v60 = vadd.f32 %v4891_v12, %v3321_v51 }
 0x2d8   : > { %v4893_v34 = vpop.f32.mrf.mxu1  ;;  %v3324_v20 = vpop.f32.mrf.mxu0 }
 0x2d9   : > { %v3448_v9 = vadd.f32 %v3322_v60, %v6744_v46  ;;  %v4894_v36 = vadd.f32 %v4893_v34, %v4892_v55 }
 0x2da   : > { %v4895_v45 = vpop.f32.mrf.mxu1  ;;  %v5187_v42 = vpop.f32.mrf.mxu0 }
 0x2db   : > { %v3325_v2 = vadd.f32 %v4894_v36, %v3324_v20  ;;  %v3487_v40 = vadd.f32 %v6844_v57, %v3448_v9 }
 0x2dc   : > { %v4896_v56 = vpop.f32.mrf.mxu1  ;;  %v3337_v14 = vpop.f32.mrf.mxu0 }
 0x2dd   : > { %v3449_v22 = vadd.f32 %v3325_v2, %v6753_v19  ;;  %v4897_v41 = vadd.f32 %v4896_v56, %v4895_v45  ;;  %v3519_v30 = vmax.f32 %v3487_v40, 0.0 }
 0x2de   : > { %v4898_v1 = vpop.f32.mrf.mxu1 }
 0x2df   : > { %v3330_v39 = vadd.f32 %v5183_v23, %v4897_v41  ;;  %v3488_v46 = vadd.f32 %v6844_v57, %v3449_v22  ;;  %v5188_v23 = vpop.f32.mrf.mxu0 }
 0x2e0   : > { %v4899_v27 = vpop.f32.mrf.mxu1 }
 0x2e1   : > { %v3450_v13 = vadd.f32 %v3330_v39, %v6740_v0  ;;  %v4900_v58 = vadd.f32 %v4899_v27, %v4898_v1  ;;  %v3520_v38 = vmax.f32 %v3488_v46, 0.0 }
 0x2e2   : > { %v4901_v59 = vpop.f32.mrf.mxu1 }
 0x2e3   : > { %v3333_v48 = vadd.f32 %v5184_v63, %v4900_v58  ;;  %v3551_v29 = vpack.c.bf16 %v3520_v38, %v3519_v30  ;;  %v3489_v19 = vadd.f32 %v6844_v57, %v3450_v13  ;;  %v3340_v63 = vpop.f32.mrf.mxu0 }
 0x2e4   : > { %v4902_v4 = vpop.f32.mrf.mxu1 }
 0x2e5   : > { %v3451_v5 = vadd.f32 %v3333_v48, %v6747_v25  ;;  %v4903_v51 = vadd.f32 %v4902_v4, %v4901_v59  ;;  %5229 = vmatprep.mubr.bf16.mxu0 %v3551_v29  ;;  %v3521_v60 = vmax.f32 %v3489_v19, 0.0  ;;  %v5191_v40 = vpop.f32.mrf.mxu0 }
 0x2e6   : > { %v4904_v26 = vpop.f32.mrf.mxu1 }
 0x2e7   : > { %v3490_v12 = vadd.f32 %v6844_v57, %v3451_v5  ;;  %v3338_v55 = vadd.f32 %v4903_v51, %v3337_v14  ;;  %v3353_v38 = vpop.f32.mrf.mxu0 }
 0x2e8   : > { %v4905_v0 = vpop.f32.mrf.mxu1 }
 0x2e9   : > { %v3522_v34 = vmax.f32 %v3490_v12, 0.0  ;;  %v3452_v9 = vadd.f32 %v3338_v55, %v6759_v52  ;;  %v4906_v36 = vadd.f32 %v4905_v0, %v4904_v26 }
 0x2ea   : > { %v4907_v20 = vpop.f32.mrf.mxu1 }
 0x2eb   : > { %v3552_v45 = vpack.c.bf16 %v3522_v34, %v3521_v60  ;;  %v3341_v2 = vadd.f32 %v4906_v36, %v3340_v63  ;;  %v3491_v41 = vadd.f32 %v6844_v57, %v3452_v9 }
 0x2ec   : > { %v4908_v56 = vpop.f32.mrf.mxu1 }
 0x2ed   : > { %v3453_v25 = vadd.f32 %v3341_v2, %v6766_v16  ;;  %v4909_v22 = vadd.f32 %v4908_v56, %v4907_v20  ;;  %5230 = vmatmul.mubr.bf16.vlgmr.msra.gmra.mxu0 %v3552_v45  ;;  %v3523_v58 = vmax.f32 %v3491_v41, 0.0 }
 0x2ee   : > { %v4910_v1 = vpop.f32.mrf.mxu1 }
 0x2ef   : > { %v3346_v39 = vadd.f32 %v5187_v42, %v4909_v22  ;;  %v3492_v46 = vadd.f32 %v6844_v57, %v3453_v25  ;;  %v5192_v42 = vpop.f32.mrf.mxu0 }
 0x2f0   : > { %v4911_v27 = vpop.f32.mrf.mxu1 }
 0x2f1   : > { %v3454_v52 = vadd.f32 %v3346_v39, %v6756_v3  ;;  %v4912_v13 = vadd.f32 %v4911_v27, %v4910_v1  ;;  %v3524_v30 = vmax.f32 %v3492_v46, 0.0 }
 0x2f2   : > { %v4913_v14 = vpop.f32.mrf.mxu1 }
 0x2f3   : > { %v3349_v59 = vadd.f32 %v5188_v23, %v4912_v13  ;;  %v3553_v48 = vpack.c.bf16 %v3524_v30, %v3523_v58  ;;  %v3493_v29 = vadd.f32 %v6844_v57, %v3454_v52  ;;  %v3356_v23 = vpop.f32.mrf.mxu0 }
 0x2f4   : > { %v4914_v16 = vpop.f32.mrf.mxu1 }
 0x2f5   : > { %v3455_v4 = vadd.f32 %v3349_v59, %v6762_v43  ;;  %v4915_v19 = vadd.f32 %v4914_v16, %v4913_v14  ;;  %5233 = vmatprep.mubr.bf16.mxu0 %v3553_v48  ;;  %v3525_v12 = vmax.f32 %v3493_v29, 0.0  ;;  %v5195_v2 = vpop.f32.mrf.mxu0 }
 0x2f6   : > { %v4916_v5 = vpop.f32.mrf.mxu1 }
 0x2f7   : > { %v3494_v51 = vadd.f32 %v6844_v57, %v3455_v4  ;;  %v3354_v26 = vadd.f32 %v4915_v19, %v3353_v38  ;;  %v3369_v27 = vpop.f32.mrf.mxu0 }
 0x2f8   : > { %v4917_v3 = vpop.f32.mrf.mxu1 }
 0x2f9   : > { %v3526_v55 = vmax.f32 %v3494_v51, 0.0  ;;  %v3456_v0 = vadd.f32 %v3354_v26, %v6773_v62  ;;  %v4918_v60 = vadd.f32 %v4917_v3, %v4916_v5 }
 0x2fa   : > { %v4919_v34 = vpop.f32.mrf.mxu1 }
 0x2fb   : > { %v3357_v9 = vadd.f32 %v4918_v60, %v3356_v23  ;;  %v3554_v36 = vpack.c.bf16 %v3526_v55, %v3525_v12  ;;  %v3495_v45 = vadd.f32 %v6844_v57, %v3456_v0 }
 0x2fc   : > { %v4920_v63 = vpop.f32.mrf.mxu1 }
 0x2fd   : > { %v3457_v43 = vadd.f32 %v3357_v9, %v6782_v10  ;;  %v4921_v20 = vadd.f32 %v4920_v63, %v4919_v34  ;;  %5234 = vmatmul.mubr.bf16.gmra.mxu0 %v3554_v36  ;;  %v3527_v39 = vmax.f32 %v3495_v45, 0.0 }
 0x2fe   : > { %v4922_v56 = vpop.f32.mrf.mxu1 }
 0x2ff   : > { %v3362_v25 = vadd.f32 %v5191_v40, %v4921_v20  ;;  %v3496_v22 = vadd.f32 %v6844_v57, %v3457_v43  ;;  %v5196_v40 = vpop.f32.mrf.mxu0 }
 0x300   : > { %v4923_v41 = vpop.f32.mrf.mxu1 }
 0x301   : > { %v3458_v62 = vadd.f32 %v3362_v25, %v6769_v44  ;;  %v4924_v1 = vadd.f32 %v4923_v41, %v4922_v56  ;;  %v3528_v46 = vmax.f32 %v3496_v22, 0.0 }
 0x302   : > { %v4925_v52 = vpop.f32.mrf.mxu1 }
 0x303   : > { %v3365_v13 = vadd.f32 %v5192_v42, %v4924_v1  ;;  %v3555_v58 = vpack.c.bf16 %v3528_v46, %v3527_v39  ;;  %v3497_v30 = vadd.f32 %v6844_v57, %v3458_v62  ;;  %v3372_v42 = vpop.f32.mrf.mxu0 }
 0x304   : > { %v4926_v10 = vpop.f32.mrf.mxu1 }
 0x305   : > { %v3459_v38 = vadd.f32 %v3365_v13, %v6776_v50  ;;  %v4927_v14 = vadd.f32 %v4926_v10, %v4925_v52  ;;  %5237 = vmatprep.mubr.bf16.mxu0 %v3555_v58  ;;  %v3529_v29 = vmax.f32 %v3497_v30, 0.0  ;;  %v5199_v60 = vpop.f32.mrf.mxu0 }
 0x306   : > { %v4928_v59 = vpop.f32.mrf.mxu1 }
 0x307   : > { %v3498_v48 = vadd.f32 %v6844_v57, %v3459_v38  ;;  %v3370_v16 = vadd.f32 %v4927_v14, %v3369_v27  ;;  %v3385_v45 = vpop.f32.mrf.mxu0 }
 0x308   : > { %v4929_v44 = vpop.f32.mrf.mxu1 }
 0x309   : > { %v3530_v4 = vmax.f32 %v3498_v48, 0.0  ;;  %v3460_v19 = vadd.f32 %v3370_v16, %v6787_v49  ;;  %v4930_v5 = vadd.f32 %v4929_v44, %v4928_v59 }
 0x30a   : > { %v4931_v51 = vpop.f32.mrf.mxu1 }
 0x30b   : > { %v3373_v26 = vadd.f32 %v4930_v5, %v3372_v42  ;;  %v3556_v3 = vpack.c.bf16 %v3530_v4, %v3529_v29  ;;  %v3499_v0 = vadd.f32 %v6844_v57, %v3460_v19 }
 0x30c   : > { %v4932_v12 = vpop.f32.mrf.mxu1 }
 0x30d   : > { %v3461_v50 = vadd.f32 %v3373_v26, %v6793_v54  ;;  %v4933_v55 = vadd.f32 %v4932_v12, %v4931_v51  ;;  %5238 = vmatmul.mubr.bf16.gmra.mxu0 %v3556_v3  ;;  %v3531_v43 = vmax.f32 %v3499_v0, 0.0 }
 0x30e   : > { %v4934_v23 = vpop.f32.mrf.mxu1 }
 0x30f   : > { %v3378_v34 = vadd.f32 %v5195_v2, %v4933_v55  ;;  %v3500_v9 = vadd.f32 %v6844_v57, %v3461_v50  ;;  %v5200_v2 = vpop.f32.mrf.mxu0 }
 0x310   : > { %v4935_v36 = vpop.f32.mrf.mxu1 }
 0x311   : > { %v3462_v49 = vadd.f32 %v3378_v34, %v6784_v28  ;;  %v4936_v63 = vadd.f32 %v4935_v36, %v4934_v23  ;;  %v3532_v20 = vmax.f32 %v3500_v9, 0.0  ;;  %v3388_v30 = vpop.f32.mrf.mxu0 }
 0x312   : > { %v4937_v56 = vpop.f32.mrf.mxu1 }
 0x313   : > { %v3381_v25 = vadd.f32 %v5196_v40, %v4936_v63  ;;  %v3557_v22 = vpack.c.bf16 %v3532_v20, %v3531_v43  ;;  %v3501_v41 = vadd.f32 %v6844_v57, %v3462_v49  ;;  %v5203_v44 = vpop.f32.mrf.mxu0 }
 0x314   : > { %v4938_v54 = vpop.f32.mrf.mxu1 }
 0x315   : > { %v3463_v62 = vadd.f32 %v3381_v25, %v6789_v11  ;;  %v4939_v1 = vadd.f32 %v4938_v54, %v4937_v56  ;;  %5241 = vmatprep.mubr.bf16.mxu0 %v3557_v22  ;;  %v3533_v52 = vmax.f32 %v3501_v41, 0.0  ;;  %v3401_v3 = vpop.f32.mrf.mxu0 }
 0x316   : > { %v4940_v39 = vpop.f32.mrf.mxu1 }
 0x317   : > { %v3502_v46 = vadd.f32 %v6844_v57, %v3463_v62  ;;  %v3386_v27 = vadd.f32 %v4939_v1, %v3385_v45 }
 0x318   : > { %v4941_v28 = vpop.f32.mrf.mxu1 }
 0x319   : > { %v3534_v13 = vmax.f32 %v3502_v46, 0.0  ;;  %v3464_v58 = vadd.f32 %v3386_v27, %v6798_v33  ;;  %v4942_v10 = vadd.f32 %v4941_v28, %v4940_v39 }
 0x31a   : > { %v4943_v38 = vpop.f32.mrf.mxu1 }
 0x31b   : > { %v3389_v14 = vadd.f32 %v4942_v10, %v3388_v30  ;;  %v3558_v40 = vpack.c.bf16 %v3534_v13, %v3533_v52  ;;  %v3503_v16 = vadd.f32 %v6844_v57, %v3464_v58 }
 0x31c   : > { %v4944_v59 = vpop.f32.mrf.mxu1 }
 0x31d   : > { %v3465_v11 = vadd.f32 %v3389_v14, %v6805_v47  ;;  %v4945_v48 = vadd.f32 %v4944_v59, %v4943_v38  ;;  %5242 = vmatmul.mubr.bf16.gmra.mxu0 %v3558_v40  ;;  %v3535_v51 = vmax.f32 %v3503_v16, 0.0 }
 0x31e   : > { %v4946_v29 = vpop.f32.mrf.mxu1 }
 0x31f   : > { %v3394_v4 = vadd.f32 %v5199_v60, %v4945_v48  ;;  %v3504_v19 = vadd.f32 %v6844_v57, %v3465_v11  ;;  %v5204_v60 = vpop.f32.mrf.mxu0 }
 0x320   : > { %v4947_v5 = vpop.f32.mrf.mxu1 }
 0x321   : > { %v3466_v33 = vadd.f32 %v3394_v4, %v6795_v37  ;;  %v4948_v42 = vadd.f32 %v4947_v5, %v4946_v29  ;;  %v3536_v26 = vmax.f32 %v3504_v19, 0.0  ;;  %v3404_v56 = vpop.f32.mrf.mxu0 }
 0x322   : > { %v4949_v12 = vpop.f32.mrf.mxu1 }
 0x323   : > { %v3397_v50 = vadd.f32 %v5200_v2, %v4948_v42  ;;  %v3559_v55 = vpack.c.bf16 %v3536_v26, %v3535_v51  ;;  %v3505_v0 = vadd.f32 %v6844_v57, %v3466_v33  ;;  %v5207_v2 = vpop.f32.mrf.mxu0 }
 0x324   : > { %v4950_v47 = vpop.f32.mrf.mxu1 }
 0x325   : > { %v3467_v23 = vadd.f32 %v3397_v50, %v6800_v24  ;;  %v4951_v34 = vadd.f32 %v4950_v47, %v4949_v12  ;;  %5245 = vmatprep.mubr.bf16.mxu0 %v3559_v55  ;;  %v3537_v63 = vmax.f32 %v3505_v0, 0.0  ;;  %v3417_v10 = vpop.f32.mrf.mxu0 }
 0x326   : > { %v4952_v9 = vpop.f32.mrf.mxu1 }
 0x327   : > { %v3506_v36 = vadd.f32 %v6844_v57, %v3467_v23  ;;  %v3402_v49 = vadd.f32 %v4951_v34, %v3401_v3  ;;  %v5208_v48 = vpop.f32.mrf.mxu0 }
 0x328   : > { %v4953_v37 = vpop.f32.mrf.mxu1 }
 0x329   : > { %v3538_v43 = vmax.f32 %v3506_v36, 0.0  ;;  %v3468_v20 = vadd.f32 %v3402_v49, %v6809_v61  ;;  %v4954_v45 = vadd.f32 %v4953_v37, %v4952_v9  ;;  %v3420_v42 = vpop.f32.mrf.mxu0 }
 0x32a   : > { %v4955_v25 = vpop.f32.mrf.mxu1 }
 0x32b   : > { %v3405_v22 = vadd.f32 %v4954_v45, %v3404_v56  ;;  %v3560_v54 = vpack.c.bf16 %v3538_v43, %v3537_v63  ;;  %v3507_v1 = vadd.f32 %v6844_v57, %v3468_v20  ;;  %v5211_v50 = vpop.f32.mrf.mxu0 }
 0x32c   : > { %v4956_v41 = vpop.f32.mrf.mxu1 }
 0x32d   : > { %v3469_v24 = vadd.f32 %v3405_v22, %v6814_v7  ;;  %v4957_v62 = vadd.f32 %v4956_v41, %v4955_v25  ;;  %5246 = vmatmul.mubr.bf16.gmra.mxu0 %v3560_v54  ;;  %v3539_v13 = vmax.f32 %v3507_v1, 0.0  ;;  %v3433_v9 = vpop.f32.mrf.mxu0 }
 0x32e   : > { %v4958_v39 = vpop.f32.mrf.mxu1 }
 0x32f   : > { %v3410_v46 = vadd.f32 %v5203_v44, %v4957_v62  ;;  %v3508_v27 = vadd.f32 %v6844_v57, %v3469_v24 }
 0x330   : > { %v4959_v28 = vpop.f32.mrf.mxu1 }
 0x331   : > { %v3470_v61 = vadd.f32 %v3410_v46, %v6807_v6  ;;  %v4960_v52 = vadd.f32 %v4959_v28, %v4958_v39  ;;  %v3540_v58 = vmax.f32 %v3508_v27, 0.0 }
 0x332   : > { %v4961_v30 = vpop.f32.mrf.mxu1 }
 0x333   : > { %v3413_v38 = vadd.f32 %v5204_v60, %v4960_v52  ;;  %v3561_v14 = vpack.c.bf16 %v3540_v58, %v3539_v13  ;;  %v3509_v40 = vadd.f32 %v6844_v57, %v3470_v61 }
 0x334   : > { %v4962_v7 = vpop.f32.mrf.mxu1 }
 0x335   : > { %v3471_v59 = vadd.f32 %v3413_v38, %v6811_v31  ;;  %v4963_v11 = vadd.f32 %v4962_v7, %v4961_v30  ;;  %5249 = vmatprep.mubr.bf16.mxu0 %v3561_v14  ;;  %v3541_v4 = vmax.f32 %v3509_v40, 0.0 }
 0x336   : > { %v4964_v16 = vpop.f32.mrf.mxu1 }
 0x337   : > { %v3510_v44 = vadd.f32 %v6844_v57, %v3471_v59  ;;  %v3418_v29 = vadd.f32 %v4963_v11, %v3417_v10 }
 0x338   : > { %v4965_v6 = vpop.f32.mrf.mxu1 }
 0x339   : > { %v3542_v19 = vmax.f32 %v3510_v44, 0.0  ;;  %v3472_v5 = vadd.f32 %v3418_v29, %v6819_v32  ;;  %v4966_v33 = vadd.f32 %v4965_v6, %v4964_v16 }
 0x33a   : > { %v4967_v51 = vpop.f32.mrf.mxu1 }
 0x33b   : > { %v3421_v26 = vadd.f32 %v4966_v33, %v3420_v42  ;;  %v3562_v3 = vpack.c.bf16 %v3542_v19, %v3541_v4  ;;  %v3511_v47 = vadd.f32 %v6844_v57, %v3472_v5  ;;  %v4568_v19 = vld [vmem:[%s5799_s21 + $0x8] sm:$0xff]   ;;  %v6913_v5 = vld [vmem:[%s7091_s6] ss:$0 sm:$0xff] }
 0x33c   : > { %v4968_v12 = vpop.f32.mrf.mxu1  ;;  %v4510_v33 = vunpack.c.l.bf16 %v4568_v19 }
 0x33d   : > { %v3473_v31 = vadd.f32 %v3421_v26, %v6826_v21  ;;  %v4969_v55 = vadd.f32 %v4968_v12, %v4967_v51  ;;  %5250 = vmatmul.mubr.bf16.gmra.mxu0 %v3562_v3  ;;  %v3543_v49 = vmax.f32 %v3511_v47, 0.0  ;;  %v5212_v21 = vpop.f32.mrf.mxu0  ;;  %v4511_v12 = vunpack.c.h.bf16 %v4568_v19 }
 0x33e   : > { %v4970_v0 = vpop.f32.mrf.mxu1 }
 0x33f   : > { %v3426_v23 = vadd.f32 %v5207_v2, %v4969_v55  ;;  %v3512_v34 = vadd.f32 %v6844_v57, %v3473_v31 }
 0x340   : > { %v4971_v60 = vpop.f32.mrf.mxu1 }
 0x341   : > { %v3474_v32 = vadd.f32 %v3426_v23, %v6816_v53  ;;  %v4972_v36 = vadd.f32 %v4971_v60, %v4970_v0  ;;  %v3544_v37 = vmax.f32 %v3512_v34, 0.0  ;;  %v3436_v53 = vpop.f32.mrf.mxu0 }
 0x342   : > { %v4973_v63 = vpop.f32.mrf.mxu1 }
 0x343   : > { %v3429_v43 = vadd.f32 %v5208_v48, %v4972_v36  ;;  %v3563_v20 = vpack.c.bf16 %v3544_v37, %v3543_v49  ;;  %v3513_v56 = vadd.f32 %v6844_v57, %v3474_v32 }
 0x344   : > { %v4974_v45 = vpop.f32.mrf.mxu1 }
 0x345   : > { %v3475_v25 = vadd.f32 %v3429_v43, %v6821_v18  ;;  %v4975_v22 = vadd.f32 %v4974_v45, %v4973_v63  ;;  %5253 = vmatprep.mubr.bf16.mxu0 %v3563_v20  ;;  %v3545_v1 = vmax.f32 %v3513_v56, 0.0  ;;  %v4570_v20 = vld [vmem:[%s5799_s21 + $0x18] sm:$0xff]  }
 0x346   : > { %v4976_v54 = vpop.f32.mrf.mxu1  ;;  %v4518_v56 = vunpack.c.l.bf16 %v4570_v20 }
 0x347   : > { %v3514_v41 = vadd.f32 %v6844_v57, %v3475_v25  ;;  %v3434_v24 = vadd.f32 %v4975_v22, %v3433_v9 }
 0x348   : > { %v4977_v62 = vpop.f32.mrf.mxu1 }
 0x349   : > { %v3546_v2 = vmax.f32 %v3514_v41, 0.0  ;;  %v3476_v39 = vadd.f32 %v3434_v24, %v6830_v17  ;;  %v4978_v46 = vadd.f32 %v4977_v62, %v4976_v54 }
 0x34a   : > { %v4979_v27 = vpop.f32.mrf.mxu1 }
 0x34b   : > { %v3437_v28 = vadd.f32 %v4978_v46, %v3436_v53  ;;  %v3564_v61 = vpack.c.bf16 %v3546_v2, %v3545_v1  ;;  %v3515_v13 = vadd.f32 %v6844_v57, %v3476_v39  ;;  %v4519_v53 = vunpack.c.h.bf16 %v4570_v20 }
 0x34c   : > { %v4980_v52 = vpop.f32.mrf.mxu1 }
 0x34d   : > { %v3477_v18 = vadd.f32 %v3437_v28, %v6836_v35  ;;  %v4981_v58 = vadd.f32 %v4980_v52, %v4979_v27  ;;  %5254 = vmatmul.mubr.bf16.gmra.mxu0 %v3564_v61  ;;  %v3547_v7 = vmax.f32 %v3515_v13, 0.0 }
 0x34e   : > { %v4982_v10 = vpop.f32.mrf.mxu1 }
 0x34f   : > { %v3516_v30 = vadd.f32 %v6844_v57, %v3477_v18  ;;  %v3442_v38 = vadd.f32 %v5211_v50, %v4981_v58 }
 0x350   : > { %v4983_v14 = vpop.f32.mrf.mxu1 }
 0x351   : > { %v3548_v17 = vmax.f32 %v3516_v30, 0.0  ;;  %v3478_v40 = vadd.f32 %v3442_v38, %v6834_v15  ;;  %v4984_v59 = vadd.f32 %v4983_v14, %v4982_v10  ;;  %v4505_v15 = vld [vmem:[%s5799_s21] sm:$0xff]  }
 0x352   : > { %v4506_v26 = vunpack.c.l.bf16 %v4505_v15  ;;  %v4507_v0 = vunpack.c.h.bf16 %v4505_v15 }
 0x353   : > { %v3445_v11 = vadd.f32 %v5212_v21, %v4984_v59  ;;  %v3565_v48 = vpack.c.bf16 %v3548_v17, %v3547_v7  ;;  %v3517_v16 = vadd.f32 %v6844_v57, %v3478_v40  ;;  %v4569_v21 = vld [vmem:[%s5799_s21 + $0x10] sm:$0xff]   ;;  %v4572_v7 = vld [vmem:[%s5799_s21 + $0x28] sm:$0xff]   ;;  %v4571_v40 = vld [vmem:[%s5799_s21 + $0x20] sm:$0xff]  }
 0x354   : > { %v4514_v54 = vunpack.c.l.bf16 %v4569_v21  ;;  %v4515_v27 = vunpack.c.h.bf16 %v4569_v21  ;;  %v4526_v59 = vunpack.c.l.bf16 %v4572_v7 }
 0x355   : > { %v3479_v35 = vadd.f32 %v3445_v11, %v6838_v8  ;;  %5257 = vmatprep.mubr.bf16.mxu0 %v3565_v48  ;;  %v3549_v29 = vmax.f32 %v3517_v16, 0.0  ;;  %v4522_v16 = vunpack.c.l.bf16 %v4571_v40 }
 0x357   : > { %v3518_v44 = vadd.f32 %v6844_v57, %v3479_v35 }
 0x359   : > { %v3550_v6 = vmax.f32 %v3518_v44, 0.0 }
 0x35b   : > { %v3566_v4 = vpack.c.bf16 %v3550_v6, %v3549_v29  ;;  %v4527_v6 = vunpack.c.h.bf16 %v4572_v7 }
 0x35d   : > { %5258 = vmatmul.mubr.bf16.gmra.mxu0 %v3566_v4 }
 0x3ad   : > { %v5231_v42 = vpop.f32.mrf.mxu0 }
 0x3ae   : > { %v3716_v51 = vadd.f32 %v5231_v42, %v6913_v5  ;;  %v4523_v42 = vunpack.c.h.bf16 %v4571_v40 }
 0x3af   : > { %v3707_v8 = vpop.f32.mrf.mxu0 }
 0x3b0   : > { %v3868_v3 = vadd.f32 %v4510_v33, %v3716_v51  ;;  %v3708_v57 = vadd.f32 %v6913_v5, %v3707_v8 }
 0x3b1   : > { %v5232_v50 = vpop.f32.mrf.mxu0 }
 0x3b2   : > { %v3900_v31 = vmax.f32 %v3868_v3, 0.0  ;;  %v3866_v55 = vadd.f32 %v4506_v26, %v3708_v57  ;;  %v3719_v47 = vadd.f32 %v5232_v50, %v6913_v5 }
 0x3b3   : > { %v3710_v23 = vpop.f32.mrf.mxu0 }
 0x3b4   : > { %v4473_v34 = vpack.c.bf16 %v3900_v31, %v3900_v31  ;;  %v3898_v60 = vmax.f32 %v3866_v55, 0.0  ;;  %v3869_v9 = vadd.f32 %v4511_v12, %v3719_v47  ;;  %v3711_v32 = vadd.f32 %v6913_v5, %v3710_v23 }
 0x3b6   : > { %4061 = vst.msk [vmem:[%s6922_s9 + $0x8] sm:$0xf] %vm4058_vm12, %v4473_v34  ;;  %v4471_v36 = vpack.c.bf16 %v3898_v60, %v3898_v60  ;;  %v3901_v49 = vmax.f32 %v3869_v9, 0.0  ;;  %v3867_v37 = vadd.f32 %v4507_v0, %v3711_v32  ;;  %v4574_v0 = vld [vmem:[%s5799_s21 + $0x38] sm:$0xff]   ;;  %v4573_v34 = vld [vmem:[%s5799_s21 + $0x30] sm:$0xff]  }
 0x3b7   : > { %v4534_v60 = vunpack.c.l.bf16 %v4574_v0 }
 0x3b8   : > { %4059 = vst.msk [vmem:[%s6922_s9] sm:$0xf] %vm4058_vm12, %v4471_v36  ;;  %v4474_v63 = vpack.c.bf16 %v3901_v49, %v3901_v49  ;;  %v3899_v43 = vmax.f32 %v3867_v37, 0.0  ;;  %v4530_v36 = vunpack.c.l.bf16 %v4573_v34 }
 0x3ba   : > { %4062 = vst.msk [vmem:[%s6922_s9 + $0xc] sm:$0xf] %vm4058_vm12, %v4474_v63  ;;  %v4472_v45 = vpack.c.bf16 %v3899_v43, %v3899_v43  ;;  %v4535_v43 = vunpack.c.h.bf16 %v4574_v0 }
 0x3bc   : > { %4060 = vst.msk [vmem:[%s6922_s9 + $0x4] sm:$0xf] %vm4058_vm12, %v4472_v45 }
 0x3bd   : > { %v5235_v25 = vpop.f32.mrf.mxu0 }
 0x3be   : > { %v3732_v22 = vadd.f32 %v5235_v25, %v6913_v5  ;;  %v4531_v25 = vunpack.c.h.bf16 %v4573_v34 }
 0x3bf   : > { %v3723_v41 = vpop.f32.mrf.mxu0 }
 0x3c0   : > { %v3872_v24 = vadd.f32 %v4518_v56, %v3732_v22  ;;  %v3724_v62 = vadd.f32 %v6913_v5, %v3723_v41 }
 0x3c1   : > { %v5236_v1 = vpop.f32.mrf.mxu0 }
 0x3c2   : > { %v3904_v2 = vmax.f32 %v3872_v24, 0.0  ;;  %v3870_v39 = vadd.f32 %v4514_v54, %v3724_v62  ;;  %v3735_v46 = vadd.f32 %v5236_v1, %v6913_v5 }
 0x3c3   : > { %v3726_v28 = vpop.f32.mrf.mxu0 }
 0x3c4   : > { %v4477_v61 = vpack.c.bf16 %v3904_v2, %v3904_v2  ;;  %v3902_v52 = vmax.f32 %v3870_v39, 0.0  ;;  %v3873_v13 = vadd.f32 %v4519_v53, %v3735_v46  ;;  %v3727_v18 = vadd.f32 %v6913_v5, %v3726_v28 }
 0x3c6   : > { %4065 = vst.msk [vmem:[%s6922_s9 + $0x18] sm:$0xf] %vm4058_vm12, %v4477_v61  ;;  %v4475_v58 = vpack.c.bf16 %v3902_v52, %v3902_v52  ;;  %v3905_v10 = vmax.f32 %v3873_v13, 0.0  ;;  %v3871_v30 = vadd.f32 %v4515_v27, %v3727_v18  ;;  %v4576_v27 = vld [vmem:[%s5799_s21 + $0x48] sm:$0xff]   ;;  %v4575_v61 = vld [vmem:[%s5799_s21 + $0x40] sm:$0xff]  }
 0x3c7   : > { %v4542_v52 = vunpack.c.l.bf16 %v4576_v27 }
 0x3c8   : > { %4063 = vst.msk [vmem:[%s6922_s9 + $0x10] sm:$0xf] %vm4058_vm12, %v4475_v58  ;;  %v4478_v38 = vpack.c.bf16 %v3905_v10, %v3905_v10  ;;  %v3903_v14 = vmax.f32 %v3871_v30, 0.0  ;;  %v4538_v58 = vunpack.c.l.bf16 %v4575_v61 }
 0x3ca   : > { %4066 = vst.msk [vmem:[%s6922_s9 + $0x1c] sm:$0xf] %vm4058_vm12, %v4478_v38  ;;  %v4476_v17 = vpack.c.bf16 %v3903_v14, %v3903_v14  ;;  %v4543_v14 = vunpack.c.h.bf16 %v4576_v27 }
 0x3cc   : > { %4064 = vst.msk [vmem:[%s6922_s9 + $0x14] sm:$0xf] %vm4058_vm12, %v4476_v17 }
 0x3cd   : > { %v5239_v11 = vpop.f32.mrf.mxu0 }
 0x3ce   : > { %v3748_v48 = vadd.f32 %v5239_v11, %v6913_v5  ;;  %v4539_v11 = vunpack.c.h.bf16 %v4575_v61 }
 0x3cf   : > { %v3739_v35 = vpop.f32.mrf.mxu0 }
 0x3d0   : > { %v3876_v44 = vadd.f32 %v4526_v59, %v3748_v48  ;;  %v3740_v29 = vadd.f32 %v6913_v5, %v3739_v35 }
 0x3d1   : > { %v5240_v4 = vpop.f32.mrf.mxu0 }
 0x3d2   : > { %v3908_v19 = vmax.f32 %v3876_v44, 0.0  ;;  %v3874_v15 = vadd.f32 %v4522_v16, %v3740_v29  ;;  %v3751_v33 = vadd.f32 %v5240_v4, %v6913_v5 }
 0x3d3   : > { %v3742_v51 = vpop.f32.mrf.mxu0 }
 0x3d4   : > { %v4481_v26 = vpack.c.bf16 %v3908_v19, %v3908_v19  ;;  %v3906_v8 = vmax.f32 %v3874_v15, 0.0  ;;  %v3877_v3 = vadd.f32 %v4527_v6, %v3751_v33  ;;  %v3743_v57 = vadd.f32 %v6913_v5, %v3742_v51 }
 0x3d6   : > { %4069 = vst.msk [vmem:[%s6922_s9 + $0x28] sm:$0xf] %vm4058_vm12, %v4481_v26  ;;  %v4479_v12 = vpack.c.bf16 %v3906_v8, %v3906_v8  ;;  %v3909_v50 = vmax.f32 %v3877_v3, 0.0  ;;  %v3875_v31 = vadd.f32 %v4523_v42, %v3743_v57  ;;  %v4578_v42 = vld [vmem:[%s5799_s21 + $0x58] sm:$0xff]   ;;  %v4577_v26 = vld [vmem:[%s5799_s21 + $0x50] sm:$0xff]  }
 0x3d7   : > { %v4550_v8 = vunpack.c.l.bf16 %v4578_v42 }
 0x3d8   : > { %4067 = vst.msk [vmem:[%s6922_s9 + $0x20] sm:$0xf] %vm4058_vm12, %v4479_v12  ;;  %v4482_v55 = vpack.c.bf16 %v3909_v50, %v3909_v50  ;;  %v3907_v47 = vmax.f32 %v3875_v31, 0.0  ;;  %v4546_v12 = vunpack.c.l.bf16 %v4577_v26 }
 0x3da   : > { %4070 = vst.msk [vmem:[%s6922_s9 + $0x2c] sm:$0xf] %vm4058_vm12, %v4482_v55  ;;  %v4480_v23 = vpack.c.bf16 %v3907_v47, %v3907_v47  ;;  %v4551_v47 = vunpack.c.h.bf16 %v4578_v42 }
 0x3dc   : > { %4068 = vst.msk [vmem:[%s6922_s9 + $0x24] sm:$0xf] %vm4058_vm12, %v4480_v23 }
 0x3dd   : > { %v5243_v9 = vpop.f32.mrf.mxu0 }
 0x3de   : > { %v3764_v32 = vadd.f32 %v5243_v9, %v6913_v5  ;;  %v4547_v9 = vunpack.c.h.bf16 %v4577_v26 }
 0x3df   : > { %v3755_v49 = vpop.f32.mrf.mxu0 }
 0x3e0   : > { %v3880_v37 = vadd.f32 %v4534_v60, %v3764_v32  ;;  %v3756_v63 = vadd.f32 %v6913_v5, %v3755_v49 }
 0x3e1   : > { %v5244_v20 = vpop.f32.mrf.mxu0 }
 0x3e2   : > { %v3912_v45 = vmax.f32 %v3880_v37, 0.0  ;;  %v3878_v21 = vadd.f32 %v4530_v36, %v3756_v63  ;;  %v3767_v56 = vadd.f32 %v5244_v20, %v6913_v5 }
 0x3e3   : > { %v3758_v22 = vpop.f32.mrf.mxu0 }
 0x3e4   : > { %v4485_v54 = vpack.c.bf16 %v3912_v45, %v3912_v45  ;;  %v3910_v41 = vmax.f32 %v3878_v21, 0.0  ;;  %v3881_v24 = vadd.f32 %v4535_v43, %v3767_v56  ;;  %v3759_v62 = vadd.f32 %v6913_v5, %v3758_v22 }
 0x3e6   : > { %4073 = vst.msk [vmem:[%s6922_s9 + $0x38] sm:$0xf] %vm4058_vm12, %v4485_v54  ;;  %v4483_v53 = vpack.c.bf16 %v3910_v41, %v3910_v41  ;;  %v3913_v1 = vmax.f32 %v3881_v24, 0.0  ;;  %v3879_v2 = vadd.f32 %v4531_v25, %v3759_v62  ;;  %v4580_v25 = vld [vmem:[%s5799_s21 + $0x68] sm:$0xff]   ;;  %v4579_v54 = vld [vmem:[%s5799_s21 + $0x60] sm:$0xff]  }
 0x3e7   : > { %v4558_v41 = vunpack.c.l.bf16 %v4580_v25 }
 0x3e8   : > { %4071 = vst.msk [vmem:[%s6922_s9 + $0x30] sm:$0xf] %vm4058_vm12, %v4483_v53  ;;  %v4486_v39 = vpack.c.bf16 %v3913_v1, %v3913_v1  ;;  %v3911_v46 = vmax.f32 %v3879_v2, 0.0  ;;  %v4554_v53 = vunpack.c.l.bf16 %v4579_v54 }
 0x3ea   : > { %4074 = vst.msk [vmem:[%s6922_s9 + $0x3c] sm:$0xf] %vm4058_vm12, %v4486_v39  ;;  %v4484_v28 = vpack.c.bf16 %v3911_v46, %v3911_v46  ;;  %v4559_v46 = vunpack.c.h.bf16 %v4580_v25 }
 0x3ec   : > { %4072 = vst.msk [vmem:[%s6922_s9 + $0x34] sm:$0xf] %vm4058_vm12, %v4484_v28 }
 0x3ed   : > { %v5247_v13 = vpop.f32.mrf.mxu0 }
 0x3ee   : > { %v3780_v18 = vadd.f32 %v5247_v13, %v6913_v5  ;;  %v4555_v13 = vunpack.c.h.bf16 %v4579_v54 }
 0x3ef   : > { %v3771_v10 = vpop.f32.mrf.mxu0 }
 0x3f0   : > { %v3884_v30 = vadd.f32 %v4542_v52, %v3780_v18  ;;  %v3772_v38 = vadd.f32 %v6913_v5, %v3771_v10 }
 0x3f1   : > { %v5248_v7 = vpop.f32.mrf.mxu0 }
 0x3f2   : > { %v3916_v17 = vmax.f32 %v3884_v30, 0.0  ;;  %v3882_v40 = vadd.f32 %v4538_v58, %v3772_v38  ;;  %v3783_v59 = vadd.f32 %v5248_v7, %v6913_v5 }
 0x3f3   : > { %v3774_v48 = vpop.f32.mrf.mxu0 }
 0x3f4   : > { %v4489_v16 = vpack.c.bf16 %v3916_v17, %v3916_v17  ;;  %v3914_v35 = vmax.f32 %v3882_v40, 0.0  ;;  %v3885_v44 = vadd.f32 %v4543_v14, %v3783_v59  ;;  %v3775_v29 = vadd.f32 %v6913_v5, %v3774_v48 }
 0x3f6   : > { %4077 = vst.msk [vmem:[%s6922_s9 + $0x48] sm:$0xf] %vm4058_vm12, %v4489_v16  ;;  %v4487_v6 = vpack.c.bf16 %v3914_v35, %v3914_v35  ;;  %v3917_v4 = vmax.f32 %v3885_v44, 0.0  ;;  %v3883_v19 = vadd.f32 %v4539_v11, %v3775_v29  ;;  %v4582_v11 = vld [vmem:[%s5799_s21 + $0x78] sm:$0xff]   ;;  %v4581_v16 = vld [vmem:[%s5799_s21 + $0x70] sm:$0xff]   ;;  %s4108_s21 = sshll.u32 %s6922_s9, 4  ;;  %s7033_s21 = int_to_ptr.vmem [resolvable:$true] %s4108_s21 }
 0x3f7   : > { %v4566_v35 = vunpack.c.l.bf16 %v4582_v11  ;;  %s5538_s17 = scalar_lea.vmem %s7033_s21, 2048  ;;  %p5545_p0 = scmp.lt.s32.totalorder %s7033_s21, %s5543_s22 }
 0x3f8   : > { %4075 = vst.msk [vmem:[%s6922_s9 + $0x40] sm:$0xf] %vm4058_vm12, %v4487_v6  ;;  %v4490_v15 = vpack.c.bf16 %v3917_v4, %v3917_v4  ;;  %v3915_v33 = vmax.f32 %v3883_v19, 0.0  ;;  %v4562_v6 = vunpack.c.l.bf16 %v4581_v16  ;;  %p5539_p1 = scmp.ne.s32.totalorder %s7033_s21, %s5538_s17  ;;  %p5546_p2 = scmp.lt.s32.totalorder %s5544_s10, %s5538_s17 }
 0x3fa   : > { %4078 = vst.msk [vmem:[%s6922_s9 + $0x4c] sm:$0xf] %vm4058_vm12, %v4490_v15  ;;  %v4488_v51 = vpack.c.bf16 %v3915_v33, %v3915_v33  ;;  %v4567_v33 = vunpack.c.h.bf16 %v4582_v11  ;;  %p5540_p8 = pnand %p5539_p1, %p5762_p13  ;;  %p5547_p3 = por %p5546_p2, %p5545_p0 }
 0x3fc   : > { %4076 = vst.msk [vmem:[%s6922_s9 + $0x44] sm:$0xf] %vm4058_vm12, %v4488_v51  ;;  %p5541_p12 = pneg %p5540_p8 }
 0x3fd   : > { %v5251_v3 = vpop.f32.mrf.mxu0 }
 0x3fe   : > { %v3796_v57 = vadd.f32 %v5251_v3, %v6913_v5  ;;  %v4563_v3 = vunpack.c.h.bf16 %v4581_v16  ;;  %p5548_p5 = pnand %p5547_p3, %p5541_p12 }
 0x3ff   : > { %v3787_v50 = vpop.f32.mrf.mxu0 }
 0x400   : > { %v3888_v31 = vadd.f32 %v4550_v8, %v3796_v57  ;;  %v3788_v55 = vadd.f32 %v6913_v5, %v3787_v50 }
 0x401   : > { %v5252_v0 = vpop.f32.mrf.mxu0 }
 0x402   : > { %v3920_v23 = vmax.f32 %v3888_v31, 0.0  ;;  %v3886_v34 = vadd.f32 %v4546_v12, %v3788_v55  ;;  %v3799_v60 = vadd.f32 %v5252_v0, %v6913_v5 }
 0x403   : > { %v3790_v32 = vpop.f32.mrf.mxu0 }
 0x404   : > { %v4493_v36 = vpack.c.bf16 %v3920_v23, %v3920_v23  ;;  %v3918_v49 = vmax.f32 %v3886_v34, 0.0  ;;  %v3889_v37 = vadd.f32 %v4551_v47, %v3799_v60  ;;  %v3791_v63 = vadd.f32 %v6913_v5, %v3790_v32 }
 0x406   : > { %4081 = vst.msk [vmem:[%s6922_s9 + $0x58] sm:$0xf] %vm4058_vm12, %v4493_v36  ;;  %v4491_v43 = vpack.c.bf16 %v3918_v49, %v3918_v49  ;;  %v3921_v20 = vmax.f32 %v3889_v37, 0.0  ;;  %v3887_v45 = vadd.f32 %v4547_v9, %v3791_v63 }
 0x408   : > { %4079 = vst.msk [vmem:[%s6922_s9 + $0x50] sm:$0xf] %vm4058_vm12, %v4491_v43  ;;  %v4494_v21 = vpack.c.bf16 %v3921_v20, %v3921_v20  ;;  %v3919_v56 = vmax.f32 %v3887_v45, 0.0 }
 0x40a   : > { %4082 = vst.msk [vmem:[%s6922_s9 + $0x5c] sm:$0xf] %vm4058_vm12, %v4494_v21  ;;  %v4492_v22 = vpack.c.bf16 %v3919_v56, %v3919_v56 }
 0x40c   : > { %4080 = vst.msk [vmem:[%s6922_s9 + $0x54] sm:$0xf] %vm4058_vm12, %v4492_v22 }
 0x40d   : > { %v5255_v24 = vpop.f32.mrf.mxu0 }
 0x40e   : > { %v3812_v62 = vadd.f32 %v5255_v24, %v6913_v5 }
 0x40f   : > { %v3803_v1 = vpop.f32.mrf.mxu0 }
 0x410   : > { %v3892_v2 = vadd.f32 %v4558_v41, %v3812_v62  ;;  %v3804_v39 = vadd.f32 %v6913_v5, %v3803_v1 }
 0x411   : > { %v5256_v27 = vpop.f32.mrf.mxu0 }
 0x412   : > { %v3924_v28 = vmax.f32 %v3892_v2, 0.0  ;;  %v3890_v61 = vadd.f32 %v4554_v53, %v3804_v39  ;;  %v3815_v52 = vadd.f32 %v5256_v27, %v6913_v5 }
 0x413   : > { %v3806_v18 = vpop.f32.mrf.mxu0 }
 0x414   : > { %v4497_v58 = vpack.c.bf16 %v3924_v28, %v3924_v28  ;;  %v3922_v10 = vmax.f32 %v3890_v61, 0.0  ;;  %v3893_v30 = vadd.f32 %v4559_v46, %v3815_v52  ;;  %v3807_v38 = vadd.f32 %v6913_v5, %v3806_v18 }
 0x416   : > { %4085 = vst.msk [vmem:[%s6922_s9 + $0x68] sm:$0xf] %vm4058_vm12, %v4497_v58  ;;  %v4495_v14 = vpack.c.bf16 %v3922_v10, %v3922_v10  ;;  %v3925_v7 = vmax.f32 %v3893_v30, 0.0  ;;  %v3891_v17 = vadd.f32 %v4555_v13, %v3807_v38 }
 0x418   : > { %4083 = vst.msk [vmem:[%s6922_s9 + $0x60] sm:$0xf] %vm4058_vm12, %v4495_v14  ;;  %v4498_v40 = vpack.c.bf16 %v3925_v7, %v3925_v7  ;;  %v3923_v59 = vmax.f32 %v3891_v17, 0.0 }
 0x41a   : > { %4086 = vst.msk [vmem:[%s6922_s9 + $0x6c] sm:$0xf] %vm4058_vm12, %v4498_v40  ;;  %v4496_v48 = vpack.c.bf16 %v3923_v59, %v3923_v59 }
 0x41c   : > { %4084 = vst.msk [vmem:[%s6922_s9 + $0x64] sm:$0xf] %vm4058_vm12, %v4496_v48 }
 0x41d   : > { %v5259_v44 = vpop.f32.mrf.mxu0 }
 0x41e   : > { %v3828_v29 = vadd.f32 %v5259_v44, %v6913_v5 }
 0x41f   : > { %v3819_v4 = vpop.f32.mrf.mxu0 }
 0x420   : > { %v3896_v19 = vadd.f32 %v4566_v35, %v3828_v29  ;;  %v3820_v15 = vadd.f32 %v6913_v5, %v3819_v4 }
 0x421   : > { %v5260_v42 = vpop.f32.mrf.mxu0 }
 0x422   : > { %v3928_v51 = vmax.f32 %v3896_v19, 0.0  ;;  %v3894_v26 = vadd.f32 %v4562_v6, %v3820_v15  ;;  %v3831_v8 = vadd.f32 %v5260_v42, %v6913_v5 }
 0x423   : > { %v3822_v57 = vpop.f32.mrf.mxu0 }
 0x424   : > { %v4501_v12 = vpack.c.bf16 %v3928_v51, %v3928_v51  ;;  %v3926_v50 = vmax.f32 %v3894_v26, 0.0  ;;  %v3897_v31 = vadd.f32 %v4567_v33, %v3831_v8  ;;  %v3823_v55 = vadd.f32 %v6913_v5, %v3822_v57 }
 0x426   : > { %4089 = vst.msk [vmem:[%s6922_s9 + $0x78] sm:$0xf] %vm4058_vm12, %v4501_v12  ;;  %v4499_v47 = vpack.c.bf16 %v3926_v50, %v3926_v50  ;;  %v3929_v0 = vmax.f32 %v3897_v31, 0.0  ;;  %v3895_v23 = vadd.f32 %v4563_v3, %v3823_v55 }
 0x428   : > { %4087 = vst.msk [vmem:[%s6922_s9 + $0x70] sm:$0xf] %vm4058_vm12, %v4499_v47  ;;  %v4502_v34 = vpack.c.bf16 %v3929_v0, %v3929_v0  ;;  %v3927_v60 = vmax.f32 %v3895_v23, 0.0 }
 0x42a   : > { %4090 = vst.msk [vmem:[%s6922_s9 + $0x7c] sm:$0xf] %vm4058_vm12, %v4502_v34  ;;  %v4500_v5 = vpack.c.bf16 %v3927_v60, %v3927_v60 }
 0x42c   : > { %4088 = vst.msk [vmem:[%s6922_s9 + $0x74] sm:$0xf] %vm4058_vm12, %v4500_v5 }
 0x42d   : > { %5551 = shalt.err (!%p5548_p5)
}
 0x42e   : > { %s5552_s14 = scalar_lea.hbm %s7031_s13, 2048  ;;  %s5556_s3 = scalar_lea.hbm %s7092_s7, 4096 }
 0x42f   : > { %p5553_p7 = scmp.ne.s32.totalorder %s7031_s13, %s5552_s14  ;;  %p5557_p9 = scmp.lt.s32.totalorder %s7031_s13, %s7092_s7 }
 0x430   : > { %p5558_p11 = scmp.lt.s32.totalorder %s5556_s3, %s5552_s14 }
 0x431   : > { %p5554_p4 = pnand %p5553_p7, %p5762_p13 }
 0x432   : > { %p5559_p10 = por %p5558_p11, %p5557_p9 }
 0x433   : > { %p5555_p6 = pneg %p5554_p4 }
 0x435   : > { %p5560_p1 = pnand %p5559_p10, %p5555_p6 }
 0x437   : > { %5563 = shalt.err (!%p5560_p1)
}
 0x438   : > { %s5630_s9 = smov 64   ;;  %s5631_s28 = smov 4  }
 0x439   : > { %5271 = dma.vmem_to_hbm [thread:$0]  (%p5762_p13), %s7033_s21, 2048, %s7031_s13, %s4092_s27, %s5630_s9, %s5630_s9, %s5631_s28  }
 0x43a PF: > { %s7135_s11 = sld [smem:[#allocation13_spill]]  ;;  %s4123_s12 = sand.u32 1, %s5602_s24  }
 0x43b   : > { %p7137_p12 = scmp.ge.s32.totalorder %s5622_s29, 2  ;;  %s4124_s17 = scalar_lea.sflag [#allocation5], %s4123_s12 }
 0x440   : > { %p7136_p8 = scmp.ne.s32.totalorder %s7135_s11, 0 }
 0x442   : > { %p5282_p0 = pnand %p7137_p12, %p7136_p8 }
 0x444   : > { %p5283_p2 = pneg %p5282_p0 }
 0x446   : > { %5597 = dma.done.wait (%p5283_p2), %s4124_s17, 2048  }
 0x447   : > { %5599 = vsyncadd (%p5283_p2), %s4124_s17, 4294965248  ;;  %s24_s29 = sadd.s32 1, %s5622_s29   ;;  %s7138_s27 = sld [smem:[#allocation12_spill]] }
 0x448   : > { %p21_p3 = scmp.ge.s32.totalorder %s24_s29, 4   ;;  %s7139_s28 = sld [smem:[#allocation14_spill]] }
 0x449   : > { %s7140_s24 = smov %s5606_s25  ;;  %s7141_s25 = smov %s5610_s26 }
 0x44a   : > { %s7142_s26 = smov %s5771_s18  ;;  %23 = sbr.rel (!%p21_p3) target bundleno = 9 (0x9), region = 103 }
 0x44f   :  { %4129 = vsyncpa [#allocation4], 1 }
 0x450   :  { %4131 = vsyncpa [#allocation4 + $0x1], 1 }
 0x451   :  { %4132 = vsyncpa [#allocation7], 1 }
 0x452   :  { %4133 = vsyncpa [#allocation5], 1 }
 0x453   :  { %4135 = vsyncpa [#allocation5 + $0x1], 1 }

</bundles_post_ra>
